<compile_context>
chip_gen: v5e
topology: v5e:2x2
jax: 0.10.0
libtpu: 0.0.40
codegen_flags: <defaults>
</compile_context>

<pallas_src>
import functools

import jax
import jax.numpy as jnp
from jax.experimental import pallas as pl
from jax.experimental.pallas import tpu as pltpu


LATENT_DIM = 50
CSHAPE = (128, 7, 7)
X_SHAPE = (1, 28, 28)
IELS = CSHAPE[0] * CSHAPE[1] * CSHAPE[2]   # 6272


def _round_up(x, m):
    return ((x + m - 1) // m) * m


# ----------------------------------------------------------------------------
# Pallas kernel: grouped matmul (K fully resident) + fused bias / activation
# ----------------------------------------------------------------------------
def _mm_bias_act_kernel(x_ref, w_ref, b_ref, o_ref, *, activation):
    out = jnp.dot(x_ref[...], w_ref[...], preferred_element_type=jnp.float32)
    out = out + b_ref[...]
    if activation == "relu":
        out = jnp.maximum(out, 0.0)
    elif activation == "sigmoid":
        # exp on the EUP + approx reciprocal (keeps the divide off the VALU);
        # clamp to guarantee the exact [0, 1] sigmoid range.
        out = pl.reciprocal(1.0 + jnp.exp(-out), approx=True)
        out = jnp.clip(out, 0.0, 1.0)
    o_ref[...] = out.astype(o_ref.dtype)


def batched_matmul_bias(x, w, b, activation="none", tm=None, tn=None):
    """out[g] = act(x[g] @ w[g] + b[g]).

    x: (G, M, K)    -- M padded here to a multiple of 8 only; K padded to match w.
    w: (G, Kp, Np)  -- pre-padded at init (Kp/Np lane-aligned).
    b: (G, 1, Np)
    Returns (G, M, Np) float32 (caller slices N if it was padded).
    """
    G, M, K = x.shape
    _, Kp, Np = w.shape
    Mp = _round_up(M, 8)                      # f32 sublane minimum, NOT 128
    tm = Mp if tm is None else tm
    tn = Np if tn is None else tn
    assert Mp % tm == 0 and Np % tn == 0 and Kp >= K

    if x.dtype != w.dtype:                    # e.g. bf16 weights -> bf16 MXU inputs
        x = x.astype(w.dtype)
    if (Mp, Kp) != (M, K):
        x = jnp.pad(x, ((0, 0), (0, Mp - M), (0, Kp - K)))

    kern = functools.partial(_mm_bias_act_kernel, activation=activation)
    out = pl.pallas_call(
        kern,
        out_shape=jax.ShapeDtypeStruct((G, Mp, Np), jnp.float32),
        grid_spec=pltpu.PrefetchScalarGridSpec(
            num_scalar_prefetch=0,
            grid=(G, Mp // tm, Np // tn),
            in_specs=[
                pl.BlockSpec((None, tm, Kp), lambda g, i, j: (g, i, 0)),
                pl.BlockSpec((None, Kp, tn), lambda g, i, j: (g, 0, j)),
                pl.BlockSpec((None, 1, tn), lambda g, i, j: (g, 0, j)),
            ],
            out_specs=pl.BlockSpec((None, tm, tn), lambda g, i, j: (g, i, j)),
        ),
        compiler_params=pltpu.CompilerParams(
            dimension_semantics=("parallel", "parallel", "parallel")),
    )(x, w, b)
    return out[:, :M, :]


# ----------------------------------------------------------------------------
# ConvTranspose2d(k=4, stride=2, padding=1) via sub-pixel decomposition:
# output phase (p, q) = (oh % 2, ow % 2) only touches kernel taps
# _PHASE_TAPS[p] x _PHASE_TAPS[q]; the other 12 taps hit structural zeros of
# the stride-2 upsample, so K_eff = 4*C_in instead of 16*C_in.
# ----------------------------------------------------------------------------
_PHASE_TAPS = ((3, 1), (2, 0))   # taps[p][a] pairs with padded input row i + p + a


def prep_conv_transpose_params(w_torch, b):
    """w_torch: PyTorch ConvTranspose2d weight layout (C_in, C_out, 4, 4)."""
    C_in, C_out, kH, kW = w_torch.shape
    assert (kH, kW) == (4, 4)
    Np = _round_up(C_out, 128)
    w_phases = []
    for p in range(2):
        for q in range(2):
            blocks = [w_torch[:, :, _PHASE_TAPS[p][a], _PHASE_TAPS[q][c]]
                      for a in range(2) for c in range(2)]
            wm = jnp.concatenate(blocks, axis=0)                  # (4*C_in, C_out)
            w_phases.append(jnp.pad(wm, ((0, 0), (0, Np - C_out))))
    w_phases = jnp.stack(w_phases, axis=0).astype(jnp.float32)    # (4, 4*C_in, Np)
    b_row = jnp.pad(b.astype(jnp.float32), (0, Np - C_out)).reshape(1, 1, Np)
    b_phases = jnp.tile(b_row, (4, 1, 1))                         # (4, 1, Np)
    return w_phases, b_phases


def conv_transpose2d(x_nhwc, w_phases, b_phases, n_out, activation="none"):
    B, H, W, C = x_nhwc.shape
    xp = jnp.pad(x_nhwc, ((0, 0), (1, 1), (1, 1), (0, 0)))
    phase_patches = []
    for p in range(2):
        for q in range(2):
            cols = [xp[:, p + a:p + a + H, q + c:q + c + W, :]
                    for a in range(2) for c in range(2)]
            phase_patches.append(
                jnp.concatenate(cols, axis=-1).reshape(B * H * W, 4 * C))
    patches = jnp.stack(phase_patches, axis=0)                    # (4, B*H*W, 4*C)

    y = batched_matmul_bias(patches, w_phases, b_phases, activation=activation)
    y = y[:, :, :n_out]                                           # drop N padding
    y = y.reshape(2, 2, B, H, W, n_out)
    y = jnp.transpose(y, (2, 3, 0, 4, 1, 5)).reshape(B, 2 * H, 2 * W, n_out)
    return y


# ----------------------------------------------------------------------------
# BatchNorm (training-mode batch statistics), tiny plain-JAX glue (XLA fuses it)
# ----------------------------------------------------------------------------
def batchnorm(x, gamma, beta, axes, eps=1e-5):
    mean = jnp.mean(x, axis=axes, keepdims=True)
    var = jnp.var(x, axis=axes, keepdims=True)    # biased, as PyTorch normalizes
    return (x - mean) * jax.lax.rsqrt(var + eps) * gamma + beta


# ----------------------------------------------------------------------------
# Generator parameters (pre-laid-out at init) + forward
# ----------------------------------------------------------------------------
def init_generator_params(key):
    k0, k1, k2, k3 = jax.random.split(key, 4)
    std = 0.02
    fc1_w = jax.random.normal(k0, (LATENT_DIM, 1024), jnp.float32) * std
    fc2_w = jax.random.normal(k1, (1024, IELS), jnp.float32) * std
    dc1_w = jax.random.normal(k2, (128, 64, 4, 4), jnp.float32) * std   # (C_in,C_out,kH,kW)
    dc2_w = jax.random.normal(k3, (64, X_SHAPE[0], 4, 4), jnp.float32) * std

    params = {
        # K padded once at init (50 -> 128); shape (1, Kp, N) for the grouped kernel.
        "fc1_wp": jnp.pad(fc1_w, ((0, 128 - LATENT_DIM), (0, 0)))[None],
        "fc1_bp": jnp.zeros((1, 1, 1024), jnp.float32),
        # fc2 weight is the dominant HBM read of the whole forward -> bf16.
        "fc2_wp": fc2_w.astype(jnp.bfloat16)[None],
        "fc2_bp": jnp.zeros((1, 1, IELS), jnp.float32),
        "bn1_g": jnp.ones((IELS,), jnp.float32),
        "bn1_b": jnp.zeros((IELS,), jnp.float32),
        "bn2_g": jnp.ones((64,), jnp.float32),
        "bn2_b": jnp.zeros((64,), jnp.float32),
    }
    params["dc1_wp"], params["dc1_bp"] = prep_conv_transpose_params(
        dc1_w, jnp.zeros((64,), jnp.float32))
    params["dc2_wp"], params["dc2_bp"] = prep_conv_transpose_params(
        dc2_w, jnp.zeros((X_SHAPE[0],), jnp.float32))
    return params


def generator_forward(params, z):
    B = z.shape[0]

    # Linear(50 -> 1024) + ReLU (fused epilogue).
    h = batched_matmul_bias(z[None], params["fc1_wp"], params["fc1_bp"],
                            activation="relu", tn=512)[0]

    # Linear(1024 -> 6272): bf16 weights, f32 accumulation; tn=896 (6272 = 7*896).
    h = batched_matmul_bias(h[None], params["fc2_wp"], params["fc2_bp"],
                            activation="none", tn=896)[0]

    # BatchNorm1d + ReLU (elementwise glue over (B, 6272)).
    h = batchnorm(h, params["bn1_g"], params["bn1_b"], axes=(0,))
    h = jnp.maximum(h, 0.0)

    # Reshape(128, 7, 7) [NCHW] -> NHWC for the conv path.
    h = h.reshape(B, CSHAPE[0], CSHAPE[1], CSHAPE[2]).transpose(0, 2, 3, 1)

    # ConvTranspose2d(128->64, 4, s2, p1) + BatchNorm2d + ReLU.
    h = conv_transpose2d(h, params["dc1_wp"], params["dc1_bp"], n_out=64)
    h = batchnorm(h, params["bn2_g"], params["bn2_b"], axes=(0, 1, 2))
    h = jnp.maximum(h, 0.0)

    # ConvTranspose2d(64->1, 4, s2, p1) + Sigmoid (fused epilogue).
    h = conv_transpose2d(h, params["dc2_wp"], params["dc2_bp"],
                         n_out=X_SHAPE[0], activation="sigmoid")

    # NHWC -> NCHW, final view to (B, *x_shape).
    return h.transpose(0, 3, 1, 2).reshape(B, *X_SHAPE)


if __name__ == "__main__":
    key = jax.random.PRNGKey(0)
    pkey, zkey = jax.random.split(key)
    params = init_generator_params(pkey)

    batch = 2
    z = jax.random.normal(zkey, (batch, LATENT_DIM), jnp.float32)

    fwd = jax.jit(generator_forward)
    img = jax.block_until_ready(fwd(params, z))

    assert img.shape == (batch, *X_SHAPE), img.shape
    assert jnp.all(jnp.isfinite(img))
    assert jnp.all((img >= 0.0) & (img <= 1.0))   # sigmoid output range
    print("KERNEL_OK")
</pallas_src>

<mosaic_0001>
module attributes {stable_mosaic.version = 11 : i64} {
  func.func @_mm_bias_act_kernel(%arg0: i32, %arg1: i32, %arg2: i32, %arg3: memref<1x8x1024xbf16, #tpu.memory_space<vmem>>, %arg4: memref<1x1024x896xbf16, #tpu.memory_space<vmem>>, %arg5: memref<1x1x896xf32, #tpu.memory_space<vmem>>, %arg6: memref<1x8x896xf32, #tpu.memory_space<vmem>>) attributes {dimension_semantics = [#tpu.dimension_semantics<parallel>, #tpu.dimension_semantics<parallel>, #tpu.dimension_semantics<parallel>], iteration_bounds = array<i64: 1, 1, 7>, scalar_prefetch = 0 : i64, scratch_operands = 0 : i64, tpu.core_type = #tpu.core_type<tc>, window_params = [{transform_indices = @transform_0, window_bounds = array<i64: 1, 8, 1024>}, {transform_indices = @transform_1, window_bounds = array<i64: 1, 1024, 896>}, {transform_indices = @transform_2, window_bounds = array<i64: 1, 1, 896>}, {transform_indices = @transform_3, window_bounds = array<i64: 1, 8, 896>}]} {
    %c0 = arith.constant 0 : index
    %c0_0 = arith.constant 0 : index
    %c0_1 = arith.constant 0 : index
    %0 = vector.load %arg3[%c0, %c0_0, %c0_1] : memref<1x8x1024xbf16, #tpu.memory_space<vmem>>, vector<1x8x1024xbf16>
    %1 = vector.shape_cast %0 : vector<1x8x1024xbf16> to vector<8x1024xbf16>
    %c0_2 = arith.constant 0 : index
    %c0_3 = arith.constant 0 : index
    %c0_4 = arith.constant 0 : index
    %2 = vector.load %arg4[%c0_2, %c0_3, %c0_4] : memref<1x1024x896xbf16, #tpu.memory_space<vmem>>, vector<1x1024x896xbf16>
    %3 = vector.shape_cast %2 : vector<1x1024x896xbf16> to vector<1024x896xbf16>
    %cst = arith.constant dense<0.000000e+00> : vector<8x896xf32>
    %4 = tpu.matmul %1, %3, %cst {dimension_numbers = #tpu.dot_dimension_numbers<[1], [0], [0], [1], [0, 0, 1, 1], [], []>} : vector<8x1024xbf16>, vector<1024x896xbf16>, vector<8x896xf32> -> vector<8x896xf32>
    %c0_5 = arith.constant 0 : index
    %c0_6 = arith.constant 0 : index
    %c0_7 = arith.constant 0 : index
    %5 = vector.load %arg5[%c0_5, %c0_6, %c0_7] : memref<1x1x896xf32, #tpu.memory_space<vmem>>, vector<1x1x896xf32>
    %6 = vector.shape_cast %5 : vector<1x1x896xf32> to vector<1x896xf32>
    %7 = vector.broadcast %6 : vector<1x896xf32> to vector<8x896xf32>
    %8 = arith.addf %4, %7 : vector<8x896xf32>
    %c0_8 = arith.constant 0 : index
    %c0_9 = arith.constant 0 : index
    %c0_10 = arith.constant 0 : index
    %9 = vector.load %arg6[%c0_8, %c0_9, %c0_10] : memref<1x8x896xf32, #tpu.memory_space<vmem>>, vector<1x8x896xf32>
    %10 = vector.shape_cast %9 : vector<1x8x896xf32> to vector<8x896xf32>
    %11 = vector.shape_cast %8 : vector<8x896xf32> to vector<1x8x896xf32>
    tpu.vector_store %arg6[%c0_8, %c0_9, %c0_10], %11 {strides = array<i32>} : memref<1x8x896xf32, #tpu.memory_space<vmem>>, vector<1x8x896xf32>,
    return
  }
  func.func @transform_0(%arg0: i32, %arg1: i32, %arg2: i32) -> (i32, i32, i32) {
    %c0_i32 = arith.constant 0 : i32
    %c0_i32_0 = arith.constant 0 : i32
    return %arg0, %arg1, %c0_i32 : i32, i32, i32
  }
  func.func @transform_1(%arg0: i32, %arg1: i32, %arg2: i32) -> (i32, i32, i32) {
    %c0_i32 = arith.constant 0 : i32
    %c0_i32_0 = arith.constant 0 : i32
    return %arg0, %c0_i32, %arg2 : i32, i32, i32
  }
  func.func @transform_2(%arg0: i32, %arg1: i32, %arg2: i32) -> (i32, i32, i32) {
    %c0_i32 = arith.constant 0 : i32
    %c0_i32_0 = arith.constant 0 : i32
    return %arg0, %c0_i32, %arg2 : i32, i32, i32
  }
  func.func @transform_3(%arg0: i32, %arg1: i32, %arg2: i32) -> (i32, i32, i32) {
    %c0_i32 = arith.constant 0 : i32
    return %arg0, %arg1, %arg2 : i32, i32, i32
  }
}

module attributes {stable_mosaic.version = 11 : i64} {
  func.func @_mm_bias_act_kernel(%arg0: i32, %arg1: i32, %arg2: i32, %arg3: memref<1x8x128xf32, #tpu.memory_space<vmem>>, %arg4: memref<1x128x512xf32, #tpu.memory_space<vmem>>, %arg5: memref<1x1x512xf32, #tpu.memory_space<vmem>>, %arg6: memref<1x8x512xf32, #tpu.memory_space<vmem>>) attributes {dimension_semantics = [#tpu.dimension_semantics<parallel>, #tpu.dimension_semantics<parallel>, #tpu.dimension_semantics<parallel>], iteration_bounds = array<i64: 1, 1, 2>, scalar_prefetch = 0 : i64, scratch_operands = 0 : i64, tpu.core_type = #tpu.core_type<tc>, window_params = [{transform_indices = @transform_0, window_bounds = array<i64: 1, 8, 128>}, {transform_indices = @transform_1, window_bounds = array<i64: 1, 128, 512>}, {transform_indices = @transform_2, window_bounds = array<i64: 1, 1, 512>}, {transform_indices = @transform_3, window_bounds = array<i64: 1, 8, 512>}]} {
    %c0 = arith.constant 0 : index
    %c0_0 = arith.constant 0 : index
    %c0_1 = arith.constant 0 : index
    %0 = vector.load %arg3[%c0, %c0_0, %c0_1] : memref<1x8x128xf32, #tpu.memory_space<vmem>>, vector<1x8x128xf32>
    %1 = vector.shape_cast %0 : vector<1x8x128xf32> to vector<8x128xf32>
    %c0_2 = arith.constant 0 : index
    %c0_3 = arith.constant 0 : index
    %c0_4 = arith.constant 0 : index
    %2 = vector.load %arg4[%c0_2, %c0_3, %c0_4] : memref<1x128x512xf32, #tpu.memory_space<vmem>>, vector<1x128x512xf32>
    %3 = vector.shape_cast %2 : vector<1x128x512xf32> to vector<128x512xf32>
    %cst = arith.constant dense<0.000000e+00> : vector<8x512xf32>
    %4 = tpu.matmul %1, %3, %cst {dimension_numbers = #tpu.dot_dimension_numbers<[1], [0], [0], [1], [0, 0, 1, 1], [], []>} : vector<8x128xf32>, vector<128x512xf32>, vector<8x512xf32> -> vector<8x512xf32>
    %c0_5 = arith.constant 0 : index
    %c0_6 = arith.constant 0 : index
    %c0_7 = arith.constant 0 : index
    %5 = vector.load %arg5[%c0_5, %c0_6, %c0_7] : memref<1x1x512xf32, #tpu.memory_space<vmem>>, vector<1x1x512xf32>
    %6 = vector.shape_cast %5 : vector<1x1x512xf32> to vector<1x512xf32>
    %7 = vector.broadcast %6 : vector<1x512xf32> to vector<8x512xf32>
    %8 = arith.addf %4, %7 : vector<8x512xf32>
    %cst_8 = arith.constant 0.000000e+00 : f32
    %9 = vector.broadcast %cst_8 : f32 to vector<8x512xf32>
    %10 = arith.maximumf %8, %9 : vector<8x512xf32>
    %c0_9 = arith.constant 0 : index
    %c0_10 = arith.constant 0 : index
    %c0_11 = arith.constant 0 : index
    %11 = vector.load %arg6[%c0_9, %c0_10, %c0_11] : memref<1x8x512xf32, #tpu.memory_space<vmem>>, vector<1x8x512xf32>
    %12 = vector.shape_cast %11 : vector<1x8x512xf32> to vector<8x512xf32>
    %13 = vector.shape_cast %10 : vector<8x512xf32> to vector<1x8x512xf32>
    tpu.vector_store %arg6[%c0_9, %c0_10, %c0_11], %13 {strides = array<i32>} : memref<1x8x512xf32, #tpu.memory_space<vmem>>, vector<1x8x512xf32>,
    return
  }
  func.func @transform_0(%arg0: i32, %arg1: i32, %arg2: i32) -> (i32, i32, i32) {
    %c0_i32 = arith.constant 0 : i32
    %c0_i32_0 = arith.constant 0 : i32
    return %arg0, %arg1, %c0_i32 : i32, i32, i32
  }
  func.func @transform_1(%arg0: i32, %arg1: i32, %arg2: i32) -> (i32, i32, i32) {
    %c0_i32 = arith.constant 0 : i32
    %c0_i32_0 = arith.constant 0 : i32
    return %arg0, %c0_i32, %arg2 : i32, i32, i32
  }
  func.func @transform_2(%arg0: i32, %arg1: i32, %arg2: i32) -> (i32, i32, i32) {
    %c0_i32 = arith.constant 0 : i32
    %c0_i32_0 = arith.constant 0 : i32
    return %arg0, %c0_i32, %arg2 : i32, i32, i32
  }
  func.func @transform_3(%arg0: i32, %arg1: i32, %arg2: i32) -> (i32, i32, i32) {
    %c0_i32 = arith.constant 0 : i32
    return %arg0, %arg1, %arg2 : i32, i32, i32
  }
}

module attributes {stable_mosaic.version = 11 : i64} {
  func.func @_mm_bias_act_kernel(%arg0: i32, %arg1: i32, %arg2: i32, %arg3: memref<1x104x512xf32, #tpu.memory_space<vmem>>, %arg4: memref<1x512x128xf32, #tpu.memory_space<vmem>>, %arg5: memref<1x1x128xf32, #tpu.memory_space<vmem>>, %arg6: memref<1x104x128xf32, #tpu.memory_space<vmem>>) attributes {dimension_semantics = [#tpu.dimension_semantics<parallel>, #tpu.dimension_semantics<parallel>, #tpu.dimension_semantics<parallel>], iteration_bounds = array<i64: 4, 1, 1>, scalar_prefetch = 0 : i64, scratch_operands = 0 : i64, tpu.core_type = #tpu.core_type<tc>, window_params = [{transform_indices = @transform_0, window_bounds = array<i64: 1, 104, 512>}, {transform_indices = @transform_1, window_bounds = array<i64: 1, 512, 128>}, {transform_indices = @transform_2, window_bounds = array<i64: 1, 1, 128>}, {transform_indices = @transform_3, window_bounds = array<i64: 1, 104, 128>}]} {
    %c0 = arith.constant 0 : index
    %c0_0 = arith.constant 0 : index
    %c0_1 = arith.constant 0 : index
    %0 = vector.load %arg3[%c0, %c0_0, %c0_1] : memref<1x104x512xf32, #tpu.memory_space<vmem>>, vector<1x104x512xf32>
    %1 = vector.shape_cast %0 : vector<1x104x512xf32> to vector<104x512xf32>
    %c0_2 = arith.constant 0 : index
    %c0_3 = arith.constant 0 : index
    %c0_4 = arith.constant 0 : index
    %2 = vector.load %arg4[%c0_2, %c0_3, %c0_4] : memref<1x512x128xf32, #tpu.memory_space<vmem>>, vector<1x512x128xf32>
    %3 = vector.shape_cast %2 : vector<1x512x128xf32> to vector<512x128xf32>
    %cst = arith.constant dense<0.000000e+00> : vector<104x128xf32>
    %4 = tpu.matmul %1, %3, %cst {dimension_numbers = #tpu.dot_dimension_numbers<[1], [0], [0], [1], [0, 0, 1, 1], [], []>} : vector<104x512xf32>, vector<512x128xf32>, vector<104x128xf32> -> vector<104x128xf32>
    %c0_5 = arith.constant 0 : index
    %c0_6 = arith.constant 0 : index
    %c0_7 = arith.constant 0 : index
    %5 = vector.load %arg5[%c0_5, %c0_6, %c0_7] : memref<1x1x128xf32, #tpu.memory_space<vmem>>, vector<1x1x128xf32>
    %6 = vector.shape_cast %5 : vector<1x1x128xf32> to vector<1x128xf32>
    %7 = vector.broadcast %6 : vector<1x128xf32> to vector<104x128xf32>
    %8 = arith.addf %4, %7 : vector<104x128xf32>
    %c0_8 = arith.constant 0 : index
    %c0_9 = arith.constant 0 : index
    %c0_10 = arith.constant 0 : index
    %9 = vector.load %arg6[%c0_8, %c0_9, %c0_10] : memref<1x104x128xf32, #tpu.memory_space<vmem>>, vector<1x104x128xf32>
    %10 = vector.shape_cast %9 : vector<1x104x128xf32> to vector<104x128xf32>
    %11 = vector.shape_cast %8 : vector<104x128xf32> to vector<1x104x128xf32>
    tpu.vector_store %arg6[%c0_8, %c0_9, %c0_10], %11 {strides = array<i32>} : memref<1x104x128xf32, #tpu.memory_space<vmem>>, vector<1x104x128xf32>,
    return
  }
  func.func @transform_0(%arg0: i32, %arg1: i32, %arg2: i32) -> (i32, i32, i32) {
    %c0_i32 = arith.constant 0 : i32
    %c0_i32_0 = arith.constant 0 : i32
    return %arg0, %arg1, %c0_i32 : i32, i32, i32
  }
  func.func @transform_1(%arg0: i32, %arg1: i32, %arg2: i32) -> (i32, i32, i32) {
    %c0_i32 = arith.constant 0 : i32
    %c0_i32_0 = arith.constant 0 : i32
    return %arg0, %c0_i32, %arg2 : i32, i32, i32
  }
  func.func @transform_2(%arg0: i32, %arg1: i32, %arg2: i32) -> (i32, i32, i32) {
    %c0_i32 = arith.constant 0 : i32
    %c0_i32_0 = arith.constant 0 : i32
    return %arg0, %c0_i32, %arg2 : i32, i32, i32
  }
  func.func @transform_3(%arg0: i32, %arg1: i32, %arg2: i32) -> (i32, i32, i32) {
    %c0_i32 = arith.constant 0 : i32
    return %arg0, %arg1, %arg2 : i32, i32, i32
  }
}

module attributes {stable_mosaic.version = 11 : i64} {
  func.func @_mm_bias_act_kernel(%arg0: i32, %arg1: i32, %arg2: i32, %arg3: memref<1x392x256xf32, #tpu.memory_space<vmem>>, %arg4: memref<1x256x128xf32, #tpu.memory_space<vmem>>, %arg5: memref<1x1x128xf32, #tpu.memory_space<vmem>>, %arg6: memref<1x392x128xf32, #tpu.memory_space<vmem>>) attributes {dimension_semantics = [#tpu.dimension_semantics<parallel>, #tpu.dimension_semantics<parallel>, #tpu.dimension_semantics<parallel>], iteration_bounds = array<i64: 4, 1, 1>, scalar_prefetch = 0 : i64, scratch_operands = 0 : i64, tpu.core_type = #tpu.core_type<tc>, window_params = [{transform_indices = @transform_0, window_bounds = array<i64: 1, 392, 256>}, {transform_indices = @transform_1, window_bounds = array<i64: 1, 256, 128>}, {transform_indices = @transform_2, window_bounds = array<i64: 1, 1, 128>}, {transform_indices = @transform_3, window_bounds = array<i64: 1, 392, 128>}]} {
    %c0 = arith.constant 0 : index
    %c0_0 = arith.constant 0 : index
    %c0_1 = arith.constant 0 : index
    %0 = vector.load %arg3[%c0, %c0_0, %c0_1] : memref<1x392x256xf32, #tpu.memory_space<vmem>>, vector<1x392x256xf32>
    %1 = vector.shape_cast %0 : vector<1x392x256xf32> to vector<392x256xf32>
    %c0_2 = arith.constant 0 : index
    %c0_3 = arith.constant 0 : index
    %c0_4 = arith.constant 0 : index
    %2 = vector.load %arg4[%c0_2, %c0_3, %c0_4] : memref<1x256x128xf32, #tpu.memory_space<vmem>>, vector<1x256x128xf32>
    %3 = vector.shape_cast %2 : vector<1x256x128xf32> to vector<256x128xf32>
    %cst = arith.constant dense<0.000000e+00> : vector<392x128xf32>
    %4 = tpu.matmul %1, %3, %cst {dimension_numbers = #tpu.dot_dimension_numbers<[1], [0], [0], [1], [0, 0, 1, 1], [], []>} : vector<392x256xf32>, vector<256x128xf32>, vector<392x128xf32> -> vector<392x128xf32>
    %c0_5 = arith.constant 0 : index
    %c0_6 = arith.constant 0 : index
    %c0_7 = arith.constant 0 : index
    %5 = vector.load %arg5[%c0_5, %c0_6, %c0_7] : memref<1x1x128xf32, #tpu.memory_space<vmem>>, vector<1x1x128xf32>
    %6 = vector.shape_cast %5 : vector<1x1x128xf32> to vector<1x128xf32>
    %7 = vector.broadcast %6 : vector<1x128xf32> to vector<392x128xf32>
    %8 = arith.addf %4, %7 : vector<392x128xf32>
    %cst_8 = arith.constant 0.000000e+00 : f32
    %9 = vector.broadcast %cst_8 : f32 to vector<392x128xf32>
    %10 = arith.subf %9, %8 : vector<392x128xf32>
    %11 = math.exp %10 : vector<392x128xf32>
    %cst_9 = arith.constant 1.000000e+00 : f32
    %12 = vector.broadcast %cst_9 : f32 to vector<392x128xf32>
    %13 = arith.addf %12, %11 : vector<392x128xf32>
    %14 = tpu.reciprocal %13 {approx = true} : vector<392x128xf32> -> vector<392x128xf32>
    %cst_10 = arith.constant 0.000000e+00 : f32
    %cst_11 = arith.constant 1.000000e+00 : f32
    %15 = vector.broadcast %cst_10 : f32 to vector<392x128xf32>
    %16 = arith.maximumf %15, %14 : vector<392x128xf32>
    %17 = vector.broadcast %cst_11 : f32 to vector<392x128xf32>
    %18 = arith.minimumf %17, %16 : vector<392x128xf32>
    %c0_12 = arith.constant 0 : index
    %c0_13 = arith.constant 0 : index
    %c0_14 = arith.constant 0 : index
    %19 = vector.load %arg6[%c0_12, %c0_13, %c0_14] : memref<1x392x128xf32, #tpu.memory_space<vmem>>, vector<1x392x128xf32>
    %20 = vector.shape_cast %19 : vector<1x392x128xf32> to vector<392x128xf32>
    %21 = vector.shape_cast %18 : vector<392x128xf32> to vector<1x392x128xf32>
    tpu.vector_store %arg6[%c0_12, %c0_13, %c0_14], %21 {strides = array<i32>} : memref<1x392x128xf32, #tpu.memory_space<vmem>>, vector<1x392x128xf32>,
    return
  }
  func.func @transform_0(%arg0: i32, %arg1: i32, %arg2: i32) -> (i32, i32, i32) {
    %c0_i32 = arith.constant 0 : i32
    %c0_i32_0 = arith.constant 0 : i32
    return %arg0, %arg1, %c0_i32 : i32, i32, i32
  }
  func.func @transform_1(%arg0: i32, %arg1: i32, %arg2: i32) -> (i32, i32, i32) {
    %c0_i32 = arith.constant 0 : i32
    %c0_i32_0 = arith.constant 0 : i32
    return %arg0, %c0_i32, %arg2 : i32, i32, i32
  }
  func.func @transform_2(%arg0: i32, %arg1: i32, %arg2: i32) -> (i32, i32, i32) {
    %c0_i32 = arith.constant 0 : i32
    %c0_i32_0 = arith.constant 0 : i32
    return %arg0, %c0_i32, %arg2 : i32, i32, i32
  }
  func.func @transform_3(%arg0: i32, %arg1: i32, %arg2: i32) -> (i32, i32, i32) {
    %c0_i32 = arith.constant 0 : i32
    return %arg0, %arg1, %arg2 : i32, i32, i32
  }
}

</mosaic_0001>

<bundles_post_ra>
// kernel: generator_forward.4
= control target key start
LH: loop header
LB: loop body
LE: loop exit
PB: predicated region body
PF: predicated region fallthrough
CT: control target
= control target key end

     0   :  { %8 = vsyncpa [#allocation3], 0  ;;  %s1031_s0 = inlined_call_operand.vmem [shape: f32[1,8,128], index: 0, kind: input, shape index: {}]   ;;  %s1032_s1 = inlined_call_operand.hbm [shape: f32[1,128,1024], index: 1, kind: input, shape index: {}]   ;;  %s1033_s2 = inlined_call_operand.hbm [shape: f32[1,1,1024], index: 2, kind: input, shape index: {}]   ;;  %s1034_s3 = inlined_call_operand.vmem [shape: f32[1,8,1024], index: 3, kind: output, shape index: {}]  }
   0x1   :  { %10 = vsyncpa [#allocation3 + $0x1], 0 }
   0x2   :  { %11 = vsyncpa [#allocation5], 0 }
   0x3   :  { %13 = vsyncpa [#allocation5 + $0x1], 0  ;;  %s850_s12 = smov 0   ;;  %s852_s13 = smov 0  }
   0x4   :  { %s854_s14 = smov 0   ;;  %s856_s15 = smov 0  }
   0x5   :  { %s858_s16 = smov 0   ;;  %s860_s17 = smov 0  }
   0x6 LB: > { %s630_s18 = sadd.s32 4294967295, %s825_s17   ;;  %s31_s19 = sadd.s32 1, %s821_s16  ;;  %s825_s17 = sphi %s860_s17, %s19_s17   ;;  %s821_s16 = sphi %s858_s16, %s1042_s16   ;;  %s817_s15 = sphi %s856_s15, %s1041_s15   ;;  %s813_s14 = sphi %s854_s14, %s1040_s14   ;;  %s809_s13 = sphi %s852_s13, %s1039_s13   ;;  %s805_s12 = sphi %s850_s12, %s1038_s12  }
   0x7   : > { %p32_p0 = scmp.ge.s32.totalorder %s31_s19, 2  ;;  %s75_s20 = sadd.s32 1, %s813_s14 }
   0x8   : > { %p82_p1 = scmp.ne.s32.totalorder %s813_s14, %s809_s13  ;;  %p83_p2 = scmp.eq.s32.totalorder %s825_s17, 0 }
   0x9   : > { %s1044_s19 = smov (%p32_p0, %s31_s19), 0  ;;  %p88_p4 = scmp.ne.s32.totalorder %s809_s13, %s805_s12 }
   0xa   : > { %p886_p3 = por %p83_p2, %p82_p1  ;;  %s71_s22 = ssub.s32 %s821_s16, %s1044_s19 }
   0xb   : > { %p89_p5 = scmp.eq.s32.totalorder %s630_s18, 0  ;;  %p73_p6 = scmp.eq.s32.totalorder %s71_s22, 0 }
   0xc   : > { %p659_p8 = scmp.lt.s32.totalorder %s825_s17, 2  ;;  %s902_s25 = sand.u32 1, %s813_s14  }
   0xd   : > { %p893_p7 = por %p89_p5, %p88_p4  ;;  %s647_s26 = sshll.u32 %s821_s16, 5 }
   0xe   : > { %s899_s24 = scalar_select %p73_p6, %s813_s14, %s75_s20  }
   0xf   : > { %s635_s27 = sshll.u32 %s902_s25, 9  ;;  %s191_s30 = scalar_lea.hbm %s1032_s1, %s647_s26 }
  0x10   : > { %s192_s4 = sshll.u32 %s191_s30, 4  ;;  %s184_s5 = scalar_lea.vmem [#allocation2], %s635_s27  ;;  %s193_s4 = int_to_ptr.hbm [resolvable:$true] %s192_s4 }
  0x11   : > { %s194_s6 = sshll.u32 %s184_s5, 4  ;;  %p911_p9 = pnand %p659_p8, %p886_p3  ;;  %s195_s6 = int_to_ptr.vmem [resolvable:$true] %s194_s6 }
  0x12   : > { %p640_p10 = scmp.ge.s32.totalorder %s825_s17, 1  ;;  %s181_s8 = scalar_lea.sflag [#allocation3], %s902_s25 }
  0x13   : > { %s827_s9 = smov 1024   ;;  %s828_s10 = smov 512  }
  0x14   : > { %s829_s11 = smov 32   ;;  %p223_p11 = scmp.lt.s32.totalorder %s825_s17, 3 }
  0x15   : > { %655 = dma.hbm_to_vmem [thread:$0]  (!%p911_p9), %s193_s4, 8192, %s195_s6, %s181_s8, %s827_s9, %s828_s10, %s829_s11  }
  0x16   : > { %s638_s12 = sshll.u32 %s902_s25, 2  ;;  %s639_s18 = sshll.u32 %s821_s16, 2 }
  0x17   : > { %p224_p12 = pnand %p640_p10, %p223_p11  ;;  %s214_s22 = scalar_lea.hbm %s1033_s2, %s639_s18 }
  0x18   : > { %s208_s26 = scalar_lea.vmem [#allocation4], %s638_s12  ;;  %s216_s28 = sshll.u32 %s214_s22, 4  ;;  %s217_s28 = int_to_ptr.hbm [resolvable:$true] %s216_s28 }
  0x19   : > { %s218_s27 = sshll.u32 %s208_s26, 4  ;;  %s205_s29 = scalar_lea.sflag [#allocation5], %s902_s25  ;;  %s219_s27 = int_to_ptr.vmem [resolvable:$true] %s218_s27 }
  0x1a   : > { %658 = dma.hbm_to_vmem [thread:$0]  (!%p911_p9), %s217_s28, 64, %s219_s27, %s205_s29  }
  0x1b   : > { %227 = sbr.rel (%p224_p12) target bundleno = 206 (0xce), region = 32  ;;  %s229_s30 = sand.u32 (!%p224_p12), 1, %s809_s13  }
  0x1c   : > { %s641_s4 = sshll.u32 (!%p224_p12), %s229_s30, 9  ;;  %s230_s5 = scalar_lea.sflag (!%p224_p12), [#allocation3], %s229_s30 }
  0x1d   : > { %s929_s6 = scalar_lea.vmem (!%p224_p12), [#allocation2], %s641_s4 }
  0x20   : > { %796 = dma.done.wait (%p893_p7), %s230_s5, 8192  }
  0x21   : > { %798 = vsyncadd (%p893_p7), %s230_s5, 4294959104  ;;  %s642_s8 = sshll.u32 %s229_s30, 2  ;;  %s240_s9 = scalar_lea.sflag [#allocation5], %s229_s30 }
  0x22   : > { %s935_s10 = scalar_lea.vmem [#allocation4], %s642_s8 }
  0x23   : > { %800 = dma.done.wait (%p893_p7), %s240_s9, 64  }
  0x24   : > { %802 = vsyncadd (%p893_p7), %s240_s9, 4294967232  ;;  %v373_v0 = vld [vmem:[%s929_s6 + $0x1f0] sm:$0xff]  ;;  %v374_v1 = vld [vmem:[%s929_s6 + $0x1f8] sm:$0xff]  ;;  %s643_s7 = sshll.u32 %s817_s15, 2 }
  0x25   : > { %v369_v2 = vld [vmem:[%s929_s6 + $0x1d0] sm:$0xff]  ;;  %425 = vmatpush.msra.mxu2 %v373_v0  ;;  %445 = vmatpush.msra.mxu3 %v374_v1  ;;  %v370_v3 = vld [vmem:[%s929_s6 + $0x1d8] sm:$0xff]  ;;  %v371_v4 = vld [vmem:[%s929_s6 + $0x1e0] sm:$0xff]  ;;  %p301_p13 = scmp.lt.s32.totalorder %s643_s7, 7 }
  0x26   : > { %v365_v5 = vld [vmem:[%s929_s6 + $0x1b0] sm:$0xff]  ;;  %385 = vmatpush.msra.mxu0 %v371_v4  ;;  %v372_v6 = vld [vmem:[%s929_s6 + $0x1e8] sm:$0xff]  ;;  %v366_v7 = vld [vmem:[%s929_s6 + $0x1b8] sm:$0xff] }
  0x27   : > { %v367_v8 = vld [vmem:[%s929_s6 + $0x1c0] sm:$0xff]  ;;  %426 = vmatpush.msra.mxu2 %v369_v2  ;;  %446 = vmatpush.msra.mxu3 %v370_v3  ;;  %v368_v9 = vld [vmem:[%s929_s6 + $0x1c8] sm:$0xff]  ;;  %v361_v10 = vld [vmem:[%s929_s6 + $0x190] sm:$0xff]  ;;  %s1046_s7 = smov (!%p301_p13, %s643_s7), 7 }
  0x28   : > { %405 = vmatpush.msra.mxu1 %v372_v6  ;;  %386 = vmatpush.msra.mxu0 %v367_v8  ;;  %v362_v11 = vld [vmem:[%s929_s6 + $0x198] sm:$0xff]  ;;  %v363_v12 = vld [vmem:[%s929_s6 + $0x1a0] sm:$0xff]  ;;  %v364_v13 = vld [vmem:[%s929_s6 + $0x1a8] sm:$0xff]  ;;  %s644_s11 = sshll.u32 %s1046_s7, 3 }
  0x29   : > { %427 = vmatpush.msra.mxu2 %v365_v5  ;;  %447 = vmatpush.msra.mxu3 %v366_v7  ;;  %v359_v14 = vld [vmem:[%s929_s6 + $0x180] sm:$0xff]  ;;  %v357_v15 = vld [vmem:[%s929_s6 + $0x170] sm:$0xff]  ;;  %v358_v16 = vld [vmem:[%s929_s6 + $0x178] sm:$0xff]  ;;  %s308_s20 = scalar_lea.vmem %s1034_s3, %s644_s11 }
  0x2a   : > { %406 = vmatpush.msra.mxu1 %v368_v9  ;;  %387 = vmatpush.msra.mxu0 %v363_v12  ;;  %v360_v17 = vld [vmem:[%s929_s6 + $0x188] sm:$0xff]  ;;  %v355_v18 = vld [vmem:[%s929_s6 + $0x160] sm:$0xff]  ;;  %v353_v19 = vld [vmem:[%s929_s6 + $0x150] sm:$0xff] }
  0x2b   : > { %428 = vmatpush.msra.mxu2 %v361_v10  ;;  %448 = vmatpush.msra.mxu3 %v362_v11  ;;  %v354_v20 = vld [vmem:[%s929_s6 + $0x158] sm:$0xff]  ;;  %v356_v21 = vld [vmem:[%s929_s6 + $0x168] sm:$0xff]  ;;  %v351_v22 = vld [vmem:[%s929_s6 + $0x140] sm:$0xff] }
  0x2c   : > { %407 = vmatpush.msra.mxu1 %v364_v13  ;;  %388 = vmatpush.msra.mxu0 %v359_v14  ;;  %v349_v23 = vld [vmem:[%s929_s6 + $0x130] sm:$0xff]  ;;  %v350_v24 = vld [vmem:[%s929_s6 + $0x138] sm:$0xff]  ;;  %v352_v25 = vld [vmem:[%s929_s6 + $0x148] sm:$0xff] }
  0x2d   : > { %429 = vmatpush.msra.mxu2 %v357_v15  ;;  %449 = vmatpush.msra.mxu3 %v358_v16  ;;  %v347_v26 = vld [vmem:[%s929_s6 + $0x120] sm:$0xff]  ;;  %v345_v27 = vld [vmem:[%s929_s6 + $0x110] sm:$0xff]  ;;  %v346_v28 = vld [vmem:[%s929_s6 + $0x118] sm:$0xff] }
  0x2e   : > { %408 = vmatpush.msra.mxu1 %v360_v17  ;;  %389 = vmatpush.msra.mxu0 %v355_v18  ;;  %v348_v29 = vld [vmem:[%s929_s6 + $0x128] sm:$0xff]  ;;  %v343_v30 = vld [vmem:[%s929_s6 + $0x100] sm:$0xff]  ;;  %v341_v31 = vld [vmem:[%s929_s6 + $0xf0] sm:$0xff] }
  0x2f   : > { %430 = vmatpush.msra.mxu2 %v353_v19  ;;  %450 = vmatpush.msra.mxu3 %v354_v20  ;;  %v342_v32 = vld [vmem:[%s929_s6 + $0xf8] sm:$0xff]  ;;  %v344_v33 = vld [vmem:[%s929_s6 + $0x108] sm:$0xff]  ;;  %v339_v34 = vld [vmem:[%s929_s6 + $0xe0] sm:$0xff] }
  0x30   : > { %409 = vmatpush.msra.mxu1 %v356_v21  ;;  %390 = vmatpush.msra.mxu0 %v351_v22  ;;  %v337_v35 = vld [vmem:[%s929_s6 + $0xd0] sm:$0xff]  ;;  %v338_v36 = vld [vmem:[%s929_s6 + $0xd8] sm:$0xff]  ;;  %v340_v37 = vld [vmem:[%s929_s6 + $0xe8] sm:$0xff] }
  0x31   : > { %431 = vmatpush.msra.mxu2 %v349_v23  ;;  %451 = vmatpush.msra.mxu3 %v350_v24  ;;  %v335_v38 = vld [vmem:[%s929_s6 + $0xc0] sm:$0xff]  ;;  %v333_v39 = vld [vmem:[%s929_s6 + $0xb0] sm:$0xff]  ;;  %v334_v40 = vld [vmem:[%s929_s6 + $0xb8] sm:$0xff] }
  0x32   : > { %410 = vmatpush.msra.mxu1 %v352_v25  ;;  %391 = vmatpush.msra.mxu0 %v347_v26  ;;  %v336_v41 = vld [vmem:[%s929_s6 + $0xc8] sm:$0xff]  ;;  %v331_v42 = vld [vmem:[%s929_s6 + $0xa0] sm:$0xff]  ;;  %v329_v43 = vld [vmem:[%s929_s6 + $0x90] sm:$0xff] }
  0x33   : > { %432 = vmatpush.msra.mxu2 %v345_v27  ;;  %452 = vmatpush.msra.mxu3 %v346_v28  ;;  %v330_v44 = vld [vmem:[%s929_s6 + $0x98] sm:$0xff]  ;;  %v332_v45 = vld [vmem:[%s929_s6 + $0xa8] sm:$0xff]  ;;  %v327_v46 = vld [vmem:[%s929_s6 + $0x80] sm:$0xff] }
  0x34   : > { %411 = vmatpush.msra.mxu1 %v348_v29  ;;  %392 = vmatpush.msra.mxu0 %v343_v30  ;;  %v325_v47 = vld [vmem:[%s929_s6 + $0x70] sm:$0xff]  ;;  %v326_v48 = vld [vmem:[%s929_s6 + $0x78] sm:$0xff]  ;;  %v328_v49 = vld [vmem:[%s929_s6 + $0x88] sm:$0xff] }
  0x35   : > { %433 = vmatpush.msra.mxu2 %v341_v31  ;;  %453 = vmatpush.msra.mxu3 %v342_v32  ;;  %v323_v50 = vld [vmem:[%s929_s6 + $0x60] sm:$0xff]  ;;  %v321_v51 = vld [vmem:[%s929_s6 + $0x50] sm:$0xff]  ;;  %v322_v52 = vld [vmem:[%s929_s6 + $0x58] sm:$0xff] }
  0x36   : > { %412 = vmatpush.msra.mxu1 %v344_v33  ;;  %393 = vmatpush.msra.mxu0 %v339_v34  ;;  %v324_v53 = vld [vmem:[%s929_s6 + $0x68] sm:$0xff]  ;;  %v319_v54 = vld [vmem:[%s929_s6 + $0x40] sm:$0xff]  ;;  %v317_v55 = vld [vmem:[%s929_s6 + $0x30] sm:$0xff] }
  0x37   : > { %434 = vmatpush.msra.mxu2 %v337_v35  ;;  %454 = vmatpush.msra.mxu3 %v338_v36  ;;  %v318_v56 = vld [vmem:[%s929_s6 + $0x38] sm:$0xff]  ;;  %v320_v57 = vld [vmem:[%s929_s6 + $0x48] sm:$0xff]  ;;  %v315_v58 = vld [vmem:[%s929_s6 + $0x20] sm:$0xff] }
  0x38   : > { %413 = vmatpush.msra.mxu1 %v340_v37  ;;  %394 = vmatpush.msra.mxu0 %v335_v38  ;;  %v313_v59 = vld [vmem:[%s929_s6 + $0x10] sm:$0xff]  ;;  %v314_v60 = vld [vmem:[%s929_s6 + $0x18] sm:$0xff]  ;;  %v310_v61 = vld [vmem:[%s1031_s0] sm:$0xff] }
  0x39   : > { %435 = vmatpush.msra.mxu2 %v333_v39  ;;  %455 = vmatpush.msra.mxu3 %v334_v40  ;;  %v316_v62 = vld [vmem:[%s929_s6 + $0x28] sm:$0xff]  ;;  %v311_v63 = vld [vmem:[%s929_s6] sm:$0xff] }
  0x3a   : > { %414 = vmatpush.msra.mxu1 %v336_v41  ;;  %395 = vmatpush.msra.mxu0 %v331_v42  ;;  %v312_v0 = vld [vmem:[%s929_s6 + $0x8] sm:$0xff]  ;;  %v375_v1 = vld [vmem:[%s935_s10] sm:$0xf] }
  0x3b   : > { %436 = vmatpush.msra.mxu2 %v329_v43  ;;  %456 = vmatpush.msra.mxu3 %v330_v44  ;;  %v377_v2 = vperm.slane %v375_v1, 0  ;;  %v378_v3 = vperm.slane %v375_v1, 1  ;;  %v379_v6 = vperm.slane %v375_v1, 2  ;;  %v380_v7 = vperm.slane %v375_v1, 3 }
  0x3c   : > { %415 = vmatpush.msra.mxu1 %v332_v45  ;;  %396 = vmatpush.msra.mxu0 %v327_v46 }
  0x3d   : > { %437 = vmatpush.msra.mxu2 %v325_v47  ;;  %457 = vmatpush.msra.mxu3 %v326_v48 }
  0x3e   : > { %416 = vmatpush.msra.mxu1 %v328_v49  ;;  %397 = vmatpush.msra.mxu0 %v323_v50 }
  0x3f   : > { %438 = vmatpush.msra.mxu2 %v321_v51  ;;  %458 = vmatpush.msra.mxu3 %v322_v52 }
  0x40   : > { %417 = vmatpush.msra.mxu1 %v324_v53  ;;  %398 = vmatpush.msra.mxu0 %v319_v54 }
  0x41   : > { %439 = vmatpush.msra.mxu2 %v317_v55  ;;  %459 = vmatpush.msra.mxu3 %v318_v56 }
  0x42   : > { %418 = vmatpush.msra.mxu1 %v320_v57  ;;  %399 = vmatpush.msra.mxu0 %v315_v58 }
  0x43   : > { %440 = vmatpush.msra.mxu2 %v313_v59  ;;  %460 = vmatpush.msra.mxu3 %v314_v60 }
  0x44   : > { %441 = vmatmul.f32.vlgmr.msra.gmra.mxu2 %v310_v61  ;;  %461 = vmatmul.f32.vlgmr.msra.gmra.mxu3 %v310_v61 }
  0x45   : > { %419 = vmatpush.msra.mxu1 %v316_v62  ;;  %400 = vmatpush.msra.mxu0 %v311_v63 }
  0x46   : > { %401 = vmatmul.f32.vlgmr.msra.gmra.mxu0 %v310_v61 }
  0x47   : > { %420 = vmatpush.msra.mxu1 %v312_v0 }
  0x48   : > { %421 = vmatmul.f32.vlgmr.msra.gmra.mxu1 %v310_v61 }
  0xc3   : > { %v402_v4 = vpop.f32.mrf.mxu0 }
  0xc4   : > { %v403_v5 = vadd.f32 %v402_v4, %v377_v2 }
  0xc5   : > { %v422_v8 = vpop.f32.mrf.mxu1 }
  0xc6   : > { %v465_v9 = vmax.f32 %v403_v5, 0.0  ;;  %v423_v10 = vadd.f32 %v422_v8, %v378_v3 }
  0xc7   : > { %v442_v11 = vpop.f32.mrf.mxu2  ;;  %v462_v12 = vpop.f32.mrf.mxu3 }
  0xc8   : > { %469 = vst [vmem:[%s308_s20] sm:$0xff] %v465_v9  ;;  %v466_v13 = vmax.f32 %v423_v10, 0.0  ;;  %v443_v14 = vadd.f32 %v442_v11, %v379_v6  ;;  %v463_v15 = vadd.f32 %v462_v12, %v380_v7 }
  0xca   : > { %470 = vst [vmem:[%s308_s20 + $0x8] sm:$0xff] %v466_v13  ;;  %v467_v16 = vmax.f32 %v443_v14, 0.0  ;;  %v468_v17 = vmax.f32 %v463_v15, 0.0 }
  0xcc   : > { %471 = vst [vmem:[%s308_s20 + $0x10] sm:$0xff] %v467_v16 }
  0xcd   : > { %472 = vst [vmem:[%s308_s20 + $0x18] sm:$0xff] %v468_v17 }
  0xce PF: > { %s19_s17 = sadd.s32 1, %s825_s17   ;;  %s1038_s12 = smov %s809_s13 }
  0xcf   : > { %p16_p0 = scmp.ge.s32.totalorder %s19_s17, 4   ;;  %s1039_s13 = smov %s813_s14 }
  0xd0   : > { %s1040_s14 = smov %s899_s24  ;;  %s1041_s15 = smov %s821_s16 }
  0xd1   : > { %s1042_s16 = smov %s1044_s19  ;;  %18 = sbr.rel (!%p16_p0) target bundleno = 6 (0x6), region = 88 }
  0xd6   :  { %511 = vsyncpa [#allocation3], 1 }
  0xd7   :  { %513 = vsyncpa [#allocation3 + $0x1], 1 }
  0xd8   :  { %514 = vsyncpa [#allocation5], 1 }
  0xd9   :  { %516 = vsyncpa [#allocation5 + $0x1], 1 }

// kernel: generator_forward.5
= control target key start
LH: loop header
LB: loop body
LE: loop exit
PB: predicated region body
PF: predicated region fallthrough
CT: control target
= control target key end

     0   :  { %8 = vsyncpa [#allocation3], 0  ;;  %s7710_s0 = inlined_call_operand.vmem [shape: bf16[1,8,1024], index: 0, kind: input, shape index: {}]   ;;  %s7711_s1 = inlined_call_operand.hbm [shape: bf16[1,1024,6272], index: 1, kind: input, shape index: {}]   ;;  %s7712_s2 = inlined_call_operand.hbm [shape: f32[1,1,6272], index: 2, kind: input, shape index: {}]   ;;  %s7713_s3 = inlined_call_operand.vmem [shape: f32[1,8,6272], index: 3, kind: output, shape index: {}]  }
   0x1   :  { %10 = vsyncpa [#allocation3 + $0x1], 0 }
   0x2   :  { %11 = vsyncpa [#allocation5], 0 }
   0x3   :  { %13 = vsyncpa [#allocation5 + $0x1], 0  ;;  %s6537_s12 = smov 0   ;;  %s6539_s13 = smov 0  }
   0x4   :  { %s6541_s14 = smov 0   ;;  %s6543_s15 = smov 0  }
   0x5   :  { %s6545_s16 = smov 0   ;;  %s6547_s17 = smov 0  }
   0x6 LB: > { %s4078_s18 = sadd.s32 4294967295, %s6512_s17   ;;  %s31_s19 = sadd.s32 1, %s6508_s16  ;;  %s6512_s17 = sphi %s6547_s17, %s19_s17   ;;  %s6508_s16 = sphi %s6545_s16, %s7721_s16   ;;  %s6504_s15 = sphi %s6543_s15, %s7720_s15   ;;  %s6500_s14 = sphi %s6541_s14, %s7719_s14   ;;  %s6496_s13 = sphi %s6539_s13, %s7718_s13   ;;  %s6492_s12 = sphi %s6537_s12, %s7717_s12  }
   0x7   : > { %p32_p0 = scmp.ge.s32.totalorder %s31_s19, 7  ;;  %s75_s20 = sadd.s32 1, %s6500_s14 }
   0x8   : > { %p82_p1 = scmp.ne.s32.totalorder %s6500_s14, %s6496_s13  ;;  %p83_p2 = scmp.eq.s32.totalorder %s6512_s17, 0 }
   0x9   : > { %s7723_s19 = smov (%p32_p0, %s31_s19), 0  ;;  %p88_p4 = scmp.ne.s32.totalorder %s6496_s13, %s6492_s12 }
   0xa   : > { %p84_p3 = por %p83_p2, %p82_p1  ;;  %s71_s21 = ssub.s32 %s6508_s16, %s7723_s19 }
   0xb   : > { %p89_p5 = scmp.eq.s32.totalorder %s4078_s18, 0  ;;  %p73_p6 = scmp.eq.s32.totalorder %s71_s21, 0 }
   0xc   : > { %p6344_p8 = scmp.lt.s32.totalorder %s6512_s17, 7  ;;  %s6585_s24 = sand.u32 1, %s6500_s14  }
   0xd   : > { %p6576_p7 = por %p89_p5, %p88_p4  ;;  %s5880_s25 = smul.u32 28, %s6508_s16 }
   0xe   : > { %s6582_s23 = scalar_select %p73_p6, %s6500_s14, %s75_s20  }
   0xf   : > { %s6329_s26 = smul.u32 3584, %s6585_s24  ;;  %s193_s29 = scalar_lea.hbm %s7711_s1, %s5880_s25 }
  0x10   : > { %p6592_p9 = pnand %p6344_p8, %p84_p3  ;;  %s194_s4 = sshll.u32 %s193_s29, 4  ;;  %s195_s4 = int_to_ptr.hbm [resolvable:$true] %s194_s4 }
  0x11   : > { %s186_s5 = scalar_lea.vmem [#allocation2], %s6329_s26  ;;  %p4084_p10 = scmp.ge.s32.totalorder %s6512_s17, 1 }
  0x12   : > { %s196_s6 = sshll.u32 %s186_s5, 4  ;;  %s183_s7 = scalar_lea.sflag [#allocation3], %s6585_s24  ;;  %s197_s6 = int_to_ptr.vmem [resolvable:$true] %s196_s6 }
  0x13   : > { %s6514_s8 = smov 3136   ;;  %s6515_s9 = smov 448  }
  0x14   : > { %s6516_s10 = smov 28   ;;  %p225_p11 = scmp.lt.s32.totalorder %s6512_s17, 8 }
  0x15   : > { %6340 = dma.hbm_to_vmem [thread:$0]  (!%p6592_p9), %s195_s4, 57344, %s197_s6, %s183_s7, %s6514_s8, %s6515_s9, %s6516_s10  }
  0x16   : > { %s6330_s11 = smul.u32 7, %s6585_s24  ;;  %p226_p12 = pnand %p4084_p10, %p225_p11 }
  0x17   : > { %s211_s12 = smul.u32 7, %s6508_s16  ;;  %s207_s28 = scalar_lea.sflag [#allocation5], %s6585_s24 }
  0x18   : > { %s210_s25 = scalar_lea.vmem [#allocation4], %s6330_s11  ;;  %229 = sbr.rel (%p226_p12) target bundleno = 629 (0x275), region = 32 }
  0x19   : > { %s216_s21 = scalar_lea.hbm %s7712_s2, %s211_s12  ;;  %s220_s26 = sshll.u32 %s210_s25, 4  ;;  %s221_s26 = int_to_ptr.vmem [resolvable:$true] %s220_s26 }
  0x1a   : > { %s218_s27 = sshll.u32 %s216_s21, 4  ;;  %s231_s29 = sand.u32 (!%p226_p12), 1, %s6496_s13   ;;  %s219_s27 = int_to_ptr.hbm [resolvable:$true] %s218_s27 }
  0x1b   : > { %6343 = dma.hbm_to_vmem [thread:$0]  (!%p6592_p9), %s219_s27, 112, %s221_s26, %s207_s28  }
  0x1c   : > { %s6331_s4 = smul.u32 (!%p226_p12), 3584, %s231_s29  ;;  %s232_s5 = scalar_lea.sflag (!%p226_p12), [#allocation3], %s231_s29 }
  0x1e   : > { %s6610_s6 = scalar_lea.vmem [#allocation2], %s6331_s4 }
  0x1f   : > { %6483 = dma.done.wait (%p6576_p7), %s232_s5, 57344  }
  0x20   : > { %6485 = vsyncadd (%p6576_p7), %s232_s5, 4294909952  ;;  %s6332_s7 = smul.u32 7, %s231_s29  ;;  %s242_s8 = scalar_lea.sflag [#allocation5], %s231_s29 }
  0x22   : > { %s6616_s9 = scalar_lea.vmem [#allocation4], %s6332_s7 }
  0x23   : > { %6487 = dma.done.wait (%p6576_p7), %s242_s8, 112  }
  0x24   : > { %6489 = vsyncadd (%p6576_p7), %s242_s8, 4294967184  ;;  %v4284_v0 = vld [vmem:[%s6610_s6 + $0x188] sm:$0xf]  ;;  %v5933_v1 = vld [vmem:[%s6610_s6 + $0x1a0] sm:$0xf0]  ;;  %s302_s21 = smul.u32 7, %s6504_s15 }
  0x25   : > { %v4508_v2 = vld [vmem:[%s6610_s6 + $0x348] sm:$0xf]  ;;  %v4285_v3 = vor.u32 %v5933_v1, %v4284_v0  ;;  %v5989_v4 = vld [vmem:[%s6610_s6 + $0x360] sm:$0xf0]  ;;  %v4256_v11 = vld [vmem:[%s6610_s6 + $0x150] sm:$0xf] }
  0x26   : > { %v4732_v5 = vld [vmem:[%s6610_s6 + $0x508] sm:$0xf]  ;;  %v6045_v6 = vld [vmem:[%s6610_s6 + $0x520] sm:$0xf0]  ;;  %v4509_v7 = vor.u32 %v5989_v4, %v4508_v2  ;;  %v5926_v13 = vld [vmem:[%s6610_s6 + $0x168] sm:$0xf0] }
  0x27   : > { %v4733_v8 = vor.u32 %v6045_v6, %v4732_v5  ;;  %v4956_v9 = vld [vmem:[%s6610_s6 + $0x6c8] sm:$0xf]  ;;  %v6101_v10 = vld [vmem:[%s6610_s6 + $0x6e0] sm:$0xf0]  ;;  %3180 = vmatpush.bf16.msra.mxu0 %v4285_v3  ;;  %v4480_v14 = vld [vmem:[%s6610_s6 + $0x310] sm:$0xf]  ;;  %v4257_v16 = vor.u32 %v5926_v13, %v4256_v11 }
  0x28   : > { %v4957_v12 = vor.u32 %v6101_v10, %v4956_v9  ;;  %v5982_v15 = vld [vmem:[%s6610_s6 + $0x328] sm:$0xf0]  ;;  %3193 = vmatpush.bf16.msra.mxu1 %v4509_v7  ;;  %v4704_v18 = vld [vmem:[%s6610_s6 + $0x4d0] sm:$0xf]  ;;  %v4228_v23 = vld [vmem:[%s6610_s6 + $0x118] sm:$0xf] }
  0x29   : > { %3206 = vmatpush.bf16.msra.mxu2 %v4733_v8  ;;  %v4481_v17 = vor.u32 %v5982_v15, %v4480_v14  ;;  %v6038_v19 = vld [vmem:[%s6610_s6 + $0x4e8] sm:$0xf0]  ;;  %v4928_v20 = vld [vmem:[%s6610_s6 + $0x690] sm:$0xf]  ;;  %v5919_v24 = vld [vmem:[%s6610_s6 + $0x130] sm:$0xf0] }
  0x2a   : > { %3219 = vmatpush.bf16.msra.mxu3 %v4957_v12  ;;  %v4705_v21 = vor.u32 %v6038_v19, %v4704_v18  ;;  %v6094_v22 = vld [vmem:[%s6610_s6 + $0x6a8] sm:$0xf0]  ;;  %v4452_v26 = vld [vmem:[%s6610_s6 + $0x2d8] sm:$0xf]  ;;  %v5975_v27 = vld [vmem:[%s6610_s6 + $0x2f0] sm:$0xf0]  ;;  %v4229_v29 = vor.u32 %v5919_v24, %v4228_v23 }
  0x2b   : > { %v4929_v25 = vor.u32 %v6094_v22, %v4928_v20  ;;  %v4676_v28 = vld [vmem:[%s6610_s6 + $0x498] sm:$0xf]  ;;  %3181 = vmatpush.bf16.msra.mxu0 %v4257_v16  ;;  %v6031_v30 = vld [vmem:[%s6610_s6 + $0x4b0] sm:$0xf0]  ;;  %v4453_v33 = vor.u32 %v5975_v27, %v4452_v26  ;;  %v4200_v35 = vld [vmem:[%s6610_s6 + $0xe0] sm:$0xf] }
  0x2c   : > { %v4900_v31 = vld [vmem:[%s6610_s6 + $0x658] sm:$0xf]  ;;  %v6087_v32 = vld [vmem:[%s6610_s6 + $0x670] sm:$0xf0]  ;;  %3194 = vmatpush.bf16.msra.mxu1 %v4481_v17  ;;  %v4677_v34 = vor.u32 %v6031_v30, %v4676_v28  ;;  %v5912_v36 = vld [vmem:[%s6610_s6 + $0xf8] sm:$0xf0] }
  0x2d   : > { %3207 = vmatpush.bf16.msra.mxu2 %v4705_v21  ;;  %v4424_v37 = vld [vmem:[%s6610_s6 + $0x2a0] sm:$0xf]  ;;  %v4901_v38 = vor.u32 %v6087_v32, %v4900_v31  ;;  %v5968_v39 = vld [vmem:[%s6610_s6 + $0x2b8] sm:$0xf0]  ;;  %v4201_v44 = vor.u32 %v5912_v36, %v4200_v35  ;;  %v4172_v47 = vld [vmem:[%s6610_s6 + $0xa8] sm:$0xf] }
  0x2e   : > { %3220 = vmatpush.bf16.msra.mxu3 %v4929_v25  ;;  %v4648_v40 = vld [vmem:[%s6610_s6 + $0x460] sm:$0xf]  ;;  %v6024_v41 = vld [vmem:[%s6610_s6 + $0x478] sm:$0xf0]  ;;  %v4425_v45 = vor.u32 %v5968_v39, %v4424_v37  ;;  %v5905_v48 = vld [vmem:[%s6610_s6 + $0xc0] sm:$0xf0] }
  0x2f   : > { %v4872_v42 = vld [vmem:[%s6610_s6 + $0x620] sm:$0xf]  ;;  %v6080_v43 = vld [vmem:[%s6610_s6 + $0x638] sm:$0xf0]  ;;  %3182 = vmatpush.bf16.msra.mxu0 %v4229_v29  ;;  %v4649_v46 = vor.u32 %v6024_v41, %v4648_v40  ;;  %v4396_v49 = vld [vmem:[%s6610_s6 + $0x268] sm:$0xf]  ;;  %v4173_v56 = vor.u32 %v5905_v48, %v4172_v47 }
  0x30   : > { %3195 = vmatpush.bf16.msra.mxu1 %v4453_v33  ;;  %v4873_v50 = vor.u32 %v6080_v43, %v4872_v42  ;;  %v5961_v51 = vld [vmem:[%s6610_s6 + $0x280] sm:$0xf0]  ;;  %v4620_v52 = vld [vmem:[%s6610_s6 + $0x428] sm:$0xf]  ;;  %v4144_v59 = vld [vmem:[%s6610_s6 + $0x70] sm:$0xf] }
  0x31   : > { %3208 = vmatpush.bf16.msra.mxu2 %v4677_v34  ;;  %v6017_v53 = vld [vmem:[%s6610_s6 + $0x440] sm:$0xf0]  ;;  %v4844_v54 = vld [vmem:[%s6610_s6 + $0x5e8] sm:$0xf]  ;;  %v4397_v57 = vor.u32 %v5961_v51, %v4396_v49  ;;  %v5898_v60 = vld [vmem:[%s6610_s6 + $0x88] sm:$0xf0] }
  0x32   : > { %3221 = vmatpush.bf16.msra.mxu3 %v4901_v38  ;;  %v6073_v55 = vld [vmem:[%s6610_s6 + $0x600] sm:$0xf0]  ;;  %v4621_v58 = vor.u32 %v6017_v53, %v4620_v52  ;;  %v4368_v61 = vld [vmem:[%s6610_s6 + $0x230] sm:$0xf]  ;;  %v5954_v63 = vld [vmem:[%s6610_s6 + $0x248] sm:$0xf0]  ;;  %v4145_v4 = vor.u32 %v5898_v60, %v4144_v59 }
  0x33   : > { %3183 = vmatpush.bf16.msra.mxu0 %v4201_v44  ;;  %v4845_v62 = vor.u32 %v6073_v55, %v4844_v54  ;;  %v4592_v0 = vld [vmem:[%s6610_s6 + $0x3f0] sm:$0xf]  ;;  %v6010_v1 = vld [vmem:[%s6610_s6 + $0x408] sm:$0xf0]  ;;  %v4369_v5 = vor.u32 %v5954_v63, %v4368_v61  ;;  %v4116_v7 = vld [vmem:[%s6610_s6 + $0x38] sm:$0xf] }
  0x34   : > { %3196 = vmatpush.bf16.msra.mxu1 %v4425_v45  ;;  %v4816_v2 = vld [vmem:[%s6610_s6 + $0x5b0] sm:$0xf]  ;;  %v6066_v3 = vld [vmem:[%s6610_s6 + $0x5c8] sm:$0xf0]  ;;  %v4593_v6 = vor.u32 %v6010_v1, %v4592_v0  ;;  %v5891_v8 = vld [vmem:[%s6610_s6 + $0x50] sm:$0xf0] }
  0x35   : > { %3209 = vmatpush.bf16.msra.mxu2 %v4649_v46  ;;  %v4340_v9 = vld [vmem:[%s6610_s6 + $0x1f8] sm:$0xf]  ;;  %v4817_v10 = vor.u32 %v6066_v3, %v4816_v2  ;;  %v5947_v11 = vld [vmem:[%s6610_s6 + $0x210] sm:$0xf0]  ;;  %v4117_v16 = vor.u32 %v5891_v8, %v4116_v7  ;;  %v4088_v17 = vld [vmem:[%s6610_s6] sm:$0xf] }
  0x36   : > { %3222 = vmatpush.bf16.msra.mxu3 %v4873_v50  ;;  %v4564_v12 = vld [vmem:[%s6610_s6 + $0x3b8] sm:$0xf]  ;;  %v6003_v13 = vld [vmem:[%s6610_s6 + $0x3d0] sm:$0xf0]  ;;  %v5884_v18 = vld [vmem:[%s6610_s6 + $0x18] sm:$0xf0]  ;;  %v4341_v19 = vor.u32 %v5947_v11, %v4340_v9 }
  0x37   : > { %3184 = vmatpush.bf16.msra.mxu0 %v4173_v56  ;;  %v4788_v14 = vld [vmem:[%s6610_s6 + $0x578] sm:$0xf]  ;;  %v6059_v15 = vld [vmem:[%s6610_s6 + $0x590] sm:$0xf0]  ;;  %v4565_v20 = vor.u32 %v6003_v13, %v4564_v12  ;;  %v4312_v21 = vld [vmem:[%s6610_s6 + $0x1c0] sm:$0xf]  ;;  %v4089_v31 = vor.u32 %v5884_v18, %v4088_v17 }
  0x38   : > { %3197 = vmatpush.bf16.msra.mxu1 %v4397_v57  ;;  %v5940_v22 = vld [vmem:[%s6610_s6 + $0x1d8] sm:$0xf0]  ;;  %v4536_v23 = vld [vmem:[%s6610_s6 + $0x380] sm:$0xf]  ;;  %v4789_v24 = vor.u32 %v6059_v15, %v4788_v14  ;;  %v5180_v28 = vld [vmem:[%s6610_s6 + $0x888] sm:$0xf] }
  0x39   : > { %3210 = vmatpush.bf16.msra.mxu2 %v4621_v58  ;;  %v5996_v25 = vld [vmem:[%s6610_s6 + $0x398] sm:$0xf0]  ;;  %v4760_v26 = vld [vmem:[%s6610_s6 + $0x540] sm:$0xf]  ;;  %v6157_v29 = vld [vmem:[%s6610_s6 + $0x8a0] sm:$0xf0]  ;;  %v4313_v35 = vor.u32 %v5940_v22, %v4312_v21 }
  0x3a   : > { %3223 = vmatpush.bf16.msra.mxu3 %v4845_v62  ;;  %v6052_v27 = vld [vmem:[%s6610_s6 + $0x558] sm:$0xf0]  ;;  %v5404_v30 = vld [vmem:[%s6610_s6 + $0xa48] sm:$0xf]  ;;  %v6213_v32 = vld [vmem:[%s6610_s6 + $0xa60] sm:$0xf0]  ;;  %v4537_v36 = vor.u32 %v5996_v25, %v4536_v23  ;;  %v5181_v40 = vor.u32 %v6157_v29, %v5180_v28 }
  0x3b   : > { %3185 = vmatpush.bf16.msra.mxu0 %v4145_v4  ;;  %v5628_v33 = vld [vmem:[%s6610_s6 + $0xc08] sm:$0xf]  ;;  %v6269_v34 = vld [vmem:[%s6610_s6 + $0xc20] sm:$0xf0]  ;;  %v4761_v39 = vor.u32 %v6052_v27, %v4760_v26  ;;  %v5405_v41 = vor.u32 %v6213_v32, %v5404_v30  ;;  %v5152_v43 = vld [vmem:[%s6610_s6 + $0x850] sm:$0xf] }
  0x3c   : > { %3198 = vmatpush.bf16.msra.mxu1 %v4369_v5  ;;  %v5852_v37 = vld [vmem:[%s6610_s6 + $0xdc8] sm:$0xf]  ;;  %v6325_v38 = vld [vmem:[%s6610_s6 + $0xde0] sm:$0xf0]  ;;  %v5629_v42 = vor.u32 %v6269_v34, %v5628_v33  ;;  %v6150_v44 = vld [vmem:[%s6610_s6 + $0x868] sm:$0xf0] }
  0x3d   : > { %3211 = vmatpush.bf16.msra.mxu2 %v4593_v6  ;;  %v5376_v45 = vld [vmem:[%s6610_s6 + $0xa10] sm:$0xf]  ;;  %v5853_v46 = vor.u32 %v6325_v38, %v5852_v37  ;;  %v6206_v47 = vld [vmem:[%s6610_s6 + $0xa28] sm:$0xf0]  ;;  %v5153_v52 = vor.u32 %v6150_v44, %v5152_v43  ;;  %v5124_v53 = vld [vmem:[%s6610_s6 + $0x818] sm:$0xf] }
  0x3e   : > { %3224 = vmatpush.bf16.msra.mxu3 %v4817_v10  ;;  %v5600_v48 = vld [vmem:[%s6610_s6 + $0xbd0] sm:$0xf]  ;;  %v6262_v49 = vld [vmem:[%s6610_s6 + $0xbe8] sm:$0xf0]  ;;  %v5377_v54 = vor.u32 %v6206_v47, %v5376_v45  ;;  %v6143_v56 = vld [vmem:[%s6610_s6 + $0x830] sm:$0xf0] }
  0x3f   : > { %3186 = vmatpush.bf16.msra.mxu0 %v4117_v16  ;;  %v5824_v50 = vld [vmem:[%s6610_s6 + $0xd90] sm:$0xf]  ;;  %v6318_v51 = vld [vmem:[%s6610_s6 + $0xda8] sm:$0xf0]  ;;  %v5601_v55 = vor.u32 %v6262_v49, %v5600_v48  ;;  %v5348_v57 = vld [vmem:[%s6610_s6 + $0x9d8] sm:$0xf]  ;;  %v5125_v3 = vor.u32 %v6143_v56, %v5124_v53 }
  0x40   : > { %3199 = vmatpush.bf16.msra.mxu1 %v4341_v19  ;;  %v317_v58 = vld [vmem:[%s7710_s0 + $0x8] sm:$0xff]  ;;  %v5825_v59 = vor.u32 %v6318_v51, %v5824_v50  ;;  %v6199_v60 = vld [vmem:[%s6610_s6 + $0x9f0] sm:$0xf0]  ;;  %v5572_v61 = vld [vmem:[%s6610_s6 + $0xb98] sm:$0xf]  ;;  %p7094_p13 = scmp.lt.s32.totalorder %s302_s21, 48 }
  0x41   : > { %3212 = vmatpush.bf16.msra.mxu2 %v4565_v20  ;;  %v6255_v62 = vld [vmem:[%s6610_s6 + $0xbb0] sm:$0xf0]  ;;  %v854_v63 = vunpack.c.l.b16 %v317_v58  ;;  %v855_v0 = vunpack.c.h.b16 %v317_v58  ;;  %v5796_v1 = vld [vmem:[%s6610_s6 + $0xd58] sm:$0xf]  ;;  %v316_v5 = vld [vmem:[%s7710_s0] sm:$0xff]  ;;  %v5349_v7 = vor.u32 %v6199_v60, %v5348_v57 }
  0x42   : > { %3225 = vmatpush.bf16.msra.mxu3 %v4789_v24  ;;  %v6311_v2 = vld [vmem:[%s6610_s6 + $0xd70] sm:$0xf0]  ;;  %v5573_v8 = vor.u32 %v6255_v62, %v5572_v61  ;;  %v5096_v9 = vld [vmem:[%s6610_s6 + $0x7e0] sm:$0xf]  ;;  %v6136_v10 = vld [vmem:[%s6610_s6 + $0x7f8] sm:$0xf0]  ;;  %v852_v12 = vunpack.c.l.b16 %v316_v5  ;;  %v853_v13 = vunpack.c.h.b16 %v316_v5 }
  0x43   : > { %3187 = vmatpush.bf16.msra.mxu0 %v4089_v31  ;;  %v6713_v4 = vpack.c.b16 %v854_v63, %v854_v63  ;;  %v6718_v6 = vpack.c.b16 %v855_v0, %v855_v0  ;;  %v5320_v11 = vld [vmem:[%s6610_s6 + $0x9a0] sm:$0xf]  ;;  %v5797_v14 = vor.u32 %v6311_v2, %v5796_v1  ;;  %v6192_v15 = vld [vmem:[%s6610_s6 + $0x9b8] sm:$0xf0]  ;;  %v5097_v22 = vor.u32 %v6136_v10, %v5096_v9  ;;  %v5068_v25 = vld [vmem:[%s6610_s6 + $0x7a8] sm:$0xf] }
  0x44   : > { %3200 = vmatpush.bf16.msra.mxu1 %v4313_v35  ;;  %v5544_v16 = vld [vmem:[%s6610_s6 + $0xb60] sm:$0xf]  ;;  %v6248_v17 = vld [vmem:[%s6610_s6 + $0xb78] sm:$0xf0]  ;;  %v6729_v20 = vpack.c.b16 %v852_v12, %v852_v12  ;;  %v6732_v21 = vpack.c.b16 %v853_v13, %v853_v13  ;;  %v5321_v23 = vor.u32 %v6192_v15, %v5320_v11  ;;  %v6129_v26 = vld [vmem:[%s6610_s6 + $0x7c0] sm:$0xf0] }
  0x45   : > { %3213 = vmatpush.bf16.msra.mxu2 %v4537_v36  ;;  %v5768_v18 = vld [vmem:[%s6610_s6 + $0xd20] sm:$0xf]  ;;  %v6304_v19 = vld [vmem:[%s6610_s6 + $0xd38] sm:$0xf0]  ;;  %v5545_v24 = vor.u32 %v6248_v17, %v5544_v16  ;;  %v5292_v27 = vld [vmem:[%s6610_s6 + $0x968] sm:$0xf]  ;;  %v5069_v34 = vor.u32 %v6129_v26, %v5068_v25 }
  0x46   : > { %3226 = vmatpush.bf16.msra.mxu3 %v4761_v39  ;;  %v5769_v28 = vor.u32 %v6304_v19, %v5768_v18  ;;  %v6185_v29 = vld [vmem:[%s6610_s6 + $0x980] sm:$0xf0]  ;;  %v5516_v30 = vld [vmem:[%s6610_s6 + $0xb28] sm:$0xf]  ;;  %3188 = vmatmul.bf16.vlgmr.msra.gmra.mxu0 %v6729_v20  ;;  %v5040_v37 = vld [vmem:[%s6610_s6 + $0x770] sm:$0xf] }
  0x47   : > { %3232 = vmatpush.bf16.msrb.mxu0 %v5181_v40  ;;  %v6241_v31 = vld [vmem:[%s6610_s6 + $0xb40] sm:$0xf0]  ;;  %v5740_v32 = vld [vmem:[%s6610_s6 + $0xce8] sm:$0xf]  ;;  %3201 = vmatmul.bf16.vlgmr.msra.gmra.mxu1 %v6732_v21  ;;  %v5293_v35 = vor.u32 %v6185_v29, %v5292_v27  ;;  %v6122_v38 = vld [vmem:[%s6610_s6 + $0x788] sm:$0xf0] }
  0x48   : > { %3245 = vmatpush.bf16.msrb.mxu1 %v5405_v41  ;;  %3214 = vmatmul.bf16.vlgmr.msra.gmra.mxu2 %v6713_v4  ;;  %v6297_v33 = vld [vmem:[%s6610_s6 + $0xd00] sm:$0xf0]  ;;  %v5517_v36 = vor.u32 %v6241_v31, %v5516_v30  ;;  %v5264_v39 = vld [vmem:[%s6610_s6 + $0x930] sm:$0xf]  ;;  %v6178_v41 = vld [vmem:[%s6610_s6 + $0x948] sm:$0xf0] }
  0x49   : > { %3258 = vmatpush.bf16.msrb.mxu2 %v5629_v42  ;;  %3227 = vmatmul.bf16.vlgmr.msra.gmra.mxu3 %v6718_v6  ;;  %v5741_v40 = vor.u32 %v6297_v33, %v5740_v32  ;;  %v5488_v42 = vld [vmem:[%s6610_s6 + $0xaf0] sm:$0xf]  ;;  %v6234_v43 = vld [vmem:[%s6610_s6 + $0xb08] sm:$0xf0]  ;;  %v5265_v47 = vor.u32 %v6178_v41, %v5264_v39  ;;  %v5012_v49 = vld [vmem:[%s6610_s6 + $0x738] sm:$0xf] }
  0x4a   : > { %3271 = vmatpush.bf16.msrb.mxu3 %v5853_v46  ;;  %v5712_v44 = vld [vmem:[%s6610_s6 + $0xcb0] sm:$0xf]  ;;  %v6290_v45 = vld [vmem:[%s6610_s6 + $0xcc8] sm:$0xf0]  ;;  %v5041_v46 = vor.u32 %v6122_v38, %v5040_v37  ;;  %v5489_v48 = vor.u32 %v6234_v43, %v5488_v42  ;;  %v6115_v50 = vld [vmem:[%s6610_s6 + $0x750] sm:$0xf0] }
  0x4b   : > { %3233 = vmatpush.bf16.msrb.mxu0 %v5153_v52  ;;  %v5236_v51 = vld [vmem:[%s6610_s6 + $0x8f8] sm:$0xf]  ;;  %v5713_v52 = vor.u32 %v6290_v45, %v5712_v44  ;;  %v6171_v53 = vld [vmem:[%s6610_s6 + $0x910] sm:$0xf0]  ;;  %v4984_v58 = vld [vmem:[%s6610_s6 + $0x700] sm:$0xf] }
  0x4c   : > { %3246 = vmatpush.bf16.msrb.mxu1 %v5377_v54  ;;  %v5460_v54 = vld [vmem:[%s6610_s6 + $0xab8] sm:$0xf]  ;;  %v6283_v57 = vld [vmem:[%s6610_s6 + $0xc90] sm:$0xf0]  ;;  %v6108_v60 = vld [vmem:[%s6610_s6 + $0x718] sm:$0xf0]  ;;  %v5237_v63 = vor.u32 %v6171_v53, %v5236_v51 }
  0x4d   : > { %3259 = vmatpush.bf16.msrb.mxu2 %v5601_v55  ;;  %v6227_v55 = vld [vmem:[%s6610_s6 + $0xad0] sm:$0xf0]  ;;  %v5684_v56 = vld [vmem:[%s6610_s6 + $0xc78] sm:$0xf]  ;;  %v5208_v61 = vld [vmem:[%s6610_s6 + $0x8c0] sm:$0xf]  ;;  %v4985_v13 = vor.u32 %v6108_v60, %v4984_v58 }
  0x4e   : > { %3272 = vmatpush.bf16.msrb.mxu3 %v5825_v59  ;;  %v5013_v59 = vor.u32 %v6115_v50, %v5012_v49  ;;  %v6164_v62 = vld [vmem:[%s6610_s6 + $0x8d8] sm:$0xf0]  ;;  %v5461_v0 = vor.u32 %v6227_v55, %v5460_v54  ;;  %v5432_v1 = vld [vmem:[%s6610_s6 + $0xa80] sm:$0xf]  ;;  %v5685_v5 = vor.u32 %v6283_v57, %v5684_v56  ;;  %v318_v9 = vld [vmem:[%s7710_s0 + $0x10] sm:$0xff]  ;;  %s7725_s21 = smov (!%p7094_p13, %s302_s21), 48 }
  0x4f   : > { %3234 = vmatpush.bf16.msrb.mxu0 %v5125_v3  ;;  %v6220_v2 = vld [vmem:[%s6610_s6 + $0xa98] sm:$0xf0]  ;;  %v5930_v10 = vld [vmem:[%s6610_s6 + $0x18c] sm:$0xf]  ;;  %v4286_v11 = vld [vmem:[%s6610_s6 + $0x1a4] sm:$0xf0]  ;;  %v5209_v18 = vor.u32 %v6164_v62, %v5208_v61 }
  0x50   : > { %3247 = vmatpush.bf16.msrb.mxu1 %v5349_v7  ;;  %v319_v3 = vld [vmem:[%s7710_s0 + $0x18] sm:$0xff]  ;;  %v5656_v7 = vld [vmem:[%s6610_s6 + $0xc40] sm:$0xf]  ;;  %v5986_v12 = vld [vmem:[%s6610_s6 + $0x34c] sm:$0xf]  ;;  %v5433_v19 = vor.u32 %v6220_v2, %v5432_v1  ;;  %v4289_v27 = vor.u32 %v5930_v10, %v4286_v11  ;;  %s4085_s15 = sshll.u32 %s7725_s21, 3 }
  0x51   : > { %3260 = vmatpush.bf16.msrb.mxu2 %v5573_v8  ;;  %v6276_v8 = vld [vmem:[%s6610_s6 + $0xc58] sm:$0xf0]  ;;  %v6042_v15 = vld [vmem:[%s6610_s6 + $0x50c] sm:$0xf]  ;;  %v4734_v16 = vld [vmem:[%s6610_s6 + $0x524] sm:$0xf0]  ;;  %v858_v17 = vunpack.c.l.b16 %v319_v3  ;;  %v859_v25 = vunpack.c.h.b16 %v319_v3  ;;  %s7133_s28 = scalar_lea.vmem %s7713_s3, %s4085_s15 }
  0x52   : > { %3273 = vmatpush.bf16.msrb.mxu3 %v5797_v14  ;;  %v4510_v14 = vld [vmem:[%s6610_s6 + $0x364] sm:$0xf0]  ;;  %v5657_v26 = vor.u32 %v6276_v8, %v5656_v7  ;;  %v4737_v30 = vor.u32 %v6042_v15, %v4734_v16  ;;  %v5923_v31 = vld [vmem:[%s6610_s6 + $0x154] sm:$0xf]  ;;  %v4258_v32 = vld [vmem:[%s6610_s6 + $0x16c] sm:$0xf0] }
  0x53   : > { %3235 = vmatpush.bf16.msrb.mxu0 %v5097_v22  ;;  %v6098_v22 = vld [vmem:[%s6610_s6 + $0x6cc] sm:$0xf]  ;;  %v4513_v29 = vor.u32 %v5986_v12, %v4510_v14  ;;  %v5979_v33 = vld [vmem:[%s6610_s6 + $0x314] sm:$0xf]  ;;  %v4706_v37 = vld [vmem:[%s6610_s6 + $0x4ec] sm:$0xf0]  ;;  %v6788_v38 = vpack.c.b16 %v858_v17, %v858_v17  ;;  %v6794_v42 = vpack.c.b16 %v859_v25, %v859_v25  ;;  %v4261_v43 = vor.u32 %v5923_v31, %v4258_v32 }
  0x54   : > { %3248 = vmatpush.bf16.msrb.mxu1 %v5321_v23  ;;  %v4958_v23 = vld [vmem:[%s6610_s6 + $0x6e4] sm:$0xf0]  ;;  %v6091_v39 = vld [vmem:[%s6610_s6 + $0x694] sm:$0xf]  ;;  %v5972_v49 = vld [vmem:[%s6610_s6 + $0x2dc] sm:$0xf] }
  0x55   : > { %3261 = vmatpush.bf16.msrb.mxu2 %v5545_v24  ;;  %v856_v24 = vunpack.c.l.b16 %v318_v9  ;;  %v4454_v51 = vld [vmem:[%s6610_s6 + $0x2f4] sm:$0xf0]  ;;  %v6084_v54 = vld [vmem:[%s6610_s6 + $0x65c] sm:$0xf]  ;;  %v4202_v60 = vld [vmem:[%s6610_s6 + $0xfc] sm:$0xf0] }
  0x56   : > { %3274 = vmatpush.bf16.msrb.mxu3 %v5769_v28  ;;  %v857_v28 = vunpack.c.h.b16 %v318_v9  ;;  %v4678_v53 = vld [vmem:[%s6610_s6 + $0x4b4] sm:$0xf0]  ;;  %v4457_v57 = vor.u32 %v5972_v49, %v4454_v51  ;;  %v5965_v61 = vld [vmem:[%s6610_s6 + $0x2a4] sm:$0xf]  ;;  %v4650_v1 = vld [vmem:[%s6610_s6 + $0x47c] sm:$0xf0] }
  0x57   : > { %3236 = vmatpush.bf16.msrb.mxu0 %v5069_v34  ;;  %v4961_v34 = vor.u32 %v6098_v22, %v4958_v23  ;;  %v6792_v41 = vpack.c.b16 %v856_v24, %v856_v24  ;;  %v4902_v55 = vld [vmem:[%s6610_s6 + $0x674] sm:$0xf0]  ;;  %v6077_v2 = vld [vmem:[%s6610_s6 + $0x624] sm:$0xf]  ;;  %v4874_v3 = vld [vmem:[%s6610_s6 + $0x63c] sm:$0xf0] }
  0x58   : > { %3249 = vmatpush.bf16.msrb.mxu1 %v5293_v35  ;;  %v4482_v35 = vld [vmem:[%s6610_s6 + $0x32c] sm:$0xf0]  ;;  %v6796_v44 = vpack.c.b16 %v857_v28, %v857_v28  ;;  %v4905_v62 = vor.u32 %v6084_v54, %v4902_v55  ;;  %v5902_v9 = vld [vmem:[%s6610_s6 + $0xac] sm:$0xf]  ;;  %v4174_v10 = vld [vmem:[%s6610_s6 + $0xc4] sm:$0xf0]  ;;  %v4877_v12 = vor.u32 %v6077_v2, %v4874_v3 }
  0x59   : > { %3262 = vmatpush.bf16.msrb.mxu2 %v5517_v36  ;;  %v6035_v36 = vld [vmem:[%s6610_s6 + $0x4d4] sm:$0xf]  ;;  %v4485_v45 = vor.u32 %v5979_v33, %v4482_v35  ;;  %v5958_v11 = vld [vmem:[%s6610_s6 + $0x26c] sm:$0xf]  ;;  %v4622_v15 = vld [vmem:[%s6610_s6 + $0x444] sm:$0xf0] }
  0x5a   : > { %3275 = vmatpush.bf16.msrb.mxu3 %v5741_v40  ;;  %v4930_v40 = vld [vmem:[%s6610_s6 + $0x6ac] sm:$0xf0]  ;;  %v6014_v14 = vld [vmem:[%s6610_s6 + $0x42c] sm:$0xf]  ;;  %v4846_v17 = vld [vmem:[%s6610_s6 + $0x604] sm:$0xf0] }
  0x5b   : > { %3237 = vmatpush.bf16.msrb.mxu0 %v5041_v46  ;;  %v4709_v46 = vor.u32 %v6035_v36, %v4706_v37  ;;  %v4933_v50 = vor.u32 %v6091_v39, %v4930_v40  ;;  %v6070_v16 = vld [vmem:[%s6610_s6 + $0x5ec] sm:$0xf]  ;;  %v4625_v22 = vor.u32 %v6014_v14, %v4622_v15  ;;  %v5895_v23 = vld [vmem:[%s6610_s6 + $0x74] sm:$0xf]  ;;  %v4146_v24 = vld [vmem:[%s6610_s6 + $0x8c] sm:$0xf0] }
  0x5c   : > { %3250 = vmatpush.bf16.msrb.mxu1 %v5265_v47  ;;  %v5916_v47 = vld [vmem:[%s6610_s6 + $0x11c] sm:$0xf]  ;;  %v5951_v25 = vld [vmem:[%s6610_s6 + $0x234] sm:$0xf]  ;;  %v4818_v31 = vld [vmem:[%s6610_s6 + $0x5cc] sm:$0xf0]  ;;  %v4149_v32 = vor.u32 %v5895_v23, %v4146_v24 }
  0x5d   : > { %3263 = vmatpush.bf16.msrb.mxu2 %v5489_v48  ;;  %v4230_v48 = vld [vmem:[%s6610_s6 + $0x134] sm:$0xf0]  ;;  %v6007_v28 = vld [vmem:[%s6610_s6 + $0x3f4] sm:$0xf]  ;;  %v5888_v35 = vld [vmem:[%s6610_s6 + $0x3c] sm:$0xf] }
  0x5e   : > { %3276 = vmatpush.bf16.msrb.mxu3 %v5713_v52  ;;  %v6028_v52 = vld [vmem:[%s6610_s6 + $0x49c] sm:$0xf]  ;;  %v4233_v56 = vor.u32 %v5916_v47, %v4230_v48  ;;  %v4118_v36 = vld [vmem:[%s6610_s6 + $0x54] sm:$0xf0]  ;;  %v5881_v49 = vld [vmem:[%s6610_s6 + $0x4] sm:$0xf] }
  0x5f   : > { %3238 = vmatpush.bf16.msrb.mxu0 %v5013_v59  ;;  %v4681_v58 = vor.u32 %v6028_v52, %v4678_v53  ;;  %v5909_v59 = vld [vmem:[%s6610_s6 + $0xe4] sm:$0xf]  ;;  %v5944_v37 = vld [vmem:[%s6610_s6 + $0x1fc] sm:$0xf]  ;;  %v4342_v40 = vld [vmem:[%s6610_s6 + $0x214] sm:$0xf0]  ;;  %v4121_v48 = vor.u32 %v5888_v35, %v4118_v36 }
  0x60   : > { %3251 = vmatpush.bf16.msrb.mxu1 %v5237_v63  ;;  %v4426_v63 = vld [vmem:[%s6610_s6 + $0x2bc] sm:$0xf0]  ;;  %v4790_v47 = vld [vmem:[%s6610_s6 + $0x594] sm:$0xf0]  ;;  %v4345_v51 = vor.u32 %v5944_v37, %v4342_v40  ;;  %v5937_v53 = vld [vmem:[%s6610_s6 + $0x1c4] sm:$0xf] }
  0x61   : > { %3264 = vmatpush.bf16.msrb.mxu2 %v5461_v0  ;;  %v6021_v0 = vld [vmem:[%s6610_s6 + $0x464] sm:$0xf]  ;;  %v4429_v7 = vor.u32 %v5965_v61, %v4426_v63  ;;  %v4314_v54 = vld [vmem:[%s6610_s6 + $0x1dc] sm:$0xf0]  ;;  %v5182_v61 = vld [vmem:[%s6610_s6 + $0x8a4] sm:$0xf0] }
  0x62   : > { %3277 = vmatpush.bf16.msrb.mxu3 %v5685_v5  ;;  %v4205_v5 = vor.u32 %v5909_v59, %v4202_v60  ;;  %v4653_v8 = vor.u32 %v6021_v0, %v4650_v1  ;;  %v5993_v55 = vld [vmem:[%s6610_s6 + $0x384] sm:$0xf]  ;;  %v4762_v59 = vld [vmem:[%s6610_s6 + $0x55c] sm:$0xf0]  ;;  %v6154_v60 = vld [vmem:[%s6610_s6 + $0x88c] sm:$0xf]  ;;  %v4317_v3 = vor.u32 %v5937_v53, %v4314_v54 }
  0x63   : > { %3239 = vmatpush.bf16.msrb.mxu0 %v4985_v13  ;;  %v4398_v13 = vld [vmem:[%s6610_s6 + $0x284] sm:$0xf0]  ;;  %v6266_v1 = vld [vmem:[%s6610_s6 + $0xc0c] sm:$0xf]  ;;  %v5154_v14 = vld [vmem:[%s6610_s6 + $0x86c] sm:$0xf0] }
  0x64   : > { %3252 = vmatpush.bf16.msrb.mxu1 %v5209_v18  ;;  %v4177_v18 = vor.u32 %v5902_v9, %v4174_v10  ;;  %v5406_v0 = vld [vmem:[%s6610_s6 + $0xa64] sm:$0xf0]  ;;  %v5185_v10 = vor.u32 %v6154_v60, %v5182_v61  ;;  %v6203_v15 = vld [vmem:[%s6610_s6 + $0xa14] sm:$0xf]  ;;  %v5826_v23 = vld [vmem:[%s6610_s6 + $0xdac] sm:$0xf0] }
  0x65   : > { %3265 = vmatpush.bf16.msrb.mxu2 %v5433_v19  ;;  %v4401_v19 = vor.u32 %v5958_v11, %v4398_v13  ;;  %v5630_v2 = vld [vmem:[%s6610_s6 + $0xc24] sm:$0xf0]  ;;  %v6147_v13 = vld [vmem:[%s6610_s6 + $0x854] sm:$0xf]  ;;  %v5798_v35 = vld [vmem:[%s6610_s6 + $0xd74] sm:$0xf0] }
  0x66   : > { %3278 = vmatpush.bf16.msrb.mxu3 %v5657_v26  ;;  %3240 = vmatmul.bf16.vlgmr.msrb.gmra.mxu0 %v6792_v41  ;;  %v4849_v26 = vor.u32 %v6070_v16, %v4846_v17  ;;  %v5378_v17 = vld [vmem:[%s6610_s6 + $0xa2c] sm:$0xf0]  ;;  %v5157_v24 = vor.u32 %v6147_v13, %v5154_v14  ;;  %v6133_v40 = vld [vmem:[%s6610_s6 + $0x7e4] sm:$0xf]  ;;  %v6238_v60 = vld [vmem:[%s6610_s6 + $0xb2c] sm:$0xf] }
  0x67   : > { %3284 = vmatpush.bf16.msra.mxu0 %v4289_v27  ;;  %3253 = vmatmul.bf16.vlgmr.msrb.gmra.mxu1 %v6796_v44  ;;  %v4370_v27 = vld [vmem:[%s6610_s6 + $0x24c] sm:$0xf0]  ;;  %v5518_v61 = vld [vmem:[%s6610_s6 + $0xb44] sm:$0xf0] }
  0x68   : > { %3297 = vmatpush.bf16.msra.mxu1 %v4513_v29  ;;  %3266 = vmatmul.bf16.vlgmr.msrb.gmra.mxu2 %v6788_v38  ;;  %v4594_v29 = vld [vmem:[%s6610_s6 + $0x40c] sm:$0xf0]  ;;  %v4373_v33 = vor.u32 %v5951_v25, %v4370_v27  ;;  %v5381_v25 = vor.u32 %v6203_v15, %v5378_v17  ;;  %v6140_v27 = vld [vmem:[%s6610_s6 + $0x81c] sm:$0xf] }
  0x69   : > { %3310 = vmatpush.bf16.msra.mxu2 %v4737_v30  ;;  %3279 = vmatmul.bf16.vlgmr.msrb.gmra.mxu3 %v6794_v42  ;;  %v6063_v30 = vld [vmem:[%s6610_s6 + $0x5b4] sm:$0xf]  ;;  %v5714_v13 = vld [vmem:[%s6610_s6 + $0xccc] sm:$0xf0]  ;;  %v6112_v17 = vld [vmem:[%s6610_s6 + $0x73c] sm:$0xf] }
  0x6a   : > { %3323 = vmatpush.bf16.msra.mxu3 %v4961_v34  ;;  %v4597_v34 = vor.u32 %v6007_v28, %v4594_v29  ;;  %v4821_v39 = vor.u32 %v6063_v30, %v4818_v31  ;;  %v5126_v28 = vld [vmem:[%s6610_s6 + $0x834] sm:$0xf0]  ;;  %v6196_v29 = vld [vmem:[%s6610_s6 + $0x9dc] sm:$0xf] }
  0x6b   : > { %3285 = vmatpush.bf16.msra.mxu0 %v4261_v43  ;;  %v6000_v43 = vld [vmem:[%s6610_s6 + $0x3bc] sm:$0xf]  ;;  %v5350_v31 = vld [vmem:[%s6610_s6 + $0x9f4] sm:$0xf0]  ;;  %v5129_v36 = vor.u32 %v6140_v27, %v5126_v28 }
  0x6c   : > { %3298 = vmatpush.bf16.msra.mxu1 %v4485_v45  ;;  %v4566_v45 = vld [vmem:[%s6610_s6 + $0x3d4] sm:$0xf0]  ;;  %v5353_v37 = vor.u32 %v6196_v29, %v5350_v31  ;;  %v6105_v29 = vld [vmem:[%s6610_s6 + $0x704] sm:$0xf] }
  0x6d   : > { %3311 = vmatpush.bf16.msra.mxu2 %v4709_v46  ;;  %v6056_v46 = vld [vmem:[%s6610_s6 + $0x57c] sm:$0xf]  ;;  %v4569_v52 = vor.u32 %v6000_v43, %v4566_v45  ;;  %v5098_v43 = vld [vmem:[%s6610_s6 + $0x7fc] sm:$0xf0]  ;;  %v6189_v45 = vld [vmem:[%s6610_s6 + $0x9a4] sm:$0xf] }
  0x6e   : > { %3324 = vmatpush.bf16.msra.mxu3 %v4933_v50  ;;  %v4090_v50 = vld [vmem:[%s6610_s6 + $0x1c] sm:$0xf0]  ;;  %v5686_v27 = vld [vmem:[%s6610_s6 + $0xc94] sm:$0xf0] }
  0x6f   : > { %3286 = vmatpush.bf16.msra.mxu0 %v4233_v56  ;;  %v4793_v56 = vor.u32 %v6056_v46, %v4790_v47  ;;  %v4093_v63 = vor.u32 %v5881_v49, %v4090_v50  ;;  %v5322_v47 = vld [vmem:[%s6610_s6 + $0x9bc] sm:$0xf0]  ;;  %v6301_v50 = vld [vmem:[%s6610_s6 + $0xd24] sm:$0xf] }
  0x70   : > { %3299 = vmatpush.bf16.msra.mxu1 %v4457_v57  ;;  %v4538_v57 = vld [vmem:[%s6610_s6 + $0x39c] sm:$0xf0]  ;;  %v5325_v53 = vor.u32 %v6189_v45, %v5322_v47  ;;  %v5934_v45 = vld [vmem:[%s6610_s6 + $0x1a8] sm:$0xf0] }
  0x71   : > { %3312 = vmatpush.bf16.msra.mxu2 %v4681_v58  ;;  %v6049_v58 = vld [vmem:[%s6610_s6 + $0x544] sm:$0xf]  ;;  %v5546_v49 = vld [vmem:[%s6610_s6 + $0xb7c] sm:$0xf0] }
  0x72   : > { %3325 = vmatpush.bf16.msra.mxu3 %v4905_v62  ;;  %v6210_v62 = vld [vmem:[%s6610_s6 + $0xa4c] sm:$0xf]  ;;  %v4765_v9 = vor.u32 %v6049_v58, %v4762_v59  ;;  %v5294_v59 = vld [vmem:[%s6610_s6 + $0x984] sm:$0xf0] }
  0x73   : > { %3287 = vmatpush.bf16.msra.mxu0 %v4205_v5  ;;  %v4541_v5 = vor.u32 %v5993_v55, %v4538_v57  ;;  %v5409_v11 = vor.u32 %v6210_v62, %v5406_v0  ;;  %v6126_v55 = vld [vmem:[%s6610_s6 + $0x7ac] sm:$0xf] }
  0x74   : > { %3300 = vmatpush.bf16.msra.mxu1 %v4429_v7  ;;  %v6322_v7 = vld [vmem:[%s6610_s6 + $0xdcc] sm:$0xf] }
  0x75   : > { %3313 = vmatpush.bf16.msra.mxu2 %v4653_v8  ;;  %v5854_v8 = vld [vmem:[%s6610_s6 + $0xde4] sm:$0xf0]  ;;  %v6182_v57 = vld [vmem:[%s6610_s6 + $0x96c] sm:$0xf] }
  0x76   : > { %3326 = vmatpush.bf16.msra.mxu3 %v4877_v12  ;;  %v5633_v12 = vor.u32 %v6266_v1, %v5630_v2  ;;  %v5857_v16 = vor.u32 %v6322_v7, %v5854_v8  ;;  %v6294_v62 = vld [vmem:[%s6610_s6 + $0xcec] sm:$0xf]  ;;  %v5297_v1 = vor.u32 %v6182_v57, %v5294_v59  ;;  %v5521_v2 = vor.u32 %v6238_v60, %v5518_v61  ;;  %v6175_v7 = vld [vmem:[%s6610_s6 + $0x934] sm:$0xf]  ;;  %v4264_v59 = vld [vmem:[%s6610_s6 + $0x158] sm:$0xf] }
  0x77   : > { %3288 = vmatpush.bf16.msra.mxu0 %v4177_v18  ;;  %v6259_v18 = vld [vmem:[%s6610_s6 + $0xbd4] sm:$0xf]  ;;  %v4488_v61 = vld [vmem:[%s6610_s6 + $0x318] sm:$0xf] }
  0x78   : > { %3301 = vmatpush.bf16.msra.mxu1 %v4401_v19  ;;  %v5602_v19 = vld [vmem:[%s6610_s6 + $0xbec] sm:$0xf0]  ;;  %v5927_v60 = vld [vmem:[%s6610_s6 + $0x170] sm:$0xf0] }
  0x79   : > { %3314 = vmatpush.bf16.msra.mxu2 %v4625_v22  ;;  %v6315_v22 = vld [vmem:[%s6610_s6 + $0xd94] sm:$0xf] }
  0x7a   : > { %3327 = vmatpush.bf16.msra.mxu3 %v4849_v26  ;;  %v5605_v26 = vor.u32 %v6259_v18, %v5602_v19  ;;  %v5829_v30 = vor.u32 %v6315_v22, %v5826_v23  ;;  %v5014_v18 = vld [vmem:[%s6610_s6 + $0x754] sm:$0xf0]  ;;  %v6168_v19 = vld [vmem:[%s6610_s6 + $0x8fc] sm:$0xf] }
  0x7b   : > { %3289 = vmatpush.bf16.msra.mxu0 %v4149_v32  ;;  %v6252_v32 = vld [vmem:[%s6610_s6 + $0xb9c] sm:$0xf]  ;;  %v5238_v23 = vld [vmem:[%s6610_s6 + $0x914] sm:$0xf0]  ;;  %v5017_v28 = vor.u32 %v6112_v17, %v5014_v18 }
  0x7c   : > { %3302 = vmatpush.bf16.msra.mxu1 %v4373_v33  ;;  %v5574_v33 = vld [vmem:[%s6610_s6 + $0xbb4] sm:$0xf0]  ;;  %v5241_v31 = vor.u32 %v6168_v19, %v5238_v23  ;;  %v6088_v17 = vld [vmem:[%s6610_s6 + $0x678] sm:$0xf0]  ;;  %v4208_v23 = vld [vmem:[%s6610_s6 + $0xe8] sm:$0xf] }
  0x7d   : > { %3315 = vmatpush.bf16.msra.mxu2 %v4597_v34  ;;  %v6308_v34 = vld [vmem:[%s6610_s6 + $0xd5c] sm:$0xf] }
  0x7e   : > { %3328 = vmatpush.bf16.msra.mxu3 %v4821_v39  ;;  %v5577_v39 = vor.u32 %v6252_v32, %v5574_v33  ;;  %v5801_v46 = vor.u32 %v6308_v34, %v5798_v35  ;;  %v6161_v33 = vld [vmem:[%s6610_s6 + $0x8c4] sm:$0xf]  ;;  %v5210_v34 = vld [vmem:[%s6610_s6 + $0x8dc] sm:$0xf0] }
  0x7f   : > { %3290 = vmatpush.bf16.msra.mxu0 %v4121_v48  ;;  %v6245_v48 = vld [vmem:[%s6610_s6 + $0xb64] sm:$0xf] }
  0x80   : > { %3303 = vmatpush.bf16.msra.mxu1 %v4345_v51  ;;  %v5770_v51 = vld [vmem:[%s6610_s6 + $0xd3c] sm:$0xf0]  ;;  %v5549_v54 = vor.u32 %v6245_v48, %v5546_v49  ;;  %v6217_v35 = vld [vmem:[%s6610_s6 + $0xa84] sm:$0xf]  ;;  %v5990_v48 = vld [vmem:[%s6610_s6 + $0x368] sm:$0xf0] }
  0x81   : > { %3316 = vmatpush.bf16.msra.mxu2 %v4569_v52  ;;  %v5101_v52 = vor.u32 %v6133_v40, %v5098_v43  ;;  %v5773_v58 = vor.u32 %v6301_v50, %v5770_v51  ;;  %v5658_v40 = vld [vmem:[%s6610_s6 + $0xc5c] sm:$0xf0]  ;;  %v4292_v43 = vld [vmem:[%s6610_s6 + $0x190] sm:$0xf]  ;;  %v6046_v50 = vld [vmem:[%s6610_s6 + $0x528] sm:$0xf0]  ;;  %v5213_v51 = vor.u32 %v6161_v33, %v5210_v34 }
  0x82   : > { %3329 = vmatpush.bf16.msra.mxu3 %v4793_v56  ;;  %v5070_v56 = vld [vmem:[%s6610_s6 + $0x7c4] sm:$0xf0]  ;;  %v4740_v49 = vld [vmem:[%s6610_s6 + $0x510] sm:$0xf] }
  0x83   : > { %3291 = vmatpush.bf16.msra.mxu0 %v4093_v63  ;;  %v5742_v63 = vld [vmem:[%s6610_s6 + $0xd04] sm:$0xf0]  ;;  %v5073_v0 = vor.u32 %v6126_v55, %v5070_v56  ;;  %v4293_v56 = vor.u32 %v5934_v45, %v4292_v43  ;;  %v4628_v43 = vld [vmem:[%s6610_s6 + $0x430] sm:$0xf]  ;;  %v6018_v45 = vld [vmem:[%s6610_s6 + $0x448] sm:$0xf0] }
  0x84   : > { %3304 = vmatpush.bf16.msra.mxu1 %v4317_v3  ;;  %v6119_v3 = vld [vmem:[%s6610_s6 + $0x774] sm:$0xf]  ;;  %v5745_v8 = vor.u32 %v6294_v62, %v5742_v63 }
  0x85   : > { %3317 = vmatpush.bf16.msra.mxu2 %v4541_v5  ;;  %v5042_v5 = vld [vmem:[%s6610_s6 + $0x78c] sm:$0xf0]  ;;  %v5983_v63 = vld [vmem:[%s6610_s6 + $0x330] sm:$0xf0] }
  0x86   : > { %3330 = vmatpush.bf16.msra.mxu3 %v4765_v9  ;;  %3292 = vmatmul.bf16.vlgmr.msra.gmra.mxu0 %v6729_v20  ;;  %v5266_v9 = vld [vmem:[%s6610_s6 + $0x94c] sm:$0xf0]  ;;  %v5045_v14 = vor.u32 %v6119_v3, %v5042_v5  ;;  %v6095_v3 = vld [vmem:[%s6610_s6 + $0x6b0] sm:$0xf0]  ;;  %v4265_v5 = vor.u32 %v5927_v60, %v4264_v59 }
  0x87   : > { %3336 = vmatpush.bf16.msrb.mxu0 %v5185_v10  ;;  %3305 = vmatmul.bf16.vlgmr.msra.gmra.mxu1 %v6732_v21  ;;  %v6231_v10 = vld [vmem:[%s6610_s6 + $0xaf4] sm:$0xf]  ;;  %v5269_v15 = vor.u32 %v6175_v7, %v5266_v9  ;;  %v4489_v7 = vor.u32 %v5983_v63, %v4488_v61  ;;  %v4236_v9 = vld [vmem:[%s6610_s6 + $0x120] sm:$0xf] }
  0x88   : > { %3349 = vmatpush.bf16.msrb.mxu1 %v5409_v11  ;;  %3318 = vmatmul.bf16.vlgmr.msra.gmra.mxu2 %v6713_v4  ;;  %v5490_v11 = vld [vmem:[%s6610_s6 + $0xb0c] sm:$0xf0]  ;;  %v6067_v59 = vld [vmem:[%s6610_s6 + $0x5d0] sm:$0xf0]  ;;  %v4124_v63 = vld [vmem:[%s6610_s6 + $0x40] sm:$0xf] }
  0x89   : > { %3362 = vmatpush.bf16.msrb.mxu2 %v5633_v12  ;;  %3331 = vmatmul.bf16.vlgmr.msra.gmra.mxu3 %v6718_v6  ;;  %v6287_v12 = vld [vmem:[%s6610_s6 + $0xcb4] sm:$0xf] }
  0x8a   : > { %3375 = vmatpush.bf16.msrb.mxu3 %v5857_v16  ;;  %v5493_v16 = vor.u32 %v6231_v10, %v5490_v11  ;;  %v5717_v22 = vor.u32 %v6287_v12, %v5714_v13  ;;  %v5920_v10 = vld [vmem:[%s6610_s6 + $0x138] sm:$0xf0]  ;;  %v4460_v11 = vld [vmem:[%s6610_s6 + $0x2e0] sm:$0xf] }
  0x8b   : > { %3337 = vmatpush.bf16.msrb.mxu0 %v5157_v24  ;;  %v6224_v24 = vld [vmem:[%s6610_s6 + $0xabc] sm:$0xf]  ;;  %v4237_v18 = vor.u32 %v5920_v10, %v4236_v9 }
  0x8c   : > { %3350 = vmatpush.bf16.msrb.mxu1 %v5381_v25  ;;  %v5462_v25 = vld [vmem:[%s6610_s6 + $0xad4] sm:$0xf0]  ;;  %v5976_v13 = vld [vmem:[%s6610_s6 + $0x2f8] sm:$0xf0] }
  0x8d   : > { %3363 = vmatpush.bf16.msrb.mxu2 %v5605_v26  ;;  %v6280_v26 = vld [vmem:[%s6610_s6 + $0xc7c] sm:$0xf]  ;;  %v5465_v32 = vor.u32 %v6224_v24, %v5462_v25  ;;  %v4461_v19 = vor.u32 %v5976_v13, %v4460_v11  ;;  %v5913_v24 = vld [vmem:[%s6610_s6 + $0x100] sm:$0xf0]  ;;  %v4432_v25 = vld [vmem:[%s6610_s6 + $0x2a8] sm:$0xf] }
  0x8e   : > { %3376 = vmatpush.bf16.msrb.mxu3 %v5829_v30  ;;  %v4986_v30 = vld [vmem:[%s6610_s6 + $0x71c] sm:$0xf0]  ;;  %v6060_v9 = vld [vmem:[%s6610_s6 + $0x598] sm:$0xf0]  ;;  %v4096_v11 = vld [vmem:[%s6610_s6 + $0x8] sm:$0xf] }
  0x8f   : > { %3338 = vmatpush.bf16.msrb.mxu0 %v5129_v36  ;;  %v5689_v36 = vor.u32 %v6280_v26, %v5686_v27  ;;  %v4989_v47 = vor.u32 %v6105_v29, %v4986_v30  ;;  %v5969_v27 = vld [vmem:[%s6610_s6 + $0x2c0] sm:$0xf0]  ;;  %v4880_v30 = vld [vmem:[%s6610_s6 + $0x628] sm:$0xf] }
  0x90   : > { %3351 = vmatpush.bf16.msrb.mxu1 %v5353_v37  ;;  %v5434_v37 = vld [vmem:[%s6610_s6 + $0xa9c] sm:$0xf0]  ;;  %v6025_v29 = vld [vmem:[%s6610_s6 + $0x480] sm:$0xf0]  ;;  %v4433_v33 = vor.u32 %v5969_v27, %v4432_v25  ;;  %v6158_v25 = vld [vmem:[%s6610_s6 + $0x8a8] sm:$0xf0] }
  0x91   : > { %3364 = vmatpush.bf16.msrb.mxu2 %v5577_v39  ;;  %v6273_v39 = vld [vmem:[%s6610_s6 + $0xc44] sm:$0xf] }
  0x92   : > { %3377 = vmatpush.bf16.msrb.mxu3 %v5801_v46  ;;  %v4516_v46 = vld [vmem:[%s6610_s6 + $0x350] sm:$0xf]  ;;  %v5661_v55 = vor.u32 %v6273_v39, %v5658_v40  ;;  %v5962_v40 = vld [vmem:[%s6610_s6 + $0x288] sm:$0xf0] }
  0x93   : > { %3339 = vmatpush.bf16.msrb.mxu0 %v5101_v52  ;;  %v5437_v52 = vor.u32 %v6217_v35, %v5434_v37  ;;  %v4517_v57 = vor.u32 %v5990_v48, %v4516_v46  ;;  %v4180_v35 = vld [vmem:[%s6610_s6 + $0xb0] sm:$0xf] }
  0x94   : > { %3352 = vmatpush.bf16.msrb.mxu1 %v5325_v53  ;;  %v4964_v53 = vld [vmem:[%s6610_s6 + $0x6d0] sm:$0xf] }
  0x95   : > { %3365 = vmatpush.bf16.msrb.mxu2 %v5549_v54  ;;  %v6102_v54 = vld [vmem:[%s6610_s6 + $0x6e8] sm:$0xf0]  ;;  %v4404_v37 = vld [vmem:[%s6610_s6 + $0x270] sm:$0xf] }
  0x96   : > { %3378 = vmatpush.bf16.msrb.mxu3 %v5773_v58  ;;  %v4741_v58 = vor.u32 %v6046_v50, %v4740_v49  ;;  %v4965_v62 = vor.u32 %v6102_v54, %v4964_v53  ;;  %v4852_v46 = vld [vmem:[%s6610_s6 + $0x5f0] sm:$0xf]  ;;  %v4405_v49 = vor.u32 %v5962_v40, %v4404_v37  ;;  %v4629_v50 = vor.u32 %v6018_v45, %v4628_v43  ;;  %v4376_v53 = vld [vmem:[%s6610_s6 + $0x238] sm:$0xf]  ;;  %v6151_v43 = vld [vmem:[%s6610_s6 + $0x870] sm:$0xf0] }
  0x97   : > { %3340 = vmatpush.bf16.msrb.mxu0 %v5073_v0  ;;  %v4712_v0 = vld [vmem:[%s6610_s6 + $0x4d8] sm:$0xf] }
  0x98   : > { %3353 = vmatpush.bf16.msrb.mxu1 %v5297_v1  ;;  %v6039_v1 = vld [vmem:[%s6610_s6 + $0x4f0] sm:$0xf0]  ;;  %v5160_v40 = vld [vmem:[%s6610_s6 + $0x858] sm:$0xf] }
  0x99   : > { %3366 = vmatpush.bf16.msrb.mxu2 %v5521_v2  ;;  %v4936_v2 = vld [vmem:[%s6610_s6 + $0x698] sm:$0xf] }
  0x9a   : > { %3379 = vmatpush.bf16.msrb.mxu3 %v5745_v8  ;;  %v4713_v8 = vor.u32 %v6039_v1, %v4712_v0  ;;  %v4937_v12 = vor.u32 %v6095_v3, %v4936_v2  ;;  %v5892_v0 = vld [vmem:[%s6610_s6 + $0x58] sm:$0xf0]  ;;  %v4348_v1 = vld [vmem:[%s6610_s6 + $0x200] sm:$0xf]  ;;  %v5384_v45 = vld [vmem:[%s6610_s6 + $0xa18] sm:$0xf] }
  0x9b   : > { %3341 = vmatpush.bf16.msrb.mxu0 %v5045_v14  ;;  %v4684_v14 = vld [vmem:[%s6610_s6 + $0x4a0] sm:$0xf]  ;;  %v5948_v3 = vld [vmem:[%s6610_s6 + $0x218] sm:$0xf0]  ;;  %v4125_v10 = vor.u32 %v5892_v0, %v4124_v63 }
  0x9c   : > { %3354 = vmatpush.bf16.msrb.mxu1 %v5269_v15  ;;  %v6032_v15 = vld [vmem:[%s6610_s6 + $0x4b8] sm:$0xf0]  ;;  %v4349_v13 = vor.u32 %v5948_v3, %v4348_v1  ;;  %v5104_v3 = vld [vmem:[%s6610_s6 + $0x7e8] sm:$0xf] }
  0x9d   : > { %3367 = vmatpush.bf16.msrb.mxu2 %v5493_v16  ;;  %v4908_v16 = vld [vmem:[%s6610_s6 + $0x660] sm:$0xf]  ;;  %v6312_v63 = vld [vmem:[%s6610_s6 + $0xd78] sm:$0xf0] }
  0x9e   : > { %3380 = vmatpush.bf16.msrb.mxu3 %v5717_v22  ;;  %v4685_v22 = vor.u32 %v6032_v15, %v4684_v14  ;;  %v4909_v26 = vor.u32 %v6088_v17, %v4908_v16  ;;  %v4320_v15 = vld [vmem:[%s6610_s6 + $0x1c8] sm:$0xf]  ;;  %v5941_v16 = vld [vmem:[%s6610_s6 + $0x1e0] sm:$0xf0] }
  0x9f   : > { %3342 = vmatpush.bf16.msrb.mxu0 %v5017_v28  ;;  %v4656_v28 = vld [vmem:[%s6610_s6 + $0x468] sm:$0xf] }
  0xa0   : > { %3355 = vmatpush.bf16.msrb.mxu1 %v5241_v31  ;;  %v6081_v31 = vld [vmem:[%s6610_s6 + $0x640] sm:$0xf0]  ;;  %v4657_v34 = vor.u32 %v6025_v29, %v4656_v28  ;;  %v4544_v17 = vld [vmem:[%s6610_s6 + $0x388] sm:$0xf]  ;;  %v6214_v28 = vld [vmem:[%s6610_s6 + $0xa68] sm:$0xf0] }
  0xa1   : > { %3368 = vmatpush.bf16.msrb.mxu2 %v5465_v32  ;;  %v4209_v32 = vor.u32 %v5913_v24, %v4208_v23  ;;  %v4881_v39 = vor.u32 %v6081_v31, %v4880_v30  ;;  %v6053_v23 = vld [vmem:[%s6610_s6 + $0x560] sm:$0xf0]  ;;  %v5188_v24 = vld [vmem:[%s6610_s6 + $0x890] sm:$0xf]  ;;  %v6270_v30 = vld [vmem:[%s6610_s6 + $0xc28] sm:$0xf0]  ;;  %v4321_v31 = vor.u32 %v5941_v16, %v4320_v15 }
  0xa2   : > { %3381 = vmatpush.bf16.msrb.mxu3 %v5689_v36  ;;  %v5906_v36 = vld [vmem:[%s6610_s6 + $0xc8] sm:$0xf0]  ;;  %v5636_v29 = vld [vmem:[%s6610_s6 + $0xc10] sm:$0xf] }
  0xa3   : > { %3343 = vmatpush.bf16.msrb.mxu0 %v4989_v47  ;;  %v6074_v47 = vld [vmem:[%s6610_s6 + $0x608] sm:$0xf0]  ;;  %v4181_v48 = vor.u32 %v5906_v36, %v4180_v35  ;;  %v5189_v36 = vor.u32 %v6158_v25, %v5188_v24  ;;  %v5524_v24 = vld [vmem:[%s6610_s6 + $0xb30] sm:$0xf] }
  0xa4   : > { %3356 = vmatpush.bf16.msrb.mxu1 %v5213_v51  ;;  %v4152_v51 = vld [vmem:[%s6610_s6 + $0x78] sm:$0xf]  ;;  %v4853_v54 = vor.u32 %v6074_v47, %v4852_v46  ;;  %v6207_v47 = vld [vmem:[%s6610_s6 + $0xa30] sm:$0xf0]  ;;  %v6242_v25 = vld [vmem:[%s6610_s6 + $0xb48] sm:$0xf0] }
  0xa5   : > { %3369 = vmatpush.bf16.msrb.mxu2 %v5437_v52  ;;  %v5899_v52 = vld [vmem:[%s6610_s6 + $0x90] sm:$0xf0] }
  0xa6   : > { %3382 = vmatpush.bf16.msrb.mxu3 %v5661_v55  ;;  %3344 = vmatmul.bf16.vlgmr.msrb.gmra.mxu0 %v6792_v41  ;;  %v5955_v55 = vld [vmem:[%s6610_s6 + $0x250] sm:$0xf0]  ;;  %v4153_v60 = vor.u32 %v5899_v52, %v4152_v51  ;;  %v5161_v52 = vor.u32 %v6151_v43, %v5160_v40 }
  0xa7   : > { %3388 = vmatpush.bf16.msra.mxu0 %v4293_v56  ;;  %3357 = vmatmul.bf16.vlgmr.msrb.gmra.mxu1 %v6796_v44  ;;  %v4600_v56 = vld [vmem:[%s6610_s6 + $0x3f8] sm:$0xf]  ;;  %v4377_v61 = vor.u32 %v5955_v55, %v4376_v53  ;;  %v6319_v51 = vld [vmem:[%s6610_s6 + $0xdb0] sm:$0xf0]  ;;  %v5385_v53 = vor.u32 %v6207_v47, %v5384_v45  ;;  %v5132_v55 = vld [vmem:[%s6610_s6 + $0x820] sm:$0xf] }
  0xa8   : > { %3401 = vmatpush.bf16.msra.mxu1 %v4517_v57  ;;  %3370 = vmatmul.bf16.vlgmr.msrb.gmra.mxu2 %v6788_v38  ;;  %v6011_v57 = vld [vmem:[%s6610_s6 + $0x410] sm:$0xf0] }
  0xa9   : > { %3414 = vmatpush.bf16.msra.mxu2 %v4741_v58  ;;  %3383 = vmatmul.bf16.vlgmr.msrb.gmra.mxu3 %v6794_v42  ;;  %v4824_v58 = vld [vmem:[%s6610_s6 + $0x5b8] sm:$0xf]  ;;  %v6291_v40 = vld [vmem:[%s6610_s6 + $0xcd0] sm:$0xf0] }
  0xaa   : > { %3427 = vmatpush.bf16.msra.mxu3 %v4965_v62  ;;  %v4601_v62 = vor.u32 %v6011_v57, %v4600_v56  ;;  %v4825_v2 = vor.u32 %v6067_v59, %v4824_v58  ;;  %v6144_v56 = vld [vmem:[%s6610_s6 + $0x838] sm:$0xf0]  ;;  %v5356_v57 = vld [vmem:[%s6610_s6 + $0x9e0] sm:$0xf] }
  0xab   : > { %3389 = vmatpush.bf16.msra.mxu0 %v4265_v5  ;;  %v4572_v5 = vld [vmem:[%s6610_s6 + $0x3c0] sm:$0xf]  ;;  %v6200_v59 = vld [vmem:[%s6610_s6 + $0x9f8] sm:$0xf0]  ;;  %v5133_v0 = vor.u32 %v6144_v56, %v5132_v55 }
  0xac   : > { %3402 = vmatpush.bf16.msra.mxu1 %v4489_v7  ;;  %v6004_v7 = vld [vmem:[%s6610_s6 + $0x3d8] sm:$0xf0]  ;;  %v5357_v1 = vor.u32 %v6200_v59, %v5356_v57  ;;  %v5468_v56 = vld [vmem:[%s6610_s6 + $0xac0] sm:$0xf] }
  0xad   : > { %3415 = vmatpush.bf16.msra.mxu2 %v4713_v8  ;;  %v4796_v8 = vld [vmem:[%s6610_s6 + $0x580] sm:$0xf]  ;;  %v4573_v14 = vor.u32 %v6004_v7, %v4572_v5  ;;  %v6137_v5 = vld [vmem:[%s6610_s6 + $0x800] sm:$0xf0]  ;;  %v5328_v7 = vld [vmem:[%s6610_s6 + $0x9a8] sm:$0xf] }
  0xae   : > { %3428 = vmatpush.bf16.msra.mxu3 %v4937_v12  ;;  %v5885_v12 = vld [vmem:[%s6610_s6 + $0x20] sm:$0xf0]  ;;  %v6172_v55 = vld [vmem:[%s6610_s6 + $0x918] sm:$0xf0]  ;;  %v5692_v59 = vld [vmem:[%s6610_s6 + $0xc80] sm:$0xf] }
  0xaf   : > { %3390 = vmatpush.bf16.msra.mxu0 %v4237_v18  ;;  %v4797_v18 = vor.u32 %v6060_v9, %v4796_v8  ;;  %v4097_v27 = vor.u32 %v5885_v12, %v4096_v11  ;;  %v6193_v9 = vld [vmem:[%s6610_s6 + $0x9c0] sm:$0xf0]  ;;  %v5776_v12 = vld [vmem:[%s6610_s6 + $0xd28] sm:$0xf]  ;;  %v6228_v57 = vld [vmem:[%s6610_s6 + $0xad8] sm:$0xf0] }
  0xb0   : > { %3403 = vmatpush.bf16.msra.mxu1 %v4461_v19  ;;  %v5997_v19 = vld [vmem:[%s6610_s6 + $0x3a0] sm:$0xf0]  ;;  %v5329_v15 = vor.u32 %v6193_v9, %v5328_v7  ;;  %v5440_v7 = vld [vmem:[%s6610_s6 + $0xa88] sm:$0xf] }
  0xb1   : > { %3416 = vmatpush.bf16.msra.mxu2 %v4685_v22  ;;  %v4768_v22 = vld [vmem:[%s6610_s6 + $0x548] sm:$0xf]  ;;  %v6249_v11 = vld [vmem:[%s6610_s6 + $0xb80] sm:$0xf0] }
  0xb2   : > { %3429 = vmatpush.bf16.msra.mxu3 %v4909_v26  ;;  %v5412_v26 = vld [vmem:[%s6610_s6 + $0xa50] sm:$0xf]  ;;  %v4769_v35 = vor.u32 %v6053_v23, %v4768_v22  ;;  %v6186_v23 = vld [vmem:[%s6610_s6 + $0x988] sm:$0xf0]  ;;  %v6221_v9 = vld [vmem:[%s6610_s6 + $0xaa0] sm:$0xf0] }
  0xb3   : > { %3391 = vmatpush.bf16.msra.mxu0 %v4209_v32  ;;  %v4545_v32 = vor.u32 %v5997_v19, %v4544_v17  ;;  %v5413_v37 = vor.u32 %v6214_v28, %v5412_v26  ;;  %v5076_v17 = vld [vmem:[%s6610_s6 + $0x7b0] sm:$0xf] }
  0xb4   : > { %3404 = vmatpush.bf16.msra.mxu1 %v4433_v33  ;;  %v5860_v33 = vld [vmem:[%s6610_s6 + $0xdd0] sm:$0xf] }
  0xb5   : > { %3417 = vmatpush.bf16.msra.mxu2 %v4657_v34  ;;  %v6326_v34 = vld [vmem:[%s6610_s6 + $0xde8] sm:$0xf0]  ;;  %v5300_v19 = vld [vmem:[%s6610_s6 + $0x970] sm:$0xf] }
  0xb6   : > { %3430 = vmatpush.bf16.msra.mxu3 %v4881_v39  ;;  %v5637_v39 = vor.u32 %v6270_v30, %v5636_v29  ;;  %v5861_v46 = vor.u32 %v6326_v34, %v5860_v33  ;;  %v5748_v26 = vld [vmem:[%s6610_s6 + $0xcf0] sm:$0xf]  ;;  %v5301_v29 = vor.u32 %v6186_v23, %v5300_v19  ;;  %v5525_v30 = vor.u32 %v6242_v25, %v5524_v24  ;;  %v5272_v33 = vld [vmem:[%s6610_s6 + $0x938] sm:$0xf]  ;;  %v6043_v19 = vld [vmem:[%s6610_s6 + $0x514] sm:$0xf] }
  0xb7   : > { %3392 = vmatpush.bf16.msra.mxu0 %v4181_v48  ;;  %v5608_v48 = vld [vmem:[%s6610_s6 + $0xbd8] sm:$0xf]  ;;  %v5441_v25 = vor.u32 %v6221_v9, %v5440_v7  ;;  %v5966_v7 = vld [vmem:[%s6610_s6 + $0x2ac] sm:$0xf]  ;;  %v4434_v9 = vld [vmem:[%s6610_s6 + $0x2c4] sm:$0xf0] }
  0xb8   : > { %3405 = vmatpush.bf16.msra.mxu1 %v4405_v49  ;;  %v6263_v49 = vld [vmem:[%s6610_s6 + $0xbf0] sm:$0xf0] }
  0xb9   : > { %3418 = vmatpush.bf16.msra.mxu2 %v4629_v50  ;;  %v5832_v50 = vld [vmem:[%s6610_s6 + $0xd98] sm:$0xf] }
  0xba   : > { %3431 = vmatpush.bf16.msra.mxu3 %v4853_v54  ;;  %v5609_v54 = vor.u32 %v6263_v49, %v5608_v48  ;;  %v5833_v58 = vor.u32 %v6319_v51, %v5832_v50  ;;  %v5020_v50 = vld [vmem:[%s6610_s6 + $0x740] sm:$0xf]  ;;  %v6116_v51 = vld [vmem:[%s6610_s6 + $0x758] sm:$0xf0] }
  0xbb   : > { %3393 = vmatpush.bf16.msra.mxu0 %v4153_v60  ;;  %v5580_v60 = vld [vmem:[%s6610_s6 + $0xba0] sm:$0xf] }
  0xbc   : > { %3406 = vmatpush.bf16.msra.mxu1 %v4377_v61  ;;  %v6256_v61 = vld [vmem:[%s6610_s6 + $0xbb8] sm:$0xf0] }
  0xbd   : > { %3419 = vmatpush.bf16.msra.mxu2 %v4601_v62  ;;  %v5804_v62 = vld [vmem:[%s6610_s6 + $0xd60] sm:$0xf] }
  0xbe   : > { %3432 = vmatpush.bf16.msra.mxu3 %v4825_v2  ;;  %v5581_v2 = vor.u32 %v6256_v61, %v5580_v60  ;;  %v5805_v8 = vor.u32 %v6312_v63, %v5804_v62  ;;  %v6284_v60 = vld [vmem:[%s6610_s6 + $0xc98] sm:$0xf0]  ;;  %v5021_v62 = vor.u32 %v6116_v51, %v5020_v50  ;;  %v4992_v63 = vld [vmem:[%s6610_s6 + $0x708] sm:$0xf] }
  0xbf   : > { %3394 = vmatpush.bf16.msra.mxu0 %v4125_v10  ;;  %v5552_v10 = vld [vmem:[%s6610_s6 + $0xb68] sm:$0xf] }
  0xc0   : > { %3407 = vmatpush.bf16.msra.mxu1 %v4349_v13  ;;  %v6305_v13 = vld [vmem:[%s6610_s6 + $0xd40] sm:$0xf0]  ;;  %v5553_v16 = vor.u32 %v6249_v11, %v5552_v10  ;;  %v5664_v10 = vld [vmem:[%s6610_s6 + $0xc48] sm:$0xf] }
  0xc1   : > { %3420 = vmatpush.bf16.msra.mxu2 %v4573_v14  ;;  %v5105_v14 = vor.u32 %v6137_v5, %v5104_v3  ;;  %v5777_v22 = vor.u32 %v6305_v13, %v5776_v12  ;;  %v5216_v3 = vld [vmem:[%s6610_s6 + $0x8c8] sm:$0xf]  ;;  %v6165_v5 = vld [vmem:[%s6610_s6 + $0x8e0] sm:$0xf0]  ;;  %v5931_v12 = vld [vmem:[%s6610_s6 + $0x194] sm:$0xf] }
  0xc2   : > { %3433 = vmatpush.bf16.msra.mxu3 %v4797_v18  ;;  %v6130_v18 = vld [vmem:[%s6610_s6 + $0x7c8] sm:$0xf0]  ;;  %v6277_v11 = vld [vmem:[%s6610_s6 + $0xc60] sm:$0xf0]  ;;  %v4294_v13 = vld [vmem:[%s6610_s6 + $0x1ac] sm:$0xf0]  ;;  %v5217_v24 = vor.u32 %v6165_v5, %v5216_v3 }
  0xc3   : > { %3395 = vmatpush.bf16.msra.mxu0 %v4097_v27  ;;  %v6298_v27 = vld [vmem:[%s6610_s6 + $0xd08] sm:$0xf0]  ;;  %v5077_v28 = vor.u32 %v6130_v18, %v5076_v17  ;;  %v3189_v43 = vpop.f32.mrf.mxu0  ;;  %v4518_v18 = vld [vmem:[%s6610_s6 + $0x36c] sm:$0xf0]  ;;  %v4210_v5 = vld [vmem:[%s6610_s6 + $0x104] sm:$0xf0] }
  0xc4   : > { %3408 = vmatpush.bf16.msra.mxu1 %v4321_v31  ;;  %v5048_v31 = vld [vmem:[%s6610_s6 + $0x778] sm:$0xf]  ;;  %v5749_v34 = vor.u32 %v6298_v27, %v5748_v26  ;;  %v3202_v47 = vpop.f32.mrf.mxu1  ;;  %v6099_v26 = vld [vmem:[%s6610_s6 + $0x6d4] sm:$0xf]  ;;  %v4966_v27 = vld [vmem:[%s6610_s6 + $0x6ec] sm:$0xf0] }
  0xc5   : > { %3421 = vmatpush.bf16.msra.mxu2 %v4545_v32  ;;  %v6123_v32 = vld [vmem:[%s6610_s6 + $0x790] sm:$0xf0]  ;;  %v5910_v3 = vld [vmem:[%s6610_s6 + $0xec] sm:$0xf] }
  0xc6   : > { %3434 = vmatpush.bf16.msra.mxu3 %v4769_v35  ;;  %3396 = vmatmul.bf16.vlgmr.msra.gmra.mxu0 %v6729_v20  ;;  %v6179_v35 = vld [vmem:[%s6610_s6 + $0x950] sm:$0xf0]  ;;  %v5049_v45 = vor.u32 %v6123_v32, %v5048_v31 }
  0xc7   : > { %3440 = vmatpush.bf16.msrb.mxu0 %v5189_v36  ;;  %3409 = vmatmul.bf16.vlgmr.msra.gmra.mxu1 %v6732_v21  ;;  %v5496_v36 = vld [vmem:[%s6610_s6 + $0xaf8] sm:$0xf]  ;;  %v5273_v48 = vor.u32 %v6179_v35, %v5272_v33  ;;  %v5924_v35 = vld [vmem:[%s6610_s6 + $0x15c] sm:$0xf] }
  0xc8   : > { %3453 = vmatpush.bf16.msrb.mxu1 %v5413_v37  ;;  %3422 = vmatmul.bf16.vlgmr.msra.gmra.mxu2 %v6713_v4  ;;  %v6235_v37 = vld [vmem:[%s6610_s6 + $0xb10] sm:$0xf0] }
  0xc9   : > { %3466 = vmatpush.bf16.msrb.mxu2 %v5637_v39  ;;  %3435 = vmatmul.bf16.vlgmr.msra.gmra.mxu3 %v6718_v6  ;;  %v5720_v39 = vld [vmem:[%s6610_s6 + $0xcb8] sm:$0xf]  ;;  %v5497_v49 = vor.u32 %v6235_v37, %v5496_v36  ;;  %v5980_v37 = vld [vmem:[%s6610_s6 + $0x31c] sm:$0xf] }
  0xca   : > { %3479 = vmatpush.bf16.msrb.mxu3 %v5861_v46  ;;  %v7039_v46 = vld [vmem:[%s6616_s9] sm:$0xff]  ;;  %v4266_v36 = vld [vmem:[%s6610_s6 + $0x174] sm:$0xf0] }
  0xcb   : > { %3441 = vmatpush.bf16.msrb.mxu0 %v5161_v52  ;;  %v5244_v52 = vld [vmem:[%s6610_s6 + $0x900] sm:$0xf]  ;;  %v834_v61 = vperm.slane %v7039_v46, 0 }
  0xcc   : > { %3454 = vmatpush.bf16.msrb.mxu1 %v5385_v53  ;;  %v7044_v53 = vpop.f32.mrf.mxu2  ;;  %v3204_v23 = vpop.f32.mrf.mxu1 }
  0xcd   : > { %3467 = vmatpush.bf16.msrb.mxu2 %v5609_v54  ;;  %v5721_v54 = vor.u32 %v6291_v40, %v5720_v39  ;;  %v4969_v39 = vor.u32 %v6099_v26, %v4966_v27  ;;  %v4490_v40 = vld [vmem:[%s6610_s6 + $0x334] sm:$0xf0]  ;;  %v6015_v26 = vld [vmem:[%s6610_s6 + $0x434] sm:$0xf]  ;;  %v4630_v27 = vld [vmem:[%s6610_s6 + $0x44c] sm:$0xf0] }
  0xce   : > { %3480 = vmatpush.bf16.msrb.mxu3 %v5833_v58  ;;  %v7049_v58 = vpop.f32.mrf.mxu3  ;;  %v4493_v50 = vor.u32 %v5980_v37, %v4490_v40  ;;  %v4378_v40 = vld [vmem:[%s6610_s6 + $0x254] sm:$0xf0] }
  0xcf   : > { %3442 = vmatpush.bf16.msrb.mxu0 %v5133_v0  ;;  %v6109_v0 = vld [vmem:[%s6610_s6 + $0x720] sm:$0xf0] }
  0xd0   : > { %3455 = vmatpush.bf16.msrb.mxu1 %v5357_v1  ;;  %v5245_v1 = vor.u32 %v6172_v55, %v5244_v52  ;;  %v4993_v17 = vor.u32 %v6109_v0, %v4992_v63  ;;  %v4238_v55 = vld [vmem:[%s6610_s6 + $0x13c] sm:$0xf0] }
  0xd1   : > { %3468 = vmatpush.bf16.msrb.mxu2 %v5581_v2  ;;  %v5469_v2 = vor.u32 %v6228_v57, %v5468_v56  ;;  %v5973_v56 = vld [vmem:[%s6610_s6 + $0x2e4] sm:$0xf] }
  0xd2   : > { %3481 = vmatpush.bf16.msrb.mxu3 %v5805_v8  ;;  %v5693_v8 = vor.u32 %v6284_v60, %v5692_v59  ;;  %v4462_v59 = vld [vmem:[%s6610_s6 + $0x2fc] sm:$0xf0]  ;;  %v6029_v60 = vld [vmem:[%s6610_s6 + $0x4a4] sm:$0xf] }
  0xd3   : > { %3443 = vmatpush.bf16.msrb.mxu0 %v5105_v14  ;;  %v5987_v14 = vld [vmem:[%s6610_s6 + $0x354] sm:$0xf] }
  0xd4   : > { %3456 = vmatpush.bf16.msrb.mxu1 %v5329_v15  ;;  %v3190_v15 = vadd.f32 %v3189_v43, %v834_v61  ;;  %v4521_v32 = vor.u32 %v5987_v14, %v4518_v18  ;;  %v6036_v43 = vld [vmem:[%s6610_s6 + $0x4dc] sm:$0xf]  ;;  %v4686_v61 = vld [vmem:[%s6610_s6 + $0x4bc] sm:$0xf0]  ;;  %v4182_v18 = vld [vmem:[%s6610_s6 + $0xcc] sm:$0xf0] }
  0xd5   : > { %3469 = vmatpush.bf16.msrb.mxu2 %v5553_v16  ;;  %v3191_v16 = vpop.f32.mrf.mxu0 }
  0xd6   : > { %3482 = vmatpush.bf16.msrb.mxu3 %v5777_v22  ;;  %v4742_v22 = vld [vmem:[%s6610_s6 + $0x52c] sm:$0xf0]  ;;  %v3230_v31 = vpop.f32.mrf.mxu3 }
  0xd7   : > { %3444 = vmatpush.bf16.msrb.mxu0 %v5077_v28  ;;  %v3217_v28 = vpop.f32.mrf.mxu2  ;;  %v4745_v33 = vor.u32 %v6043_v19, %v4742_v22  ;;  %v5959_v19 = vld [vmem:[%s6610_s6 + $0x274] sm:$0xf] }
  0xd8   : > { %3457 = vmatpush.bf16.msrb.mxu1 %v5301_v29  ;;  %v5665_v29 = vor.u32 %v6277_v11, %v5664_v10  ;;  %v6022_v10 = vld [vmem:[%s6610_s6 + $0x46c] sm:$0xf]  ;;  %v4658_v11 = vld [vmem:[%s6610_s6 + $0x484] sm:$0xf0]  ;;  %v6071_v28 = vld [vmem:[%s6610_s6 + $0x5f4] sm:$0xf] }
  0xd9   : > { %3470 = vmatpush.bf16.msrb.mxu2 %v5525_v30  ;;  %v4297_v30 = vor.u32 %v5931_v12, %v4294_v13  ;;  %v6078_v12 = vld [vmem:[%s6610_s6 + $0x62c] sm:$0xf]  ;;  %v4882_v13 = vld [vmem:[%s6610_s6 + $0x644] sm:$0xf0]  ;;  %v4661_v16 = vor.u32 %v6022_v10, %v4658_v11 }
  0xda   : > { %3483 = vmatpush.bf16.msrb.mxu3 %v5749_v34  ;;  %v3203_v34 = vadd.f32 %v3202_v47, %v3190_v15  ;;  %v4269_v47 = vor.u32 %v5924_v35, %v4266_v36  ;;  %v4437_v15 = vor.u32 %v5966_v7, %v4434_v9  ;;  %v4154_v35 = vld [vmem:[%s6610_s6 + $0x94] sm:$0xf0]  ;;  %v5952_v36 = vld [vmem:[%s6610_s6 + $0x23c] sm:$0xf]  ;;  %v4098_v7 = vld [vmem:[%s6610_s6 + $0x24] sm:$0xf0] }
  0xdb   : > { %3445 = vmatpush.bf16.msrb.mxu0 %v5049_v45  ;;  %v4714_v45 = vld [vmem:[%s6610_s6 + $0x4f4] sm:$0xf0]  ;;  %v5938_v10 = vld [vmem:[%s6610_s6 + $0x1cc] sm:$0xf]  ;;  %v4322_v11 = vld [vmem:[%s6610_s6 + $0x1e4] sm:$0xf0] }
  0xdc   : > { %3458 = vmatpush.bf16.msrb.mxu1 %v5273_v48  ;;  %v6092_v48 = vld [vmem:[%s6610_s6 + $0x69c] sm:$0xf]  ;;  %v4717_v51 = vor.u32 %v6036_v43, %v4714_v45  ;;  %v3216_v52 = vadd.f32 %v7044_v53, %v3203_v34  ;;  %v4910_v53 = vld [vmem:[%s6610_s6 + $0x67c] sm:$0xf0]  ;;  %v4602_v45 = vld [vmem:[%s6610_s6 + $0x414] sm:$0xf0] }
  0xdd   : > { %3471 = vmatpush.bf16.msrb.mxu2 %v5497_v49  ;;  %v4938_v49 = vld [vmem:[%s6610_s6 + $0x6b4] sm:$0xf0]  ;;  %v5896_v34 = vld [vmem:[%s6610_s6 + $0x7c] sm:$0xf] }
  0xde   : > { %3484 = vmatpush.bf16.msrb.mxu3 %v5721_v54  ;;  %v5917_v54 = vld [vmem:[%s6610_s6 + $0x124] sm:$0xf]  ;;  %v4941_v57 = vor.u32 %v6092_v48, %v4938_v49  ;;  %v3229_v0 = vadd.f32 %v7049_v58, %v3216_v52  ;;  %v4213_v58 = vor.u32 %v5910_v3, %v4210_v5  ;;  %v6008_v43 = vld [vmem:[%s6610_s6 + $0x3fc] sm:$0xf]  ;;  %v5882_v5 = vld [vmem:[%s6610_s6 + $0xc] sm:$0xf] }
  0xdf   : > { %3446 = vmatpush.bf16.msrb.mxu0 %v5021_v62  ;;  %v6085_v62 = vld [vmem:[%s6610_s6 + $0x664] sm:$0xf]  ;;  %v4241_v63 = vor.u32 %v5917_v54, %v4238_v55  ;;  %v4381_v55 = vor.u32 %v5952_v36, %v4378_v40  ;;  %v5162_v36 = vld [vmem:[%s6610_s6 + $0x874] sm:$0xf0] }
  0xe0   : > { %3459 = vmatpush.bf16.msrb.mxu1 %v5245_v1  ;;  %v4465_v1 = vor.u32 %v5973_v56, %v4462_v59  ;;  %v4605_v56 = vor.u32 %v6008_v43, %v4602_v45  ;;  %v4126_v59 = vld [vmem:[%s6610_s6 + $0x5c] sm:$0xf0]  ;;  %v5386_v40 = vld [vmem:[%s6610_s6 + $0xa34] sm:$0xf0]  ;;  %v6260_v43 = vld [vmem:[%s6610_s6 + $0xbdc] sm:$0xf] }
  0xe1   : > { %3472 = vmatpush.bf16.msrb.mxu2 %v5469_v2  ;;  %v4689_v2 = vor.u32 %v6029_v60, %v4686_v61  ;;  %v5945_v60 = vld [vmem:[%s6610_s6 + $0x204] sm:$0xf]  ;;  %v5610_v45 = vld [vmem:[%s6610_s6 + $0xbf4] sm:$0xf0] }
  0xe2   : > { %3485 = vmatpush.bf16.msrb.mxu3 %v5693_v8  ;;  %v4913_v8 = vor.u32 %v6085_v62, %v4910_v53  ;;  %v4350_v53 = vld [vmem:[%s6610_s6 + $0x21c] sm:$0xf0] }
  0xe3   : > { %3447 = vmatpush.bf16.msrb.mxu0 %v4993_v17  ;;  %v3241_v14 = vpop.f32.mrf.mxu0  ;;  %v5903_v17 = vld [vmem:[%s6610_s6 + $0xb4] sm:$0xf] }
  0xe4   : > { %3460 = vmatpush.bf16.msrb.mxu1 %v5217_v24  ;;  %v3242_v22 = vadd.f32 %v3241_v14, %v3229_v0  ;;  %v3254_v23 = vpop.f32.mrf.mxu1  ;;  %v4885_v24 = vor.u32 %v6078_v12, %v4882_v13  ;;  %v4185_v31 = vor.u32 %v5903_v17, %v4182_v18  ;;  %v4574_v0 = vld [vmem:[%s6610_s6 + $0x3dc] sm:$0xf0]  ;;  %v5994_v12 = vld [vmem:[%s6610_s6 + $0x38c] sm:$0xf]  ;;  %v4546_v14 = vld [vmem:[%s6610_s6 + $0x3a4] sm:$0xf0] }
  0xe5   : > { %3473 = vmatpush.bf16.msrb.mxu2 %v5441_v25  ;;  %v4406_v25 = vld [vmem:[%s6610_s6 + $0x28c] sm:$0xf0]  ;;  %v6155_v18 = vld [vmem:[%s6610_s6 + $0x894] sm:$0xf] }
  0xe6   : > { %3486 = vmatpush.bf16.msrb.mxu3 %v5665_v29  ;;  %3448 = vmatmul.bf16.vlgmr.msrb.gmra.mxu0 %v6792_v41  ;;  %v4854_v29 = vld [vmem:[%s6610_s6 + $0x60c] sm:$0xf0] }
  0xe7   : > { %3492 = vmatpush.bf16.msra.mxu0 %v4297_v30  ;;  %3461 = vmatmul.bf16.vlgmr.msrb.gmra.mxu1 %v6796_v44  ;;  %v3255_v30 = vadd.f32 %v3254_v23, %v3242_v22  ;;  %v6211_v22 = vld [vmem:[%s6610_s6 + $0xa54] sm:$0xf]  ;;  %v4101_v23 = vor.u32 %v5882_v5, %v4098_v7  ;;  %v5330_v7 = vld [vmem:[%s6610_s6 + $0x9c4] sm:$0xf0] }
  0xe8   : > { %3505 = vmatpush.bf16.msra.mxu1 %v4521_v32  ;;  %3474 = vmatmul.bf16.vlgmr.msrb.gmra.mxu2 %v6788_v38  ;;  %v4409_v32 = vor.u32 %v5959_v19, %v4406_v25  ;;  %v5190_v19 = vld [vmem:[%s6610_s6 + $0x8ac] sm:$0xf0]  ;;  %v6267_v25 = vld [vmem:[%s6610_s6 + $0xc14] sm:$0xf] }
  0xe9   : > { %3518 = vmatpush.bf16.msra.mxu2 %v4745_v33  ;;  %3487 = vmatmul.bf16.vlgmr.msrb.gmra.mxu3 %v6794_v42  ;;  %v4633_v33 = vor.u32 %v6015_v26, %v4630_v27  ;;  %v5638_v26 = vld [vmem:[%s6610_s6 + $0xc2c] sm:$0xf0]  ;;  %v4325_v27 = vor.u32 %v5938_v10, %v4322_v11  ;;  %v6302_v10 = vld [vmem:[%s6610_s6 + $0xd2c] sm:$0xf]  ;;  %v5778_v11 = vld [vmem:[%s6610_s6 + $0xd44] sm:$0xf0] }
  0xea   : > { %3531 = vmatpush.bf16.msra.mxu3 %v4969_v39  ;;  %v4857_v39 = vor.u32 %v6071_v28, %v4854_v29  ;;  %v4549_v28 = vor.u32 %v5994_v12, %v4546_v14  ;;  %v6323_v29 = vld [vmem:[%s6610_s6 + $0xdd4] sm:$0xf] }
  0xeb   : > { %3493 = vmatpush.bf16.msra.mxu0 %v4269_v47  ;;  %v3267_v37 = vpop.f32.mrf.mxu2  ;;  %v6064_v47 = vld [vmem:[%s6610_s6 + $0x5bc] sm:$0xf]  ;;  %v3243_v54 = vpop.f32.mrf.mxu0 }
  0xec   : > { %3506 = vmatpush.bf16.msra.mxu1 %v4493_v50  ;;  %v3268_v48 = vadd.f32 %v3267_v37, %v3255_v30  ;;  %v3280_v49 = vpop.f32.mrf.mxu3  ;;  %v4826_v50 = vld [vmem:[%s6610_s6 + $0x5d4] sm:$0xf0]  ;;  %v3256_v61 = vpop.f32.mrf.mxu1  ;;  %v5862_v30 = vld [vmem:[%s6610_s6 + $0xdec] sm:$0xf0]  ;;  %v6204_v37 = vld [vmem:[%s6610_s6 + $0xa1c] sm:$0xf] }
  0xed   : > { %3519 = vmatpush.bf16.msra.mxu2 %v4717_v51  ;;  %v4157_v51 = vor.u32 %v5896_v34, %v4154_v35  ;;  %v4829_v62 = vor.u32 %v6064_v47, %v4826_v50  ;;  %v5641_v34 = vor.u32 %v6267_v25, %v5638_v26  ;;  %v6148_v35 = vld [vmem:[%s6610_s6 + $0x85c] sm:$0xf]  ;;  %v5389_v50 = vor.u32 %v6204_v37, %v5386_v40  ;;  %v5134_v54 = vld [vmem:[%s6610_s6 + $0x83c] sm:$0xf0]  ;;  %v6309_v61 = vld [vmem:[%s6610_s6 + $0xd64] sm:$0xf] }
  0xee   : > { %3532 = vmatpush.bf16.msra.mxu3 %v4941_v57  ;;  %v3281_v52 = vadd.f32 %v3280_v49, %v3268_v48  ;;  %v5889_v57 = vld [vmem:[%s6610_s6 + $0x44] sm:$0xf]  ;;  %v6316_v48 = vld [vmem:[%s6610_s6 + $0xd9c] sm:$0xf]  ;;  %v5834_v49 = vld [vmem:[%s6610_s6 + $0xdb4] sm:$0xf0]  ;;  %v5165_v47 = vor.u32 %v6148_v35, %v5162_v36 }
  0xef   : > { %3494 = vmatpush.bf16.msra.mxu0 %v4241_v63  ;;  %v6001_v63 = vld [vmem:[%s6610_s6 + $0x3c4] sm:$0xf]  ;;  %v4129_v3 = vor.u32 %v5889_v57, %v4126_v59  ;;  %v5358_v57 = vld [vmem:[%s6610_s6 + $0x9fc] sm:$0xf0]  ;;  %v6295_v25 = vld [vmem:[%s6610_s6 + $0xcf4] sm:$0xf] }
  0xf0   : > { %3507 = vmatpush.bf16.msra.mxu1 %v4465_v1  ;;  %3908 = vst [vmem:[%s7133_s28] sm:$0xff] %v3281_v52  ;;  %v6057_v1 = vld [vmem:[%s6610_s6 + $0x584] sm:$0xf]  ;;  %v4577_v9 = vor.u32 %v6001_v63, %v4574_v0  ;;  %v5750_v26 = vld [vmem:[%s6610_s6 + $0xd0c] sm:$0xf0]  ;;  %v5274_v35 = vld [vmem:[%s6610_s6 + $0x954] sm:$0xf0] }
  0xf1   : > { %3520 = vmatpush.bf16.msra.mxu2 %v4689_v2  ;;  %v4798_v2 = vld [vmem:[%s6610_s6 + $0x59c] sm:$0xf0]  ;;  %v6141_v52 = vld [vmem:[%s6610_s6 + $0x824] sm:$0xf]  ;;  %v6232_v36 = vld [vmem:[%s6610_s6 + $0xafc] sm:$0xf] }
  0xf2   : > { %3533 = vmatpush.bf16.msra.mxu3 %v4913_v8  ;;  %v4353_v8 = vor.u32 %v5945_v60, %v4350_v53  ;;  %v6253_v59 = vld [vmem:[%s6610_s6 + $0xba4] sm:$0xf]  ;;  %v5582_v60 = vld [vmem:[%s6610_s6 + $0xbbc] sm:$0xf0]  ;;  %v5137_v53 = vor.u32 %v6141_v52, %v5134_v54  ;;  %v5498_v37 = vld [vmem:[%s6610_s6 + $0xb14] sm:$0xf0] }
  0xf3   : > { %3495 = vmatpush.bf16.msra.mxu0 %v4213_v58  ;;  %v3269_v13 = vpop.f32.mrf.mxu2  ;;  %v4801_v58 = vor.u32 %v6057_v1, %v4798_v2  ;;  %v5585_v0 = vor.u32 %v6253_v59, %v5582_v60  ;;  %v6134_v1 = vld [vmem:[%s6610_s6 + $0x7ec] sm:$0xf]  ;;  %v5106_v2 = vld [vmem:[%s6610_s6 + $0x804] sm:$0xf0]  ;;  %v6288_v40 = vld [vmem:[%s6610_s6 + $0xcbc] sm:$0xf] }
  0xf4   : > { %3508 = vmatpush.bf16.msra.mxu1 %v4437_v15  ;;  %v6050_v15 = vld [vmem:[%s6610_s6 + $0x54c] sm:$0xf]  ;;  %v3282_v17 = vpop.f32.mrf.mxu3  ;;  %v5109_v12 = vor.u32 %v6134_v1, %v5106_v2  ;;  %v6169_v52 = vld [vmem:[%s6610_s6 + $0x904] sm:$0xf]  ;;  %v5470_v59 = vld [vmem:[%s6610_s6 + $0xadc] sm:$0xf0] }
  0xf5   : > { %3521 = vmatpush.bf16.msra.mxu2 %v4661_v16  ;;  %v4770_v16 = vld [vmem:[%s6610_s6 + $0x564] sm:$0xf0]  ;;  %v6183_v17 = vld [vmem:[%s6610_s6 + $0x974] sm:$0xf]  ;;  %v6281_v60 = vld [vmem:[%s6610_s6 + $0xc84] sm:$0xf] }
  0xf6   : > { %3534 = vmatpush.bf16.msra.mxu3 %v4885_v24  ;;  %v5414_v24 = vld [vmem:[%s6610_s6 + $0xa6c] sm:$0xf0] }
  0xf7   : > { %3496 = vmatpush.bf16.msra.mxu0 %v4185_v31  ;;  %v4773_v31 = vor.u32 %v6050_v15, %v4770_v16  ;;  %v6127_v15 = vld [vmem:[%s6610_s6 + $0x7b4] sm:$0xf]  ;;  %v5078_v16 = vld [vmem:[%s6610_s6 + $0x7cc] sm:$0xf0] }
  0xf8   : > { %3509 = vmatpush.bf16.msra.mxu1 %v4409_v32  ;;  %v5193_v32 = vor.u32 %v6155_v18, %v5190_v19  ;;  %v5781_v19 = vor.u32 %v6302_v10, %v5778_v11  ;;  %v6274_v10 = vld [vmem:[%s6610_s6 + $0xc4c] sm:$0xf]  ;;  %v5666_v11 = vld [vmem:[%s6610_s6 + $0xc64] sm:$0xf0] }
  0xf9   : > { %3522 = vmatpush.bf16.msra.mxu2 %v4633_v33  ;;  %v5417_v33 = vor.u32 %v6211_v22, %v5414_v24  ;;  %v5302_v22 = vld [vmem:[%s6610_s6 + $0x98c] sm:$0xf0] }
  0xfa   : > { %3535 = vmatpush.bf16.msra.mxu3 %v4857_v39  ;;  %v5865_v39 = vor.u32 %v6323_v29, %v5862_v30  ;;  %v5526_v24 = vld [vmem:[%s6610_s6 + $0xb4c] sm:$0xf0]  ;;  %v6120_v30 = vld [vmem:[%s6610_s6 + $0x77c] sm:$0xf] }
  0xfb   : > { %3497 = vmatpush.bf16.msra.mxu0 %v4157_v51  ;;  %v5613_v51 = vor.u32 %v6260_v43, %v5610_v45  ;;  %v5722_v43 = vld [vmem:[%s6610_s6 + $0xcd4] sm:$0xf0] }
  0xfc   : > { %3510 = vmatpush.bf16.msra.mxu1 %v4381_v55  ;;  %v6197_v55 = vld [vmem:[%s6610_s6 + $0x9e4] sm:$0xf] }
  0xfd   : > { %3523 = vmatpush.bf16.msra.mxu2 %v4605_v56  ;;  %v5837_v56 = vor.u32 %v6316_v48, %v5834_v49  ;;  %v5361_v63 = vor.u32 %v6197_v55, %v5358_v57  ;;  %v5725_v55 = vor.u32 %v6288_v40, %v5722_v43  ;;  %v6225_v57 = vld [vmem:[%s6610_s6 + $0xac4] sm:$0xf]  ;;  %v4720_v40 = vld [vmem:[%s6610_s6 + $0x4e0] sm:$0xf]  ;;  %v6040_v43 = vld [vmem:[%s6610_s6 + $0x4f8] sm:$0xf0] }
  0xfe   : > { %3536 = vmatpush.bf16.msra.mxu3 %v4829_v62  ;;  %v5806_v62 = vld [vmem:[%s6610_s6 + $0xd7c] sm:$0xf0]  ;;  %v5473_v2 = vor.u32 %v6225_v57, %v5470_v59  ;;  %v4692_v57 = vld [vmem:[%s6610_s6 + $0x4a8] sm:$0xf]  ;;  %v6033_v59 = vld [vmem:[%s6610_s6 + $0x4c0] sm:$0xf0] }
  0xff   : > { %3498 = vmatpush.bf16.msra.mxu0 %v4129_v3  ;;  %v6190_v3 = vld [vmem:[%s6610_s6 + $0x9ac] sm:$0xf]  ;;  %v5809_v5 = vor.u32 %v6309_v61, %v5806_v62  ;;  %v5694_v61 = vld [vmem:[%s6610_s6 + $0xc9c] sm:$0xf0]  ;;  %v835_v62 = vperm.slane %v7039_v46, 1 }
 0x100   : > { %3511 = vmatpush.bf16.msra.mxu1 %v4353_v8  ;;  %v6246_v8 = vld [vmem:[%s6610_s6 + $0xb6c] sm:$0xf] }
 0x101   : > { %3524 = vmatpush.bf16.msra.mxu2 %v4577_v9  ;;  %v5554_v9 = vld [vmem:[%s6610_s6 + $0xb84] sm:$0xf0] }
 0x102   : > { %3537 = vmatpush.bf16.msra.mxu3 %v4801_v58  ;;  %v5333_v58 = vor.u32 %v6190_v3, %v5330_v7  ;;  %v5557_v14 = vor.u32 %v6246_v8, %v5554_v9  ;;  %v6162_v3 = vld [vmem:[%s6610_s6 + $0x8cc] sm:$0xf]  ;;  %v5697_v8 = vor.u32 %v6281_v60, %v5694_v61  ;;  %v5442_v9 = vld [vmem:[%s6610_s6 + $0xaa4] sm:$0xf0] }
 0x103   : > { %3499 = vmatpush.bf16.msra.mxu0 %v4101_v23  ;;  %v7188_v13 = vpop.f32.mrf.mxu0  ;;  %v6239_v23 = vld [vmem:[%s6610_s6 + $0xb34] sm:$0xf]  ;;  %v6218_v7 = vld [vmem:[%s6610_s6 + $0xa8c] sm:$0xf]  ;;  %v4916_v60 = vld [vmem:[%s6610_s6 + $0x668] sm:$0xf] }
 0x104   : > { %3512 = vmatpush.bf16.msra.mxu1 %v4325_v27  ;;  %v7193_v18 = vpop.f32.mrf.mxu1  ;;  %v5081_v27 = vor.u32 %v6127_v15, %v5078_v16  ;;  %v5529_v29 = vor.u32 %v6239_v23, %v5526_v24  ;;  %v4524_v15 = vld [vmem:[%s6610_s6 + $0x358] sm:$0xf]  ;;  %v3294_v16 = vadd.f32 %v7188_v13, %v835_v62  ;;  %v6047_v23 = vld [vmem:[%s6610_s6 + $0x530] sm:$0xf0]  ;;  %v5669_v13 = vor.u32 %v6274_v10, %v5666_v11 }
 0x105   : > { %3525 = vmatpush.bf16.msra.mxu2 %v4549_v28  ;;  %v5305_v28 = vor.u32 %v6183_v17, %v5302_v22  ;;  %v4748_v22 = vld [vmem:[%s6610_s6 + $0x518] sm:$0xf] }
 0x106   : > { %3538 = vmatpush.bf16.msra.mxu3 %v4773_v31  ;;  %3500 = vmatmul.bf16.vlgmr.msra.gmra.mxu0 %v6729_v20  ;;  %v5050_v31 = vld [vmem:[%s6610_s6 + $0x794] sm:$0xf0] }
 0x107   : > { %3544 = vmatpush.bf16.msrb.mxu0 %v5193_v32  ;;  %3513 = vmatmul.bf16.vlgmr.msra.gmra.mxu1 %v6732_v21  ;;  %v6176_v32 = vld [vmem:[%s6610_s6 + $0x93c] sm:$0xf]  ;;  %v5053_v45 = vor.u32 %v6120_v30, %v5050_v31  ;;  %v4749_v30 = vor.u32 %v6047_v23, %v4748_v22  ;;  %v3307_v31 = vadd.f32 %v7193_v18, %v3294_v16  ;;  %v5963_v22 = vld [vmem:[%s6610_s6 + $0x290] sm:$0xf0]  ;;  %v4636_v23 = vld [vmem:[%s6610_s6 + $0x438] sm:$0xf] }
 0x108   : > { %3557 = vmatpush.bf16.msrb.mxu1 %v5417_v33  ;;  %3526 = vmatmul.bf16.vlgmr.msra.gmra.mxu2 %v6713_v4  ;;  %v5277_v49 = vor.u32 %v6176_v32, %v5274_v35  ;;  %v4272_v32 = vld [vmem:[%s6610_s6 + $0x160] sm:$0xf] }
 0x109   : > { %3570 = vmatpush.bf16.msrb.mxu2 %v5641_v34  ;;  %3539 = vmatmul.bf16.vlgmr.msra.gmra.mxu3 %v6718_v6  ;;  %v5753_v34 = vor.u32 %v6295_v25, %v5750_v26  ;;  %v5445_v25 = vor.u32 %v6218_v7, %v5442_v9  ;;  %v4972_v26 = vld [vmem:[%s6610_s6 + $0x6d8] sm:$0xf]  ;;  %v4496_v35 = vld [vmem:[%s6610_s6 + $0x320] sm:$0xf]  ;;  %v4664_v7 = vld [vmem:[%s6610_s6 + $0x470] sm:$0xf] }
 0x10a   : > { %3583 = vmatpush.bf16.msrb.mxu3 %v5865_v39  ;;  %v6082_v9 = vld [vmem:[%s6610_s6 + $0x648] sm:$0xf0] }
 0x10b   : > { %3545 = vmatpush.bf16.msrb.mxu0 %v5165_v47  ;;  %v7203_v33 = vpop.f32.mrf.mxu2  ;;  %v3295_v48 = vpop.f32.mrf.mxu0  ;;  %v5501_v47 = vor.u32 %v6232_v36, %v5498_v37  ;;  %v5984_v37 = vld [vmem:[%s6610_s6 + $0x338] sm:$0xf0] }
 0x10c   : > { %3558 = vmatpush.bf16.msrb.mxu1 %v5389_v50  ;;  %v7208_v39 = vpop.f32.mrf.mxu3  ;;  %v6113_v50 = vld [vmem:[%s6610_s6 + $0x744] sm:$0xf]  ;;  %v3308_v54 = vpop.f32.mrf.mxu1  ;;  %v6096_v48 = vld [vmem:[%s6610_s6 + $0x6b8] sm:$0xf0] }
 0x10d   : > { %3571 = vmatpush.bf16.msrb.mxu2 %v5613_v51  ;;  %v5022_v51 = vld [vmem:[%s6610_s6 + $0x75c] sm:$0xf0]  ;;  %v4468_v54 = vld [vmem:[%s6610_s6 + $0x2e8] sm:$0xf] }
 0x10e   : > { %3584 = vmatpush.bf16.msrb.mxu3 %v5837_v56  ;;  %v5246_v56 = vld [vmem:[%s6610_s6 + $0x91c] sm:$0xf0] }
 0x10f   : > { %3546 = vmatpush.bf16.msrb.mxu0 %v5137_v53  ;;  %v5025_v53 = vor.u32 %v6113_v50, %v5022_v51  ;;  %v5249_v1 = vor.u32 %v6169_v52, %v5246_v56  ;;  %v3320_v50 = vadd.f32 %v7203_v33, %v3307_v31  ;;  %v4244_v51 = vld [vmem:[%s6610_s6 + $0x128] sm:$0xf]  ;;  %v5921_v52 = vld [vmem:[%s6610_s6 + $0x140] sm:$0xf0]  ;;  %v5900_v31 = vld [vmem:[%s6610_s6 + $0x98] sm:$0xf0] }
 0x110   : > { %3559 = vmatpush.bf16.msrb.mxu1 %v5361_v63  ;;  %v6106_v63 = vld [vmem:[%s6610_s6 + $0x70c] sm:$0xf]  ;;  %v5977_v56 = vld [vmem:[%s6610_s6 + $0x300] sm:$0xf0]  ;;  %v4245_v61 = vor.u32 %v5921_v52, %v4244_v51 }
 0x111   : > { %3572 = vmatpush.bf16.msrb.mxu2 %v5585_v0  ;;  %v4994_v0 = vld [vmem:[%s6610_s6 + $0x724] sm:$0xf0]  ;;  %v6089_v33 = vld [vmem:[%s6610_s6 + $0x680] sm:$0xf0]  ;;  %v3333_v62 = vadd.f32 %v7208_v39, %v3320_v50 }
 0x112   : > { %3585 = vmatpush.bf16.msrb.mxu3 %v5809_v5  ;;  %v5218_v5 = vld [vmem:[%s6610_s6 + $0x8e4] sm:$0xf0]  ;;  %v4997_v17 = vor.u32 %v6106_v63, %v4994_v0  ;;  %v4693_v63 = vor.u32 %v6033_v59, %v4692_v57  ;;  %v4216_v0 = vld [vmem:[%s6610_s6 + $0xf0] sm:$0xf]  ;;  %v5949_v57 = vld [vmem:[%s6610_s6 + $0x220] sm:$0xf0] }
 0x113   : > { %3547 = vmatpush.bf16.msrb.mxu0 %v5109_v12  ;;  %v3321_v46 = vpop.f32.mrf.mxu2  ;;  %v5221_v24 = vor.u32 %v6162_v3, %v5218_v5  ;;  %v4917_v3 = vor.u32 %v6089_v33, %v4916_v60  ;;  %v5970_v5 = vld [vmem:[%s6610_s6 + $0x2c8] sm:$0xf0]  ;;  %v4132_v50 = vld [vmem:[%s6610_s6 + $0x48] sm:$0xf] }
 0x114   : > { %3560 = vmatpush.bf16.msrb.mxu1 %v5333_v58  ;;  %v3334_v12 = vpop.f32.mrf.mxu3  ;;  %v4300_v58 = vld [vmem:[%s6610_s6 + $0x198] sm:$0xf]  ;;  %v6026_v46 = vld [vmem:[%s6610_s6 + $0x488] sm:$0xf0]  ;;  %v4580_v33 = vld [vmem:[%s6610_s6 + $0x3c8] sm:$0xf] }
 0x115   : > { %3573 = vmatpush.bf16.msrb.mxu2 %v5557_v14  ;;  %v5935_v14 = vld [vmem:[%s6610_s6 + $0x1b0] sm:$0xf0]  ;;  %v4665_v12 = vor.u32 %v6026_v46, %v4664_v7  ;;  %v5942_v7 = vld [vmem:[%s6610_s6 + $0x1e8] sm:$0xf0]  ;;  %v4552_v46 = vld [vmem:[%s6610_s6 + $0x390] sm:$0xf] }
 0x116   : > { %3586 = vmatpush.bf16.msrb.mxu3 %v5781_v19  ;;  %v5991_v19 = vld [vmem:[%s6610_s6 + $0x370] sm:$0xf0] }
 0x117   : > { %3548 = vmatpush.bf16.msrb.mxu0 %v5081_v27  ;;  %v6103_v27 = vld [vmem:[%s6610_s6 + $0x6f0] sm:$0xf0] }
 0x118   : > { %3561 = vmatpush.bf16.msrb.mxu1 %v5305_v28  ;;  %v4301_v28 = vor.u32 %v5935_v14, %v4300_v58  ;;  %v4973_v36 = vor.u32 %v6103_v27, %v4972_v26  ;;  %v4188_v58 = vld [vmem:[%s6610_s6 + $0xb8] sm:$0xf]  ;;  %v5907_v14 = vld [vmem:[%s6610_s6 + $0xd0] sm:$0xf0] }
 0x119   : > { %3574 = vmatpush.bf16.msrb.mxu2 %v5529_v29  ;;  %v4525_v29 = vor.u32 %v5991_v19, %v4524_v15  ;;  %v4412_v15 = vld [vmem:[%s6610_s6 + $0x278] sm:$0xf]  ;;  %v6075_v26 = vld [vmem:[%s6610_s6 + $0x610] sm:$0xf0] }
 0x11a   : > { %3587 = vmatpush.bf16.msrb.mxu3 %v5753_v34  ;;  %v5928_v34 = vld [vmem:[%s6610_s6 + $0x178] sm:$0xf0] }
 0x11b   : > { %3549 = vmatpush.bf16.msrb.mxu0 %v5053_v45  ;;  %v4944_v45 = vld [vmem:[%s6610_s6 + $0x6a0] sm:$0xf]  ;;  %v4273_v18 = vor.u32 %v5928_v34, %v4272_v32 }
 0x11c   : > { %3562 = vmatpush.bf16.msrb.mxu1 %v5277_v49  ;;  %v4497_v49 = vor.u32 %v5984_v37, %v4496_v35  ;;  %v4384_v32 = vld [vmem:[%s6610_s6 + $0x240] sm:$0xf] }
 0x11d   : > { %3575 = vmatpush.bf16.msrb.mxu2 %v5501_v47  ;;  %v4721_v47 = vor.u32 %v6040_v43, %v4720_v40  ;;  %v4608_v37 = vld [vmem:[%s6610_s6 + $0x400] sm:$0xf]  ;;  %v6012_v40 = vld [vmem:[%s6610_s6 + $0x418] sm:$0xf0] }
 0x11e   : > { %3588 = vmatpush.bf16.msrb.mxu3 %v5725_v55  ;;  %v4945_v55 = vor.u32 %v6096_v48, %v4944_v45  ;;  %v4832_v48 = vld [vmem:[%s6610_s6 + $0x5c0] sm:$0xf] }
 0x11f   : > { %3550 = vmatpush.bf16.msrb.mxu0 %v5025_v53  ;;  %v4469_v53 = vor.u32 %v5977_v56, %v4468_v54  ;;  %v4609_v54 = vor.u32 %v6012_v40, %v4608_v37  ;;  %v4356_v56 = vld [vmem:[%s6610_s6 + $0x208] sm:$0xf]  ;;  %v6264_v37 = vld [vmem:[%s6610_s6 + $0xbf8] sm:$0xf0]  ;;  %v5840_v40 = vld [vmem:[%s6610_s6 + $0xda0] sm:$0xf] }
 0x120   : > { %3563 = vmatpush.bf16.msrb.mxu1 %v5249_v1  ;;  %v5914_v1 = vld [vmem:[%s6610_s6 + $0x108] sm:$0xf0] }
 0x121   : > { %3576 = vmatpush.bf16.msrb.mxu2 %v5473_v2  ;;  %v4440_v2 = vld [vmem:[%s6610_s6 + $0x2b0] sm:$0xf]  ;;  %v4217_v39 = vor.u32 %v5914_v1, %v4216_v0  ;;  %v5886_v1 = vld [vmem:[%s6610_s6 + $0x28] sm:$0xf0] }
 0x122   : > { %3589 = vmatpush.bf16.msrb.mxu3 %v5697_v8  ;;  %v4888_v8 = vld [vmem:[%s6610_s6 + $0x630] sm:$0xf]  ;;  %v4441_v11 = vor.u32 %v5970_v5, %v4440_v2  ;;  %v4357_v2 = vor.u32 %v5949_v57, %v4356_v56  ;;  %v5812_v56 = vld [vmem:[%s6610_s6 + $0xd68] sm:$0xf]  ;;  %v6313_v57 = vld [vmem:[%s6610_s6 + $0xd80] sm:$0xf0] }
 0x123   : > { %3551 = vmatpush.bf16.msrb.mxu0 %v4997_v17  ;;  %v3345_v10 = vpop.f32.mrf.mxu0  ;;  %v4889_v19 = vor.u32 %v6082_v9, %v4888_v8  ;;  %v4104_v0 = vld [vmem:[%s6610_s6 + $0x10] sm:$0xf] }
 0x124   : > { %3564 = vmatpush.bf16.msrb.mxu1 %v5221_v24  ;;  %v3346_v16 = vadd.f32 %v3345_v10, %v3333_v62  ;;  %v3358_v17 = vpop.f32.mrf.mxu1  ;;  %v6019_v24 = vld [vmem:[%s6610_s6 + $0x450] sm:$0xf0]  ;;  %v4804_v62 = vld [vmem:[%s6610_s6 + $0x588] sm:$0xf]  ;;  %v4328_v5 = vld [vmem:[%s6610_s6 + $0x1d0] sm:$0xf] }
 0x125   : > { %3577 = vmatpush.bf16.msrb.mxu2 %v5445_v25  ;;  %v4860_v25 = vld [vmem:[%s6610_s6 + $0x5f8] sm:$0xf]  ;;  %v4776_v10 = vld [vmem:[%s6610_s6 + $0x550] sm:$0xf] }
 0x126   : > { %3590 = vmatpush.bf16.msrb.mxu3 %v5669_v13  ;;  %3552 = vmatmul.bf16.vlgmr.msrb.gmra.mxu0 %v6792_v41  ;;  %v3359_v27 = vadd.f32 %v3358_v17, %v3346_v16  ;;  %v4189_v13 = vor.u32 %v5907_v14, %v4188_v58  ;;  %v4861_v35 = vor.u32 %v6075_v26, %v4860_v25  ;;  %v5196_v58 = vld [vmem:[%s6610_s6 + $0x898] sm:$0xf]  ;;  %v6159_v14 = vld [vmem:[%s6610_s6 + $0x8b0] sm:$0xf0] }
 0x127   : > { %3596 = vmatpush.bf16.msra.mxu0 %v4301_v28  ;;  %3565 = vmatmul.bf16.vlgmr.msrb.gmra.mxu1 %v6796_v44  ;;  %v4413_v28 = vor.u32 %v5963_v22, %v4412_v15  ;;  %v5420_v15 = vld [vmem:[%s6610_s6 + $0xa58] sm:$0xf]  ;;  %v4105_v16 = vor.u32 %v5886_v1, %v4104_v0  ;;  %v6215_v17 = vld [vmem:[%s6610_s6 + $0xa70] sm:$0xf0]  ;;  %v6194_v0 = vld [vmem:[%s6610_s6 + $0x9c8] sm:$0xf0] }
 0x128   : > { %3609 = vmatpush.bf16.msra.mxu1 %v4525_v29  ;;  %3578 = vmatmul.bf16.vlgmr.msrb.gmra.mxu2 %v6788_v38  ;;  %v4637_v29 = vor.u32 %v6019_v24, %v4636_v23  ;;  %v6271_v22 = vld [vmem:[%s6610_s6 + $0xc30] sm:$0xf0]  ;;  %v4329_v23 = vor.u32 %v5942_v7, %v4328_v5  ;;  %v5868_v25 = vld [vmem:[%s6610_s6 + $0xdd8] sm:$0xf]  ;;  %v5560_v1 = vld [vmem:[%s6610_s6 + $0xb70] sm:$0xf] }
 0x129   : > { %3622 = vmatpush.bf16.msra.mxu2 %v4749_v30  ;;  %3591 = vmatmul.bf16.vlgmr.msrb.gmra.mxu3 %v6794_v42  ;;  %v4160_v30 = vld [vmem:[%s6610_s6 + $0x80] sm:$0xf]  ;;  %v6327_v26 = vld [vmem:[%s6610_s6 + $0xdf0] sm:$0xf0]  ;;  %v6306_v5 = vld [vmem:[%s6610_s6 + $0xd48] sm:$0xf0] }
 0x12a   : > { %3635 = vmatpush.bf16.msra.mxu3 %v4973_v36  ;;  %v5956_v36 = vld [vmem:[%s6610_s6 + $0x258] sm:$0xf0] }
 0x12b   : > { %3597 = vmatpush.bf16.msra.mxu0 %v4273_v18  ;;  %v3371_v34 = vpop.f32.mrf.mxu2  ;;  %v6068_v18 = vld [vmem:[%s6610_s6 + $0x5d8] sm:$0xf0]  ;;  %v3347_v51 = vpop.f32.mrf.mxu0  ;;  %v4385_v52 = vor.u32 %v5956_v36, %v4384_v32  ;;  %v5392_v32 = vld [vmem:[%s6610_s6 + $0xa20] sm:$0xf] }
 0x12c   : > { %3610 = vmatpush.bf16.msra.mxu1 %v4497_v49  ;;  %v3372_v43 = vadd.f32 %v3371_v34, %v3359_v27  ;;  %v3384_v45 = vpop.f32.mrf.mxu3  ;;  %v4161_v49 = vor.u32 %v5900_v31, %v4160_v30  ;;  %v3360_v59 = vpop.f32.mrf.mxu1  ;;  %v4833_v60 = vor.u32 %v6068_v18, %v4832_v48  ;;  %v5168_v30 = vld [vmem:[%s6610_s6 + $0x860] sm:$0xf]  ;;  %v6152_v31 = vld [vmem:[%s6610_s6 + $0x878] sm:$0xf0]  ;;  %v5869_v34 = vor.u32 %v6327_v26, %v5868_v25 }
 0x12d   : > { %3623 = vmatpush.bf16.msra.mxu2 %v4721_v47  ;;  %v5616_v36 = vld [vmem:[%s6610_s6 + $0xbe0] sm:$0xf]  ;;  %v6124_v26 = vld [vmem:[%s6610_s6 + $0x798] sm:$0xf0] }
 0x12e   : > { %3636 = vmatpush.bf16.msra.mxu3 %v4945_v55  ;;  %v3385_v47 = vadd.f32 %v3384_v45, %v3372_v43  ;;  %v5893_v55 = vld [vmem:[%s6610_s6 + $0x60] sm:$0xf0]  ;;  %v6320_v43 = vld [vmem:[%s6610_s6 + $0xdb8] sm:$0xf0]  ;;  %v5169_v45 = vor.u32 %v6152_v31, %v5168_v30  ;;  %v5617_v18 = vor.u32 %v6264_v37, %v5616_v36  ;;  %v5056_v25 = vld [vmem:[%s6610_s6 + $0x780] sm:$0xf] }
 0x12f   : > { %3598 = vmatpush.bf16.msra.mxu0 %v4245_v61  ;;  %v6005_v61 = vld [vmem:[%s6610_s6 + $0x3e0] sm:$0xf0]  ;;  %v5841_v51 = vor.u32 %v6320_v43, %v5840_v40  ;;  %v5504_v30 = vld [vmem:[%s6610_s6 + $0xb00] sm:$0xf]  ;;  %v6236_v31 = vld [vmem:[%s6610_s6 + $0xb18] sm:$0xf0]  ;;  %v5057_v36 = vor.u32 %v6124_v26, %v5056_v25 }
 0x130   : > { %3611 = vmatpush.bf16.msra.mxu1 %v4469_v53  ;;  %3909 = vst [vmem:[%s7133_s28 + $0x8] sm:$0xff] %v3385_v47  ;;  %v6061_v53 = vld [vmem:[%s6610_s6 + $0x5a0] sm:$0xf0]  ;;  %v5505_v43 = vor.u32 %v6236_v31, %v5504_v30 }
 0x131   : > { %3624 = vmatpush.bf16.msra.mxu2 %v4693_v63  ;;  %v4133_v63 = vor.u32 %v5893_v55, %v4132_v50  ;;  %v4805_v9 = vor.u32 %v6061_v53, %v4804_v62  ;;  %v6145_v47 = vld [vmem:[%s6610_s6 + $0x840] sm:$0xf0]  ;;  %v5364_v50 = vld [vmem:[%s6610_s6 + $0x9e8] sm:$0xf]  ;;  %v6138_v62 = vld [vmem:[%s6610_s6 + $0x808] sm:$0xf0] }
 0x132   : > { %3637 = vmatpush.bf16.msra.mxu3 %v4917_v3  ;;  %v4581_v3 = vor.u32 %v6005_v61, %v4580_v33  ;;  %v6257_v55 = vld [vmem:[%s6610_s6 + $0xbc0] sm:$0xf0]  ;;  %v5112_v61 = vld [vmem:[%s6610_s6 + $0x7f0] sm:$0xf] }
 0x133   : > { %3599 = vmatpush.bf16.msra.mxu0 %v4217_v39  ;;  %v3373_v8 = vpop.f32.mrf.mxu2  ;;  %v5998_v39 = vld [vmem:[%s6610_s6 + $0x3a8] sm:$0xf0]  ;;  %v5336_v53 = vld [vmem:[%s6610_s6 + $0x9b0] sm:$0xf]  ;;  %v5113_v7 = vor.u32 %v6138_v62, %v5112_v61  ;;  %v5981_v30 = vld [vmem:[%s6610_s6 + $0x324] sm:$0xf] }
 0x134   : > { %3612 = vmatpush.bf16.msra.mxu1 %v4441_v11  ;;  %v6054_v11 = vld [vmem:[%s6610_s6 + $0x568] sm:$0xf0]  ;;  %v4553_v24 = vor.u32 %v5998_v39, %v4552_v46  ;;  %v5337_v8 = vor.u32 %v6194_v0, %v5336_v53  ;;  %v5084_v39 = vld [vmem:[%s6610_s6 + $0x7b8] sm:$0xf]  ;;  %v5224_v53 = vld [vmem:[%s6610_s6 + $0x8d0] sm:$0xf] }
 0x135   : > { %3625 = vmatpush.bf16.msra.mxu2 %v4665_v12  ;;  %v3386_v12 = vpop.f32.mrf.mxu3  ;;  %v4777_v27 = vor.u32 %v6054_v11, %v4776_v10  ;;  %v6131_v10 = vld [vmem:[%s6610_s6 + $0x7d0] sm:$0xf0]  ;;  %v5308_v11 = vld [vmem:[%s6610_s6 + $0x978] sm:$0xf]  ;;  %v5448_v0 = vld [vmem:[%s6610_s6 + $0xa90] sm:$0xf] }
 0x136   : > { %3638 = vmatpush.bf16.msra.mxu3 %v4889_v19  ;;  %v5644_v19 = vld [vmem:[%s6610_s6 + $0xc18] sm:$0xf] }
 0x137   : > { %3600 = vmatpush.bf16.msra.mxu0 %v4189_v13  ;;  %v5197_v13 = vor.u32 %v6159_v14, %v5196_v58  ;;  %v6187_v14 = vld [vmem:[%s6610_s6 + $0x990] sm:$0xf0] }
 0x138   : > { %3613 = vmatpush.bf16.msra.mxu1 %v4413_v28  ;;  %v5421_v28 = vor.u32 %v6215_v17, %v5420_v15  ;;  %v5532_v15 = vld [vmem:[%s6610_s6 + $0xb38] sm:$0xf] }
 0x139   : > { %3626 = vmatpush.bf16.msra.mxu2 %v4637_v29  ;;  %v5645_v29 = vor.u32 %v6271_v22, %v5644_v19  ;;  %v5756_v17 = vld [vmem:[%s6610_s6 + $0xcf8] sm:$0xf]  ;;  %v6299_v19 = vld [vmem:[%s6610_s6 + $0xd10] sm:$0xf0]  ;;  %v5085_v22 = vor.u32 %v6131_v10, %v5084_v39  ;;  %v5988_v10 = vld [vmem:[%s6610_s6 + $0x35c] sm:$0xf] }
 0x13a   : > { %3639 = vmatpush.bf16.msra.mxu3 %v4861_v35  ;;  %v6208_v35 = vld [vmem:[%s6610_s6 + $0xa38] sm:$0xf0]  ;;  %v4302_v39 = vld [vmem:[%s6610_s6 + $0x1b4] sm:$0xf0] }
 0x13b   : > { %3601 = vmatpush.bf16.msra.mxu0 %v4161_v49  ;;  %v5393_v48 = vor.u32 %v6208_v35, %v5392_v32  ;;  %v5140_v49 = vld [vmem:[%s6610_s6 + $0x828] sm:$0xf]  ;;  %v6292_v35 = vld [vmem:[%s6610_s6 + $0xcd8] sm:$0xf0] }
 0x13c   : > { %3614 = vmatpush.bf16.msra.mxu1 %v4385_v52  ;;  %v6201_v52 = vld [vmem:[%s6610_s6 + $0xa00] sm:$0xf0]  ;;  %v5141_v59 = vor.u32 %v6145_v47, %v5140_v49 }
 0x13d   : > { %3627 = vmatpush.bf16.msra.mxu2 %v4609_v54  ;;  %v5588_v54 = vld [vmem:[%s6610_s6 + $0xba8] sm:$0xf] }
 0x13e   : > { %3640 = vmatpush.bf16.msra.mxu3 %v4833_v60  ;;  %v5365_v60 = vor.u32 %v6201_v52, %v5364_v50  ;;  %v5589_v33 = vor.u32 %v6257_v55, %v5588_v54  ;;  %v6173_v50 = vld [vmem:[%s6610_s6 + $0x920] sm:$0xf0]  ;;  %v5700_v54 = vld [vmem:[%s6610_s6 + $0xc88] sm:$0xf] }
 0x13f   : > { %3602 = vmatpush.bf16.msra.mxu0 %v4133_v63  ;;  %v5813_v63 = vor.u32 %v6313_v57, %v5812_v56  ;;  %v6229_v52 = vld [vmem:[%s6610_s6 + $0xae0] sm:$0xf0] }
 0x140   : > { %3615 = vmatpush.bf16.msra.mxu1 %v4357_v2  ;;  %v6250_v2 = vld [vmem:[%s6610_s6 + $0xb88] sm:$0xf0]  ;;  %v6285_v55 = vld [vmem:[%s6610_s6 + $0xca0] sm:$0xf0] }
 0x141   : > { %3628 = vmatpush.bf16.msra.mxu2 %v4581_v3  ;;  %v5784_v3 = vld [vmem:[%s6610_s6 + $0xd30] sm:$0xf]  ;;  %v7371_v56 = vld [vmem:[%s6616_s9] sm:$0xff] }
 0x142   : > { %3641 = vmatpush.bf16.msra.mxu3 %v4805_v9  ;;  %v5561_v9 = vor.u32 %v6250_v2, %v5560_v1  ;;  %v5785_v58 = vor.u32 %v6306_v5, %v5784_v3  ;;  %v836_v57 = vperm.slane %v7371_v56, 2  ;;  %v5701_v2 = vor.u32 %v6285_v55, %v5700_v54  ;;  %v6222_v3 = vld [vmem:[%s6610_s6 + $0xaa8] sm:$0xf0]  ;;  %v5672_v5 = vld [vmem:[%s6610_s6 + $0xc50] sm:$0xf] }
 0x143   : > { %3603 = vmatpush.bf16.msra.mxu0 %v4105_v16  ;;  %v7338_v46 = vpop.f32.mrf.mxu0  ;;  %v6243_v16 = vld [vmem:[%s6610_s6 + $0xb50] sm:$0xf0]  ;;  %v4694_v54 = vld [vmem:[%s6610_s6 + $0x4c4] sm:$0xf0]  ;;  %v6086_v55 = vld [vmem:[%s6610_s6 + $0x66c] sm:$0xf] }
 0x144   : > { %3616 = vmatpush.bf16.msra.mxu1 %v4329_v23  ;;  %v7343_v12 = vpop.f32.mrf.mxu1  ;;  %v5309_v23 = vor.u32 %v6187_v14, %v5308_v11  ;;  %v3398_v11 = vadd.f32 %v7338_v46, %v836_v57  ;;  %v4526_v14 = vld [vmem:[%s6610_s6 + $0x374] sm:$0xf0] }
 0x145   : > { %3629 = vmatpush.bf16.msra.mxu2 %v4553_v24  ;;  %v5533_v24 = vor.u32 %v6243_v16, %v5532_v15  ;;  %v6044_v15 = vld [vmem:[%s6610_s6 + $0x51c] sm:$0xf]  ;;  %v4750_v16 = vld [vmem:[%s6610_s6 + $0x534] sm:$0xf0]  ;;  %v4529_v25 = vor.u32 %v5988_v10, %v4526_v14 }
 0x146   : > { %3642 = vmatpush.bf16.msra.mxu3 %v4777_v27  ;;  %3604 = vmatmul.bf16.vlgmr.msra.gmra.mxu0 %v6729_v20  ;;  %v5280_v27 = vld [vmem:[%s6610_s6 + $0x940] sm:$0xf]  ;;  %v4753_v26 = vor.u32 %v6044_v15, %v4750_v16  ;;  %v4190_v10 = vld [vmem:[%s6610_s6 + $0xd4] sm:$0xf0] }
 0x147   : > { %3648 = vmatpush.bf16.msrb.mxu0 %v5197_v13  ;;  %3617 = vmatmul.bf16.vlgmr.msra.gmra.mxu1 %v6732_v21  ;;  %v4414_v16 = vld [vmem:[%s6610_s6 + $0x294] sm:$0xf0] }
 0x148   : > { %3661 = vmatpush.bf16.msrb.mxu1 %v5421_v28  ;;  %3630 = vmatmul.bf16.vlgmr.msra.gmra.mxu2 %v6713_v4  ;;  %v5757_v28 = vor.u32 %v6299_v19, %v5756_v17  ;;  %v5449_v19 = vor.u32 %v6222_v3, %v5448_v0  ;;  %v4442_v0 = vld [vmem:[%s6610_s6 + $0x2cc] sm:$0xf0]  ;;  %v6079_v3 = vld [vmem:[%s6610_s6 + $0x634] sm:$0xf] }
 0x149   : > { %3674 = vmatpush.bf16.msrb.mxu2 %v5645_v29  ;;  %3643 = vmatmul.bf16.vlgmr.msra.gmra.mxu3 %v6718_v6  ;;  %v6180_v29 = vld [vmem:[%s6610_s6 + $0x958] sm:$0xf0] }
 0x14a   : > { %3687 = vmatpush.bf16.msrb.mxu3 %v5869_v34  ;;  %v5728_v34 = vld [vmem:[%s6610_s6 + $0xcc0] sm:$0xf]  ;;  %v5281_v40 = vor.u32 %v6180_v29, %v5280_v27  ;;  %v3411_v27 = vadd.f32 %v7343_v12, %v3398_v11  ;;  %v5960_v11 = vld [vmem:[%s6610_s6 + $0x27c] sm:$0xf] }
 0x14b   : > { %3649 = vmatpush.bf16.msrb.mxu0 %v5169_v45  ;;  %v7353_v13 = vpop.f32.mrf.mxu2  ;;  %v3399_v37 = vpop.f32.mrf.mxu0  ;;  %v5028_v45 = vld [vmem:[%s6610_s6 + $0x748] sm:$0xf]  ;;  %v5729_v47 = vor.u32 %v6292_v35, %v5728_v34  ;;  %v4274_v29 = vld [vmem:[%s6610_s6 + $0x17c] sm:$0xf0]  ;;  %v6037_v35 = vld [vmem:[%s6610_s6 + $0x4e4] sm:$0xf] }
 0x14c   : > { %3662 = vmatpush.bf16.msrb.mxu1 %v5393_v48  ;;  %v7358_v32 = vpop.f32.mrf.mxu3  ;;  %v6117_v48 = vld [vmem:[%s6610_s6 + $0x760] sm:$0xf0]  ;;  %v3412_v49 = vpop.f32.mrf.mxu1  ;;  %v4498_v34 = vld [vmem:[%s6610_s6 + $0x33c] sm:$0xf0] }
 0x14d   : > { %3675 = vmatpush.bf16.msrb.mxu2 %v5617_v18  ;;  %v5252_v18 = vld [vmem:[%s6610_s6 + $0x908] sm:$0xf]  ;;  %v6093_v37 = vld [vmem:[%s6610_s6 + $0x6a4] sm:$0xf] }
 0x14e   : > { %3688 = vmatpush.bf16.msrb.mxu3 %v5841_v51  ;;  %v5476_v51 = vld [vmem:[%s6610_s6 + $0xac8] sm:$0xf]  ;;  %v5253_v61 = vor.u32 %v6173_v50, %v5252_v18  ;;  %v5918_v18 = vld [vmem:[%s6610_s6 + $0x12c] sm:$0xf] }
 0x14f   : > { %3650 = vmatpush.bf16.msrb.mxu0 %v5141_v59  ;;  %v5029_v59 = vor.u32 %v6117_v48, %v5028_v45  ;;  %v5477_v62 = vor.u32 %v6229_v52, %v5476_v51  ;;  %v3424_v48 = vadd.f32 %v7353_v13, %v3411_v27  ;;  %v4246_v49 = vld [vmem:[%s6610_s6 + $0x144] sm:$0xf0]  ;;  %v6030_v52 = vld [vmem:[%s6610_s6 + $0x4ac] sm:$0xf]  ;;  %v5897_v27 = vld [vmem:[%s6610_s6 + $0x84] sm:$0xf] }
 0x150   : > { %3663 = vmatpush.bf16.msrb.mxu1 %v5365_v60  ;;  %v5000_v60 = vld [vmem:[%s6610_s6 + $0x710] sm:$0xf]  ;;  %v4470_v51 = vld [vmem:[%s6610_s6 + $0x304] sm:$0xf0]  ;;  %v4249_v57 = vor.u32 %v5918_v18, %v4246_v49  ;;  %v5890_v18 = vld [vmem:[%s6610_s6 + $0x4c] sm:$0xf] }
 0x151   : > { %3676 = vmatpush.bf16.msrb.mxu2 %v5589_v33  ;;  %v6110_v33 = vld [vmem:[%s6610_s6 + $0x728] sm:$0xf0]  ;;  %v4918_v13 = vld [vmem:[%s6610_s6 + $0x684] sm:$0xf0] }
 0x152   : > { %3689 = vmatpush.bf16.msrb.mxu3 %v5813_v63  ;;  %v6166_v63 = vld [vmem:[%s6610_s6 + $0x8e8] sm:$0xf0] }
 0x153   : > { %3651 = vmatpush.bf16.msrb.mxu0 %v5113_v7  ;;  %v3425_v1 = vpop.f32.mrf.mxu2  ;;  %v6278_v7 = vld [vmem:[%s6610_s6 + $0xc68] sm:$0xf0]  ;;  %v5225_v17 = vor.u32 %v6166_v63, %v5224_v53  ;;  %v5967_v53 = vld [vmem:[%s6610_s6 + $0x2b4] sm:$0xf]  ;;  %v4921_v63 = vor.u32 %v6086_v55, %v4918_v13 }
 0x154   : > { %3664 = vmatpush.bf16.msrb.mxu1 %v5337_v8  ;;  %v3438_v8 = vpop.f32.mrf.mxu3  ;;  %v5673_v46 = vor.u32 %v6278_v7, %v5672_v5  ;;  %v6023_v1 = vld [vmem:[%s6610_s6 + $0x474] sm:$0xf]  ;;  %v4890_v5 = vld [vmem:[%s6610_s6 + $0x64c] sm:$0xf0] }
 0x155   : > { %3677 = vmatpush.bf16.msrb.mxu2 %v5561_v9  ;;  %v5932_v9 = vld [vmem:[%s6610_s6 + $0x19c] sm:$0xf]  ;;  %v4445_v8 = vor.u32 %v5967_v53, %v4442_v0  ;;  %v4893_v15 = vor.u32 %v6079_v3, %v4890_v5  ;;  %v4106_v53 = vld [vmem:[%s6610_s6 + $0x2c] sm:$0xf0]  ;;  %v5995_v3 = vld [vmem:[%s6610_s6 + $0x394] sm:$0xf] }
 0x156   : > { %3690 = vmatpush.bf16.msrb.mxu3 %v5785_v58  ;;  %v5001_v58 = vor.u32 %v6110_v33, %v5000_v60  ;;  %v4697_v33 = vor.u32 %v6030_v52, %v4694_v54  ;;  %v5946_v52 = vld [vmem:[%s6610_s6 + $0x20c] sm:$0xf]  ;;  %v4358_v54 = vld [vmem:[%s6610_s6 + $0x224] sm:$0xf0] }
 0x157   : > { %3652 = vmatpush.bf16.msrb.mxu0 %v5085_v22  ;;  %v6100_v22 = vld [vmem:[%s6610_s6 + $0x6dc] sm:$0xf] }
 0x158   : > { %3665 = vmatpush.bf16.msrb.mxu1 %v5309_v23  ;;  %v4974_v23 = vld [vmem:[%s6610_s6 + $0x6f4] sm:$0xf0] }
 0x159   : > { %3678 = vmatpush.bf16.msrb.mxu2 %v5533_v24  ;;  %v4305_v24 = vor.u32 %v5932_v9, %v4302_v39  ;;  %v4977_v31 = vor.u32 %v6100_v22, %v4974_v23  ;;  %v5904_v39 = vld [vmem:[%s6610_s6 + $0xbc] sm:$0xf]  ;;  %v4862_v23 = vld [vmem:[%s6610_s6 + $0x614] sm:$0xf0] }
 0x15a   : > { %3691 = vmatpush.bf16.msrb.mxu3 %v5757_v28  ;;  %v5925_v28 = vld [vmem:[%s6610_s6 + $0x164] sm:$0xf]  ;;  %v6072_v22 = vld [vmem:[%s6610_s6 + $0x5fc] sm:$0xf] }
 0x15b   : > { %3653 = vmatpush.bf16.msrb.mxu0 %v5057_v36  ;;  %v4722_v36 = vld [vmem:[%s6610_s6 + $0x4fc] sm:$0xf0]  ;;  %v4277_v12 = vor.u32 %v5925_v28, %v4274_v29  ;;  %v5953_v29 = vld [vmem:[%s6610_s6 + $0x244] sm:$0xf] }
 0x15c   : > { %3666 = vmatpush.bf16.msrb.mxu1 %v5281_v40  ;;  %v4946_v40 = vld [vmem:[%s6610_s6 + $0x6bc] sm:$0xf0]  ;;  %v4725_v45 = vor.u32 %v6037_v35, %v4722_v36  ;;  %v6009_v35 = vld [vmem:[%s6610_s6 + $0x404] sm:$0xf] }
 0x15d   : > { %3679 = vmatpush.bf16.msrb.mxu2 %v5505_v43  ;;  %v4501_v43 = vor.u32 %v5981_v30, %v4498_v34  ;;  %v4949_v50 = vor.u32 %v6093_v37, %v4946_v40  ;;  %v4162_v28 = vld [vmem:[%s6610_s6 + $0x9c] sm:$0xf0] }
 0x15e   : > { %3692 = vmatpush.bf16.msrb.mxu3 %v5729_v47  ;;  %v5974_v47 = vld [vmem:[%s6610_s6 + $0x2ec] sm:$0xf]  ;;  %v4386_v34 = vld [vmem:[%s6610_s6 + $0x25c] sm:$0xf0] }
 0x15f   : > { %3654 = vmatpush.bf16.msrb.mxu0 %v5029_v59  ;;  %v3437_v59 = vadd.f32 %v7358_v32, %v3424_v48  ;;  %v4473_v60 = vor.u32 %v5974_v47, %v4470_v51  ;;  %v4610_v36 = vld [vmem:[%s6610_s6 + $0x41c] sm:$0xf0]  ;;  %v4389_v47 = vor.u32 %v5953_v29, %v4386_v34  ;;  %v4134_v51 = vld [vmem:[%s6610_s6 + $0x64] sm:$0xf0] }
 0x160   : > { %3667 = vmatpush.bf16.msrb.mxu1 %v5253_v61  ;;  %v5911_v61 = vld [vmem:[%s6610_s6 + $0xf4] sm:$0xf]  ;;  %v5170_v29 = vld [vmem:[%s6610_s6 + $0x87c] sm:$0xf0] }
 0x161   : > { %3680 = vmatpush.bf16.msrb.mxu2 %v5477_v62  ;;  %v4218_v62 = vld [vmem:[%s6610_s6 + $0x10c] sm:$0xf0]  ;;  %v5394_v34 = vld [vmem:[%s6610_s6 + $0xa3c] sm:$0xf0] }
 0x162   : > { %3693 = vmatpush.bf16.msrb.mxu3 %v5701_v2  ;;  %v4666_v2 = vld [vmem:[%s6610_s6 + $0x48c] sm:$0xf0]  ;;  %v4221_v32 = vor.u32 %v5911_v61, %v4218_v62  ;;  %v4137_v61 = vor.u32 %v5890_v18, %v4134_v51  ;;  %v5883_v62 = vld [vmem:[%s6610_s6 + $0x14] sm:$0xf]  ;;  %v5142_v18 = vld [vmem:[%s6610_s6 + $0x844] sm:$0xf0] }
 0x163   : > { %3655 = vmatpush.bf16.msrb.mxu0 %v5001_v58  ;;  %v3449_v7 = vpop.f32.mrf.mxu0  ;;  %v4669_v9 = vor.u32 %v6023_v1, %v4666_v2  ;;  %v5939_v1 = vld [vmem:[%s6610_s6 + $0x1d4] sm:$0xf]  ;;  %v4330_v2 = vld [vmem:[%s6610_s6 + $0x1ec] sm:$0xf0]  ;;  %v6254_v51 = vld [vmem:[%s6610_s6 + $0xbac] sm:$0xf] }
 0x164   : > { %3668 = vmatpush.bf16.msrb.mxu1 %v5225_v17  ;;  %v3450_v58 = vadd.f32 %v3449_v7, %v3437_v59  ;;  %v3462_v14 = vpop.f32.mrf.mxu1  ;;  %v6016_v17 = vld [vmem:[%s6610_s6 + $0x43c] sm:$0xf]  ;;  %v4582_v59 = vld [vmem:[%s6610_s6 + $0x3e4] sm:$0xf0]  ;;  %v4554_v7 = vld [vmem:[%s6610_s6 + $0x3ac] sm:$0xf0] }
 0x165   : > { %3681 = vmatpush.bf16.msrb.mxu2 %v5449_v19  ;;  %v4638_v19 = vld [vmem:[%s6610_s6 + $0x454] sm:$0xf0] }
 0x166   : > { %3694 = vmatpush.bf16.msrb.mxu3 %v5673_v46  ;;  %3656 = vmatmul.bf16.vlgmr.msrb.gmra.mxu0 %v6792_v41  ;;  %v3463_v46 = vadd.f32 %v3462_v14, %v3450_v58  ;;  %v6212_v58 = vld [vmem:[%s6610_s6 + $0xa5c] sm:$0xf]  ;;  %v4109_v14 = vor.u32 %v5883_v62, %v4106_v53  ;;  %v5338_v53 = vld [vmem:[%s6610_s6 + $0x9cc] sm:$0xf0] }
 0x167   : > { %3700 = vmatpush.bf16.msra.mxu0 %v4305_v24  ;;  %3669 = vmatmul.bf16.vlgmr.msrb.gmra.mxu1 %v6796_v44  ;;  %v4193_v24 = vor.u32 %v5904_v39, %v4190_v10  ;;  %v6156_v10 = vld [vmem:[%s6610_s6 + $0x89c] sm:$0xf] }
 0x168   : > { %3713 = vmatpush.bf16.msra.mxu1 %v4529_v25  ;;  %3682 = vmatmul.bf16.vlgmr.msrb.gmra.mxu2 %v6788_v38  ;;  %v4417_v25 = vor.u32 %v5960_v11, %v4414_v16  ;;  %v5198_v11 = vld [vmem:[%s6610_s6 + $0x8b4] sm:$0xf0]  ;;  %v6268_v16 = vld [vmem:[%s6610_s6 + $0xc1c] sm:$0xf] }
 0x169   : > { %3726 = vmatpush.bf16.msra.mxu2 %v4753_v26  ;;  %3695 = vmatmul.bf16.vlgmr.msrb.gmra.mxu3 %v6794_v42  ;;  %v4641_v26 = vor.u32 %v6016_v17, %v4638_v19  ;;  %v5646_v17 = vld [vmem:[%s6610_s6 + $0xc34] sm:$0xf0]  ;;  %v4333_v19 = vor.u32 %v5939_v1, %v4330_v2  ;;  %v6303_v1 = vld [vmem:[%s6610_s6 + $0xd34] sm:$0xf]  ;;  %v5786_v2 = vld [vmem:[%s6610_s6 + $0xd4c] sm:$0xf0] }
 0x16a   : > { %3739 = vmatpush.bf16.msra.mxu3 %v4977_v31  ;;  %v4865_v31 = vor.u32 %v6072_v22, %v4862_v23  ;;  %v4557_v22 = vor.u32 %v5995_v3, %v4554_v7  ;;  %v6324_v23 = vld [vmem:[%s6610_s6 + $0xddc] sm:$0xf] }
 0x16b   : > { %3701 = vmatpush.bf16.msra.mxu0 %v4277_v12  ;;  %v3475_v30 = vpop.f32.mrf.mxu2  ;;  %v6065_v12 = vld [vmem:[%s6610_s6 + $0x5c4] sm:$0xf]  ;;  %v3451_v49 = vpop.f32.mrf.mxu0 }
 0x16c   : > { %3714 = vmatpush.bf16.msra.mxu1 %v4501_v43  ;;  %v3476_v37 = vadd.f32 %v3475_v30, %v3463_v46  ;;  %v3488_v40 = vpop.f32.mrf.mxu3  ;;  %v4834_v43 = vld [vmem:[%s6610_s6 + $0x5dc] sm:$0xf0]  ;;  %v3464_v55 = vpop.f32.mrf.mxu1  ;;  %v5870_v46 = vld [vmem:[%s6610_s6 + $0xdf4] sm:$0xf0]  ;;  %v6205_v30 = vld [vmem:[%s6610_s6 + $0xa24] sm:$0xf] }
 0x16d   : > { %3727 = vmatpush.bf16.msra.mxu2 %v4725_v45  ;;  %v4165_v45 = vor.u32 %v5897_v27, %v4162_v28  ;;  %v4837_v13 = vor.u32 %v6065_v12, %v4834_v43  ;;  %v5649_v27 = vor.u32 %v6268_v16, %v5646_v17  ;;  %v6149_v28 = vld [vmem:[%s6610_s6 + $0x864] sm:$0xf]  ;;  %v5397_v43 = vor.u32 %v6205_v30, %v5394_v34  ;;  %v6198_v49 = vld [vmem:[%s6610_s6 + $0x9ec] sm:$0xf]  ;;  %v5814_v55 = vld [vmem:[%s6610_s6 + $0xd84] sm:$0xf0] }
 0x16e   : > { %3740 = vmatpush.bf16.msra.mxu3 %v4949_v50  ;;  %v3489_v48 = vadd.f32 %v3488_v40, %v3476_v37  ;;  %v4613_v50 = vor.u32 %v6009_v35, %v4610_v36  ;;  %v6261_v35 = vld [vmem:[%s6610_s6 + $0xbe4] sm:$0xf]  ;;  %v5618_v36 = vld [vmem:[%s6610_s6 + $0xbfc] sm:$0xf0]  ;;  %v5173_v12 = vor.u32 %v6149_v28, %v5170_v29  ;;  %v6296_v16 = vld [vmem:[%s6610_s6 + $0xcfc] sm:$0xf] }
 0x16f   : > { %3702 = vmatpush.bf16.msra.mxu0 %v4249_v57  ;;  %v6002_v57 = vld [vmem:[%s6610_s6 + $0x3cc] sm:$0xf]  ;;  %v6317_v37 = vld [vmem:[%s6610_s6 + $0xda4] sm:$0xf]  ;;  %v5842_v40 = vld [vmem:[%s6610_s6 + $0xdbc] sm:$0xf0] }
 0x170   : > { %3715 = vmatpush.bf16.msra.mxu1 %v4473_v60  ;;  %3910 = vst [vmem:[%s7133_s28 + $0x10] sm:$0xff] %v3489_v48  ;;  %v6058_v60 = vld [vmem:[%s6610_s6 + $0x58c] sm:$0xf]  ;;  %v4585_v0 = vor.u32 %v6002_v57, %v4582_v59  ;;  %v5758_v17 = vld [vmem:[%s6610_s6 + $0xd14] sm:$0xf0] }
 0x171   : > { %3728 = vmatpush.bf16.msra.mxu2 %v4697_v33  ;;  %v4806_v33 = vld [vmem:[%s6610_s6 + $0x5a4] sm:$0xf0]  ;;  %v6142_v48 = vld [vmem:[%s6610_s6 + $0x82c] sm:$0xf]  ;;  %v5282_v28 = vld [vmem:[%s6610_s6 + $0x95c] sm:$0xf0] }
 0x172   : > { %3741 = vmatpush.bf16.msra.mxu3 %v4921_v63  ;;  %v4361_v63 = vor.u32 %v5946_v52, %v4358_v54  ;;  %v5590_v52 = vld [vmem:[%s6610_s6 + $0xbc4] sm:$0xf0]  ;;  %v6310_v54 = vld [vmem:[%s6610_s6 + $0xd6c] sm:$0xf]  ;;  %v6233_v29 = vld [vmem:[%s6610_s6 + $0xb04] sm:$0xf] }
 0x173   : > { %3703 = vmatpush.bf16.msra.mxu0 %v4221_v32  ;;  %v3477_v5 = vpop.f32.mrf.mxu2  ;;  %v4809_v32 = vor.u32 %v6058_v60, %v4806_v33  ;;  %v5593_v59 = vor.u32 %v6254_v51, %v5590_v52  ;;  %v6135_v60 = vld [vmem:[%s6610_s6 + $0x7f4] sm:$0xf]  ;;  %v5114_v33 = vld [vmem:[%s6610_s6 + $0x80c] sm:$0xf0]  ;;  %v5817_v62 = vor.u32 %v6310_v54, %v5814_v55  ;;  %v5506_v30 = vld [vmem:[%s6610_s6 + $0xb1c] sm:$0xf0] }
 0x174   : > { %3716 = vmatpush.bf16.msra.mxu1 %v4445_v8  ;;  %v6051_v8 = vld [vmem:[%s6610_s6 + $0x554] sm:$0xf]  ;;  %v3490_v39 = vpop.f32.mrf.mxu3  ;;  %v5117_v3 = vor.u32 %v6135_v60, %v5114_v33  ;;  %v6289_v34 = vld [vmem:[%s6610_s6 + $0xcc4] sm:$0xf]  ;;  %v5478_v51 = vld [vmem:[%s6610_s6 + $0xae4] sm:$0xf0] }
 0x175   : > { %3729 = vmatpush.bf16.msra.mxu2 %v4669_v9  ;;  %v4778_v9 = vld [vmem:[%s6610_s6 + $0x56c] sm:$0xf0]  ;;  %v6184_v39 = vld [vmem:[%s6610_s6 + $0x97c] sm:$0xf]  ;;  %v6282_v52 = vld [vmem:[%s6610_s6 + $0xc8c] sm:$0xf] }
 0x176   : > { %3742 = vmatpush.bf16.msra.mxu3 %v4893_v15  ;;  %v5422_v15 = vld [vmem:[%s6610_s6 + $0xa74] sm:$0xf0]  ;;  %v5702_v54 = vld [vmem:[%s6610_s6 + $0xca4] sm:$0xf0]  ;;  %v837_v55 = vperm.slane %v7371_v56, 3 }
 0x177   : > { %3704 = vmatpush.bf16.msra.mxu0 %v4193_v24  ;;  %v4781_v24 = vor.u32 %v6051_v8, %v4778_v9  ;;  %v6128_v8 = vld [vmem:[%s6610_s6 + $0x7bc] sm:$0xf]  ;;  %v5086_v9 = vld [vmem:[%s6610_s6 + $0x7d4] sm:$0xf0] }
 0x178   : > { %3717 = vmatpush.bf16.msra.mxu1 %v4417_v25  ;;  %v5201_v25 = vor.u32 %v6156_v10, %v5198_v11  ;;  %v5789_v11 = vor.u32 %v6303_v1, %v5786_v2  ;;  %v6275_v1 = vld [vmem:[%s6610_s6 + $0xc54] sm:$0xf]  ;;  %v5674_v2 = vld [vmem:[%s6610_s6 + $0xc6c] sm:$0xf0] }
 0x179   : > { %3730 = vmatpush.bf16.msra.mxu2 %v4641_v26  ;;  %v5425_v26 = vor.u32 %v6212_v58, %v5422_v15  ;;  %v5310_v58 = vld [vmem:[%s6610_s6 + $0x994] sm:$0xf0] }
 0x17a   : > { %3743 = vmatpush.bf16.msra.mxu3 %v4865_v31  ;;  %v5873_v31 = vor.u32 %v6324_v23, %v5870_v46  ;;  %v5534_v15 = vld [vmem:[%s6610_s6 + $0xb54] sm:$0xf0]  ;;  %v6121_v46 = vld [vmem:[%s6610_s6 + $0x784] sm:$0xf] }
 0x17b   : > { %3705 = vmatpush.bf16.msra.mxu0 %v4165_v45  ;;  %v5621_v45 = vor.u32 %v6261_v35, %v5618_v36  ;;  %v5730_v35 = vld [vmem:[%s6610_s6 + $0xcdc] sm:$0xf0] }
 0x17c   : > { %3718 = vmatpush.bf16.msra.mxu1 %v4389_v47  ;;  %v5845_v47 = vor.u32 %v6317_v37, %v5842_v40 }
 0x17d   : > { %3731 = vmatpush.bf16.msra.mxu2 %v4613_v50  ;;  %v5366_v50 = vld [vmem:[%s6610_s6 + $0xa04] sm:$0xf0] }
 0x17e   : > { %3744 = vmatpush.bf16.msra.mxu3 %v4837_v13  ;;  %v5145_v13 = vor.u32 %v6142_v48, %v5142_v18  ;;  %v5369_v57 = vor.u32 %v6198_v49, %v5366_v50  ;;  %v6170_v48 = vld [vmem:[%s6610_s6 + $0x90c] sm:$0xf]  ;;  %v5733_v49 = vor.u32 %v6289_v34, %v5730_v35  ;;  %v4728_v34 = vld [vmem:[%s6610_s6 + $0x4e8] sm:$0xf]  ;;  %v6041_v35 = vld [vmem:[%s6610_s6 + $0x500] sm:$0xf0] }
 0x17f   : > { %3706 = vmatpush.bf16.msra.mxu0 %v4137_v61  ;;  %v6191_v61 = vld [vmem:[%s6610_s6 + $0x9b4] sm:$0xf]  ;;  %v6226_v50 = vld [vmem:[%s6610_s6 + $0xacc] sm:$0xf] }
 0x180   : > { %3719 = vmatpush.bf16.msra.mxu1 %v4361_v63  ;;  %v6247_v63 = vld [vmem:[%s6610_s6 + $0xb74] sm:$0xf]  ;;  %v5481_v33 = vor.u32 %v6226_v50, %v5478_v51  ;;  %v4700_v50 = vld [vmem:[%s6610_s6 + $0x4b0] sm:$0xf]  ;;  %v6034_v51 = vld [vmem:[%s6610_s6 + $0x4c8] sm:$0xf0] }
 0x181   : > { %3732 = vmatpush.bf16.msra.mxu2 %v4585_v0  ;;  %v5562_v0 = vld [vmem:[%s6610_s6 + $0xb8c] sm:$0xf0] }
 0x182   : > { %3745 = vmatpush.bf16.msra.mxu3 %v4809_v32  ;;  %v5341_v32 = vor.u32 %v6191_v61, %v5338_v53  ;;  %v5565_v7 = vor.u32 %v6247_v63, %v5562_v0  ;;  %v6163_v61 = vld [vmem:[%s6610_s6 + $0x8d4] sm:$0xf]  ;;  %v5705_v63 = vor.u32 %v6282_v52, %v5702_v54  ;;  %v5450_v0 = vld [vmem:[%s6610_s6 + $0xaac] sm:$0xf0] }
 0x183   : > { %3707 = vmatpush.bf16.msra.mxu0 %v4109_v14  ;;  %v7491_v5 = vpop.f32.mrf.mxu0  ;;  %v6240_v14 = vld [vmem:[%s6610_s6 + $0xb3c] sm:$0xf]  ;;  %v6219_v53 = vld [vmem:[%s6610_s6 + $0xa94] sm:$0xf]  ;;  %v4924_v52 = vld [vmem:[%s6610_s6 + $0x670] sm:$0xf] }
 0x184   : > { %3720 = vmatpush.bf16.msra.mxu1 %v4333_v19  ;;  %v7496_v10 = vpop.f32.mrf.mxu1  ;;  %v5089_v19 = vor.u32 %v6128_v8, %v5086_v9  ;;  %v5537_v23 = vor.u32 %v6240_v14, %v5534_v15  ;;  %v4532_v8 = vld [vmem:[%s6610_s6 + $0x360] sm:$0xf]  ;;  %v3502_v9 = vadd.f32 %v7491_v5, %v837_v55  ;;  %v6048_v14 = vld [vmem:[%s6610_s6 + $0x538] sm:$0xf0]  ;;  %v5677_v5 = vor.u32 %v6275_v1, %v5674_v2 }
 0x185   : > { %3733 = vmatpush.bf16.msra.mxu2 %v4557_v22  ;;  %v5313_v22 = vor.u32 %v6184_v39, %v5310_v58  ;;  %v4756_v58 = vld [vmem:[%s6610_s6 + $0x520] sm:$0xf] }
 0x186   : > { %3746 = vmatpush.bf16.msra.mxu3 %v4781_v24  ;;  %3708 = vmatmul.bf16.vlgmr.msra.gmra.mxu0 %v6729_v20  ;;  %v5058_v24 = vld [vmem:[%s6610_s6 + $0x79c] sm:$0xf0] }
 0x187   : > { %3752 = vmatpush.bf16.msrb.mxu0 %v5201_v25  ;;  %3721 = vmatmul.bf16.vlgmr.msra.gmra.mxu1 %v6732_v21  ;;  %v6177_v25 = vld [vmem:[%s6610_s6 + $0x944] sm:$0xf]  ;;  %v5061_v36 = vor.u32 %v6121_v46, %v5058_v24  ;;  %v4757_v46 = vor.u32 %v6048_v14, %v4756_v58  ;;  %v3515_v24 = vadd.f32 %v7496_v10, %v3502_v9  ;;  %v5964_v58 = vld [vmem:[%s6610_s6 + $0x298] sm:$0xf0]  ;;  %v4644_v14 = vld [vmem:[%s6610_s6 + $0x440] sm:$0xf] }
 0x188   : > { %3765 = vmatpush.bf16.msrb.mxu1 %v5425_v26  ;;  %3734 = vmatmul.bf16.vlgmr.msra.gmra.mxu2 %v6713_v4  ;;  %v5285_v40 = vor.u32 %v6177_v25, %v5282_v28  ;;  %v4280_v25 = vld [vmem:[%s6610_s6 + $0x168] sm:$0xf] }
 0x189   : > { %3778 = vmatpush.bf16.msrb.mxu2 %v5649_v27  ;;  %3747 = vmatmul.bf16.vlgmr.msra.gmra.mxu3 %v6718_v6  ;;  %v5761_v27 = vor.u32 %v6296_v16, %v5758_v17  ;;  %v5453_v16 = vor.u32 %v6219_v53, %v5450_v0  ;;  %v4980_v17 = vld [vmem:[%s6610_s6 + $0x6e0] sm:$0xf]  ;;  %v4504_v28 = vld [vmem:[%s6610_s6 + $0x328] sm:$0xf]  ;;  %v4672_v53 = vld [vmem:[%s6610_s6 + $0x478] sm:$0xf] }
 0x18a   : > { %3791 = vmatpush.bf16.msrb.mxu3 %v5873_v31  ;;  %v6083_v0 = vld [vmem:[%s6610_s6 + $0x650] sm:$0xf0] }
 0x18b   : > { %3753 = vmatpush.bf16.msrb.mxu0 %v5173_v12  ;;  %v7506_v26 = vpop.f32.mrf.mxu2  ;;  %v3503_v37 = vpop.f32.mrf.mxu0  ;;  %v5509_v12 = vor.u32 %v6233_v29, %v5506_v30  ;;  %v5985_v30 = vld [vmem:[%s6610_s6 + $0x340] sm:$0xf0] }
 0x18c   : > { %3766 = vmatpush.bf16.msrb.mxu1 %v5397_v43  ;;  %v7511_v31 = vpop.f32.mrf.mxu3  ;;  %v6114_v43 = vld [vmem:[%s6610_s6 + $0x74c] sm:$0xf]  ;;  %v3516_v18 = vpop.f32.mrf.mxu1  ;;  %v6097_v37 = vld [vmem:[%s6610_s6 + $0x6c0] sm:$0xf0] }
 0x18d   : > { %3779 = vmatpush.bf16.msrb.mxu2 %v5621_v45  ;;  %v5030_v45 = vld [vmem:[%s6610_s6 + $0x764] sm:$0xf0]  ;;  %v4476_v18 = vld [vmem:[%s6610_s6 + $0x2f0] sm:$0xf] }
 0x18e   : > { %3792 = vmatpush.bf16.msrb.mxu3 %v5845_v47  ;;  %v5254_v47 = vld [vmem:[%s6610_s6 + $0x924] sm:$0xf0] }
 0x18f   : > { %3754 = vmatpush.bf16.msrb.mxu0 %v5145_v13  ;;  %v5033_v13 = vor.u32 %v6114_v43, %v5030_v45  ;;  %v5257_v60 = vor.u32 %v6170_v48, %v5254_v47  ;;  %v3528_v43 = vadd.f32 %v7506_v26, %v3515_v24  ;;  %v4252_v45 = vld [vmem:[%s6610_s6 + $0x130] sm:$0xf]  ;;  %v5922_v48 = vld [vmem:[%s6610_s6 + $0x148] sm:$0xf0]  ;;  %v5901_v24 = vld [vmem:[%s6610_s6 + $0xa0] sm:$0xf0] }
 0x190   : > { %3767 = vmatpush.bf16.msrb.mxu1 %v5369_v57  ;;  %v6107_v57 = vld [vmem:[%s6610_s6 + $0x714] sm:$0xf]  ;;  %v5978_v47 = vld [vmem:[%s6610_s6 + $0x308] sm:$0xf0]  ;;  %v4253_v54 = vor.u32 %v5922_v48, %v4252_v45 }
 0x191   : > { %3780 = vmatpush.bf16.msrb.mxu2 %v5593_v59  ;;  %v5002_v59 = vld [vmem:[%s6610_s6 + $0x72c] sm:$0xf0]  ;;  %v6090_v26 = vld [vmem:[%s6610_s6 + $0x688] sm:$0xf0]  ;;  %v3541_v55 = vadd.f32 %v7511_v31, %v3528_v43 }
 0x192   : > { %3793 = vmatpush.bf16.msrb.mxu3 %v5817_v62  ;;  %v5226_v62 = vld [vmem:[%s6610_s6 + $0x8ec] sm:$0xf0]  ;;  %v5005_v39 = vor.u32 %v6107_v57, %v5002_v59  ;;  %v4701_v57 = vor.u32 %v6034_v51, %v4700_v50  ;;  %v4224_v59 = vld [vmem:[%s6610_s6 + $0xf8] sm:$0xf]  ;;  %v5950_v50 = vld [vmem:[%s6610_s6 + $0x228] sm:$0xf0] }
 0x193   : > { %3755 = vmatpush.bf16.msrb.mxu0 %v5117_v3  ;;  %v3529_v56 = vpop.f32.mrf.mxu2  ;;  %v5229_v15 = vor.u32 %v6163_v61, %v5226_v62  ;;  %v4925_v61 = vor.u32 %v6090_v26, %v4924_v52  ;;  %v5971_v62 = vld [vmem:[%s6610_s6 + $0x2d0] sm:$0xf0]  ;;  %v4140_v43 = vld [vmem:[%s6610_s6 + $0x50] sm:$0xf] }
 0x194   : > { %3768 = vmatpush.bf16.msrb.mxu1 %v5341_v32  ;;  %v3542_v3 = vpop.f32.mrf.mxu3  ;;  %v4308_v32 = vld [vmem:[%s6610_s6 + $0x1a0] sm:$0xf]  ;;  %v6027_v56 = vld [vmem:[%s6610_s6 + $0x490] sm:$0xf0]  ;;  %v4588_v26 = vld [vmem:[%s6610_s6 + $0x3d0] sm:$0xf] }
 0x195   : > { %3781 = vmatpush.bf16.msrb.mxu2 %v5565_v7  ;;  %v5936_v7 = vld [vmem:[%s6610_s6 + $0x1b8] sm:$0xf0]  ;;  %v4673_v3 = vor.u32 %v6027_v56, %v4672_v53  ;;  %v5943_v53 = vld [vmem:[%s6610_s6 + $0x1f0] sm:$0xf0]  ;;  %v4560_v56 = vld [vmem:[%s6610_s6 + $0x398] sm:$0xf] }
 0x196   : > { %3794 = vmatpush.bf16.msrb.mxu3 %v5789_v11  ;;  %v5992_v11 = vld [vmem:[%s6610_s6 + $0x378] sm:$0xf0] }
 0x197   : > { %3756 = vmatpush.bf16.msrb.mxu0 %v5089_v19  ;;  %v6104_v19 = vld [vmem:[%s6610_s6 + $0x6f8] sm:$0xf0] }
 0x198   : > { %3769 = vmatpush.bf16.msrb.mxu1 %v5313_v22  ;;  %v4309_v22 = vor.u32 %v5936_v7, %v4308_v32  ;;  %v4981_v29 = vor.u32 %v6104_v19, %v4980_v17  ;;  %v4196_v32 = vld [vmem:[%s6610_s6 + $0xc0] sm:$0xf]  ;;  %v5908_v7 = vld [vmem:[%s6610_s6 + $0xd8] sm:$0xf0] }
 0x199   : > { %3782 = vmatpush.bf16.msrb.mxu2 %v5537_v23  ;;  %v4533_v23 = vor.u32 %v5992_v11, %v4532_v8  ;;  %v4420_v8 = vld [vmem:[%s6610_s6 + $0x280] sm:$0xf]  ;;  %v6076_v17 = vld [vmem:[%s6610_s6 + $0x618] sm:$0xf0] }
 0x19a   : > { %3795 = vmatpush.bf16.msrb.mxu3 %v5761_v27  ;;  %v5929_v27 = vld [vmem:[%s6610_s6 + $0x180] sm:$0xf0] }
 0x19b   : > { %3757 = vmatpush.bf16.msrb.mxu0 %v5061_v36  ;;  %v4952_v36 = vld [vmem:[%s6610_s6 + $0x6a8] sm:$0xf]  ;;  %v4281_v10 = vor.u32 %v5929_v27, %v4280_v25 }
 0x19c   : > { %3770 = vmatpush.bf16.msrb.mxu1 %v5285_v40  ;;  %v4505_v40 = vor.u32 %v5985_v30, %v4504_v28  ;;  %v4392_v25 = vld [vmem:[%s6610_s6 + $0x248] sm:$0xf] }
 0x19d   : > { %3783 = vmatpush.bf16.msrb.mxu2 %v5509_v12  ;;  %v4729_v12 = vor.u32 %v6041_v35, %v4728_v34  ;;  %v4616_v30 = vld [vmem:[%s6610_s6 + $0x408] sm:$0xf]  ;;  %v6013_v34 = vld [vmem:[%s6610_s6 + $0x420] sm:$0xf0] }
 0x19e   : > { %3796 = vmatpush.bf16.msrb.mxu3 %v5733_v49  ;;  %v4953_v49 = vor.u32 %v6097_v37, %v4952_v36  ;;  %v4840_v37 = vld [vmem:[%s6610_s6 + $0x5c8] sm:$0xf] }
 0x19f   : > { %3758 = vmatpush.bf16.msrb.mxu0 %v5033_v13  ;;  %v4477_v13 = vor.u32 %v5978_v47, %v4476_v18  ;;  %v4617_v18 = vor.u32 %v6013_v34, %v4616_v30  ;;  %v4364_v47 = vld [vmem:[%s6610_s6 + $0x210] sm:$0xf]  ;;  %v6265_v30 = vld [vmem:[%s6610_s6 + $0xc00] sm:$0xf0]  ;;  %v5848_v34 = vld [vmem:[%s6610_s6 + $0xda8] sm:$0xf] }
 0x1a0   : > { %3771 = vmatpush.bf16.msrb.mxu1 %v5257_v60  ;;  %v5915_v60 = vld [vmem:[%s6610_s6 + $0x110] sm:$0xf0] }
 0x1a1   : > { %3784 = vmatpush.bf16.msrb.mxu2 %v5481_v33  ;;  %v4448_v33 = vld [vmem:[%s6610_s6 + $0x2b8] sm:$0xf]  ;;  %v4225_v31 = vor.u32 %v5915_v60, %v4224_v59  ;;  %v5887_v60 = vld [vmem:[%s6610_s6 + $0x30] sm:$0xf0] }
 0x1a2   : > { %3797 = vmatpush.bf16.msrb.mxu3 %v5705_v63  ;;  %v4896_v63 = vld [vmem:[%s6610_s6 + $0x638] sm:$0xf]  ;;  %v4449_v2 = vor.u32 %v5971_v62, %v4448_v33  ;;  %v4365_v33 = vor.u32 %v5950_v50, %v4364_v47  ;;  %v5820_v47 = vld [vmem:[%s6610_s6 + $0xd70] sm:$0xf]  ;;  %v6314_v50 = vld [vmem:[%s6610_s6 + $0xd88] sm:$0xf0] }
 0x1a3   : > { %3759 = vmatpush.bf16.msrb.mxu0 %v5005_v39  ;;  %v3553_v1 = vpop.f32.mrf.mxu0  ;;  %v4897_v11 = vor.u32 %v6083_v0, %v4896_v63  ;;  %v4112_v59 = vld [vmem:[%s6610_s6 + $0x18] sm:$0xf] }
 0x1a4   : > { %3772 = vmatpush.bf16.msrb.mxu1 %v5229_v15  ;;  %v3554_v9 = vadd.f32 %v3553_v1, %v3541_v55  ;;  %v3566_v39 = vpop.f32.mrf.mxu1  ;;  %v6020_v15 = vld [vmem:[%s6610_s6 + $0x458] sm:$0xf0]  ;;  %v4812_v55 = vld [vmem:[%s6610_s6 + $0x590] sm:$0xf]  ;;  %v4336_v62 = vld [vmem:[%s6610_s6 + $0x1d8] sm:$0xf] }
 0x1a5   : > { %3785 = vmatpush.bf16.msrb.mxu2 %v5453_v16  ;;  %v4868_v16 = vld [vmem:[%s6610_s6 + $0x600] sm:$0xf]  ;;  %v4784_v1 = vld [vmem:[%s6610_s6 + $0x558] sm:$0xf] }
 0x1a6   : > { %3798 = vmatpush.bf16.msrb.mxu3 %v5677_v5  ;;  %3760 = vmatmul.bf16.vlgmr.msrb.gmra.mxu0 %v6792_v41  ;;  %v3567_v19 = vadd.f32 %v3566_v39, %v3554_v9  ;;  %v4197_v5 = vor.u32 %v5908_v7, %v4196_v32  ;;  %v4869_v28 = vor.u32 %v6076_v17, %v4868_v16  ;;  %v5204_v32 = vld [vmem:[%s6610_s6 + $0x8a0] sm:$0xf]  ;;  %v6160_v7 = vld [vmem:[%s6610_s6 + $0x8b8] sm:$0xf0] }
 0x1a7   : > { %3804 = vmatpush.bf16.msra.mxu0 %v4309_v22  ;;  %3773 = vmatmul.bf16.vlgmr.msrb.gmra.mxu1 %v6796_v44  ;;  %v4421_v22 = vor.u32 %v5964_v58, %v4420_v8  ;;  %v5428_v8 = vld [vmem:[%s6610_s6 + $0xa60] sm:$0xf]  ;;  %v4113_v9 = vor.u32 %v5887_v60, %v4112_v59  ;;  %v6216_v39 = vld [vmem:[%s6610_s6 + $0xa78] sm:$0xf0]  ;;  %v5792_v59 = vld [vmem:[%s6610_s6 + $0xd38] sm:$0xf] }
 0x1a8   : > { %3817 = vmatpush.bf16.msra.mxu1 %v4533_v23  ;;  %3786 = vmatmul.bf16.vlgmr.msrb.gmra.mxu2 %v6788_v38  ;;  %v4645_v23 = vor.u32 %v6020_v15, %v4644_v14  ;;  %v6272_v58 = vld [vmem:[%s6610_s6 + $0xc38] sm:$0xf0]  ;;  %v4337_v14 = vor.u32 %v5943_v53, %v4336_v62  ;;  %v5876_v16 = vld [vmem:[%s6610_s6 + $0xde0] sm:$0xf]  ;;  %v6307_v60 = vld [vmem:[%s6610_s6 + $0xd50] sm:$0xf0] }
 0x1a9   : > { %3830 = vmatpush.bf16.msra.mxu2 %v4757_v46  ;;  %3799 = vmatmul.bf16.vlgmr.msrb.gmra.mxu3 %v6794_v42  ;;  %v4168_v46 = vld [vmem:[%s6610_s6 + $0x88] sm:$0xf]  ;;  %v6328_v17 = vld [vmem:[%s6610_s6 + $0xdf8] sm:$0xf0]  ;;  %v5092_v53 = vld [vmem:[%s6610_s6 + $0x7c0] sm:$0xf] }
 0x1aa   : > { %3843 = vmatpush.bf16.msra.mxu3 %v4981_v29  ;;  %v5957_v29 = vld [vmem:[%s6610_s6 + $0x260] sm:$0xf0] }
 0x1ab   : > { %3805 = vmatpush.bf16.msra.mxu0 %v4281_v10  ;;  %v3579_v27 = vpop.f32.mrf.mxu2  ;;  %v6069_v10 = vld [vmem:[%s6610_s6 + $0x5e0] sm:$0xf0]  ;;  %v3555_v45 = vpop.f32.mrf.mxu0  ;;  %v4393_v48 = vor.u32 %v5957_v29, %v4392_v25  ;;  %v5400_v25 = vld [vmem:[%s6610_s6 + $0xa28] sm:$0xf] }
 0x1ac   : > { %3818 = vmatpush.bf16.msra.mxu1 %v4505_v40  ;;  %v3580_v35 = vadd.f32 %v3579_v27, %v3567_v19  ;;  %v3592_v36 = vpop.f32.mrf.mxu3  ;;  %v4169_v40 = vor.u32 %v5901_v24, %v4168_v46  ;;  %v3568_v51 = vpop.f32.mrf.mxu1  ;;  %v4841_v52 = vor.u32 %v6069_v10, %v4840_v37  ;;  %v5176_v46 = vld [vmem:[%s6610_s6 + $0x868] sm:$0xf]  ;;  %v6153_v24 = vld [vmem:[%s6610_s6 + $0x880] sm:$0xf0]  ;;  %v5877_v27 = vor.u32 %v6328_v17, %v5876_v16 }
 0x1ad   : > { %3831 = vmatpush.bf16.msra.mxu2 %v4729_v12  ;;  %v5624_v29 = vld [vmem:[%s6610_s6 + $0xbe8] sm:$0xf]  ;;  %v6181_v17 = vld [vmem:[%s6610_s6 + $0x960] sm:$0xf0] }
 0x1ae   : > { %3844 = vmatpush.bf16.msra.mxu3 %v4953_v49  ;;  %v3593_v12 = vadd.f32 %v3592_v36, %v3580_v35  ;;  %v5894_v49 = vld [vmem:[%s6610_s6 + $0x68] sm:$0xf0]  ;;  %v6321_v35 = vld [vmem:[%s6610_s6 + $0xdc0] sm:$0xf0]  ;;  %v5177_v36 = vor.u32 %v6153_v24, %v5176_v46  ;;  %v5625_v10 = vor.u32 %v6265_v30, %v5624_v29  ;;  %v5036_v29 = vld [vmem:[%s6610_s6 + $0x750] sm:$0xf] }
 0x1af   : > { %3806 = vmatpush.bf16.msra.mxu0 %v4253_v54  ;;  %v6006_v54 = vld [vmem:[%s6610_s6 + $0x3e8] sm:$0xf0]  ;;  %v5849_v45 = vor.u32 %v6321_v35, %v5848_v34  ;;  %v6293_v46 = vld [vmem:[%s6610_s6 + $0xce0] sm:$0xf0]  ;;  %v5260_v34 = vld [vmem:[%s6610_s6 + $0x910] sm:$0xf] }
 0x1b0   : > { %3819 = vmatpush.bf16.msra.mxu1 %v4477_v13  ;;  %3911 = vst [vmem:[%s7133_s28 + $0x18] sm:$0xff] %v3593_v12  ;;  %v6062_v13 = vld [vmem:[%s6610_s6 + $0x5a8] sm:$0xf0] }
 0x1b1   : > { %3832 = vmatpush.bf16.msra.mxu2 %v4701_v57  ;;  %v4141_v57 = vor.u32 %v5894_v49, %v4140_v43  ;;  %v4813_v0 = vor.u32 %v6062_v13, %v4812_v55  ;;  %v6146_v12 = vld [vmem:[%s6610_s6 + $0x848] sm:$0xf0]  ;;  %v5372_v43 = vld [vmem:[%s6610_s6 + $0x9f0] sm:$0xf]  ;;  %v5821_v55 = vor.u32 %v6314_v50, %v5820_v47  ;;  %v6195_v13 = vld [vmem:[%s6610_s6 + $0x9d0] sm:$0xf0] }
 0x1b2   : > { %3845 = vmatpush.bf16.msra.mxu3 %v4925_v61  ;;  %v4589_v61 = vor.u32 %v6006_v54, %v4588_v26  ;;  %v6258_v49 = vld [vmem:[%s6610_s6 + $0xbc8] sm:$0xf0]  ;;  %v5120_v26 = vld [vmem:[%s6610_s6 + $0x7f8] sm:$0xf]  ;;  %v6139_v54 = vld [vmem:[%s6610_s6 + $0x810] sm:$0xf0] }
 0x1b3   : > { %3807 = vmatpush.bf16.msra.mxu0 %v4225_v31  ;;  %v3581_v63 = vpop.f32.mrf.mxu2  ;;  %v5999_v31 = vld [vmem:[%s6610_s6 + $0x3b0] sm:$0xf0]  ;;  %v6118_v30 = vld [vmem:[%s6610_s6 + $0x768] sm:$0xf0]  ;;  %v5008_v50 = vld [vmem:[%s6610_s6 + $0x718] sm:$0xf] }
 0x1b4   : > { %3820 = vmatpush.bf16.msra.mxu1 %v4449_v2  ;;  %v6055_v2 = vld [vmem:[%s6610_s6 + $0x570] sm:$0xf0]  ;;  %v4561_v15 = vor.u32 %v5999_v31, %v4560_v56  ;;  %v6132_v56 = vld [vmem:[%s6610_s6 + $0x7d8] sm:$0xf0]  ;;  %v5316_v63 = vld [vmem:[%s6610_s6 + $0x980] sm:$0xf]  ;;  %v5793_v31 = vor.u32 %v6307_v60, %v5792_v59 }
 0x1b5   : > { %3833 = vmatpush.bf16.msra.mxu2 %v4673_v3  ;;  %v3594_v3 = vpop.f32.mrf.mxu3  ;;  %v4785_v19 = vor.u32 %v6055_v2, %v4784_v1  ;;  %v6188_v1 = vld [vmem:[%s6610_s6 + $0x998] sm:$0xf0]  ;;  %v5540_v2 = vld [vmem:[%s6610_s6 + $0xb40] sm:$0xf] }
 0x1b6   : > { %3846 = vmatpush.bf16.msra.mxu3 %v4897_v11  ;;  %v5652_v11 = vld [vmem:[%s6610_s6 + $0xc20] sm:$0xf]  ;;  %v6244_v3 = vld [vmem:[%s6610_s6 + $0xb58] sm:$0xf0] }
 0x1b7   : > { %3808 = vmatpush.bf16.msra.mxu0 %v4197_v5  ;;  %v5205_v5 = vor.u32 %v6160_v7, %v5204_v32  ;;  %v5764_v32 = vld [vmem:[%s6610_s6 + $0xd00] sm:$0xf]  ;;  %v6300_v7 = vld [vmem:[%s6610_s6 + $0xd18] sm:$0xf0] }
 0x1b8   : > { %3821 = vmatpush.bf16.msra.mxu1 %v4421_v22  ;;  %v5429_v22 = vor.u32 %v6216_v39, %v5428_v8  ;;  %v5093_v8 = vor.u32 %v6132_v56, %v5092_v53  ;;  %v5541_v39 = vor.u32 %v6244_v3, %v5540_v2  ;;  %v5765_v16 = vor.u32 %v6300_v7, %v5764_v32 }
 0x1b9   : > { %3834 = vmatpush.bf16.msra.mxu2 %v4645_v23  ;;  %v5653_v23 = vor.u32 %v6272_v58, %v5652_v11  ;;  %v5064_v11 = vld [vmem:[%s6610_s6 + $0x788] sm:$0xf]  ;;  %v6125_v58 = vld [vmem:[%s6610_s6 + $0x7a0] sm:$0xf0] }
 0x1ba   : > { %3847 = vmatpush.bf16.msra.mxu3 %v4869_v28  ;;  %v6209_v28 = vld [vmem:[%s6610_s6 + $0xa40] sm:$0xf0]  ;;  %v5065_v24 = vor.u32 %v6125_v58, %v5064_v11 }
 0x1bb   : > { %3809 = vmatpush.bf16.msra.mxu0 %v4169_v40  ;;  %v5401_v37 = vor.u32 %v6209_v28, %v5400_v25  ;;  %v5148_v40 = vld [vmem:[%s6610_s6 + $0x830] sm:$0xf] }
 0x1bc   : > { %3822 = vmatpush.bf16.msra.mxu1 %v4393_v48  ;;  %v6202_v48 = vld [vmem:[%s6610_s6 + $0xa08] sm:$0xf0]  ;;  %v5149_v51 = vor.u32 %v6146_v12, %v5148_v40  ;;  %v5708_v12 = vld [vmem:[%s6610_s6 + $0xc90] sm:$0xf] }
 0x1bd   : > { %3835 = vmatpush.bf16.msra.mxu2 %v4617_v18  ;;  %v5596_v18 = vld [vmem:[%s6610_s6 + $0xbb0] sm:$0xf]  ;;  %v6230_v40 = vld [vmem:[%s6610_s6 + $0xae8] sm:$0xf0] }
 0x1be   : > { %3848 = vmatpush.bf16.msra.mxu3 %v4841_v52  ;;  %v5597_v52 = vor.u32 %v6258_v49, %v5596_v18  ;;  %v5037_v18 = vor.u32 %v6118_v30, %v5036_v29 }
 0x1bf   : > { %3810 = vmatpush.bf16.msra.mxu0 %v4141_v57  ;;  %v6251_v57 = vld [vmem:[%s6610_s6 + $0xb90] sm:$0xf0] }
 0x1c0   : > { %3823 = vmatpush.bf16.msra.mxu1 %v4365_v33 }
 0x1c1   : > { %3836 = vmatpush.bf16.msra.mxu2 %v4589_v61 }
 0x1c2   : > { %3849 = vmatpush.bf16.msra.mxu3 %v4813_v0 }
 0x1c3   : > { %3811 = vmatpush.bf16.msra.mxu0 %v4113_v9  ;;  %v7641_v33 = vpop.f32.mrf.mxu0  ;;  %v5317_v9 = vor.u32 %v6188_v1, %v5316_v63 }
 0x1c4   : > { %3824 = vmatpush.bf16.msra.mxu1 %v4337_v14  ;;  %v7646_v0 = vpop.f32.mrf.mxu1  ;;  %v5288_v14 = vld [vmem:[%s6610_s6 + $0x948] sm:$0xf] }
 0x1c5   : > { %3837 = vmatpush.bf16.msra.mxu2 %v4561_v15 }
 0x1c6   : > { %3850 = vmatpush.bf16.msra.mxu3 %v4785_v19  ;;  %3812 = vmatmul.bf16.vlgmr.msra.gmra.mxu0 %v6729_v20  ;;  %v5568_v20 = vld [vmem:[%s6610_s6 + $0xb78] sm:$0xf]  ;;  %v5512_v19 = vld [vmem:[%s6610_s6 + $0xb08] sm:$0xf] }
 0x1c7   : > { %3856 = vmatpush.bf16.msrb.mxu0 %v5205_v5  ;;  %3825 = vmatmul.bf16.vlgmr.msra.gmra.mxu1 %v6732_v21  ;;  %v5121_v21 = vor.u32 %v6139_v54, %v5120_v26  ;;  %v5569_v62 = vor.u32 %v6251_v57, %v5568_v20  ;;  %v6237_v5 = vld [vmem:[%s6610_s6 + $0xb20] sm:$0xf0]  ;;  %v6167_v54 = vld [vmem:[%s6610_s6 + $0x8f0] sm:$0xf0]  ;;  %v5680_v20 = vld [vmem:[%s6610_s6 + $0xc58] sm:$0xf] }
 0x1c8   : > { %3869 = vmatpush.bf16.msrb.mxu1 %v5429_v22  ;;  %3838 = vmatmul.bf16.vlgmr.msra.gmra.mxu2 %v6713_v4  ;;  %v5373_v4 = vor.u32 %v6202_v48, %v5372_v43  ;;  %v5513_v28 = vor.u32 %v6237_v5, %v5512_v19  ;;  %v6286_v43 = vld [vmem:[%s6610_s6 + $0xca8] sm:$0xf0]  ;;  %v6279_v57 = vld [vmem:[%s6610_s6 + $0xc70] sm:$0xf0] }
 0x1c9   : > { %3882 = vmatpush.bf16.msrb.mxu2 %v5653_v23  ;;  %3851 = vmatmul.bf16.vlgmr.msra.gmra.mxu3 %v6718_v6  ;;  %v5344_v6 = vld [vmem:[%s6610_s6 + $0x9b8] sm:$0xf]  ;;  %v5736_v23 = vld [vmem:[%s6610_s6 + $0xcc8] sm:$0xf]  ;;  %v5709_v26 = vor.u32 %v6286_v43, %v5708_v12 }
 0x1ca   : > { %3895 = vmatpush.bf16.msrb.mxu3 %v5877_v27  ;;  %v5345_v61 = vor.u32 %v6195_v13, %v5344_v6  ;;  %v5289_v27 = vor.u32 %v6181_v17, %v5288_v14  ;;  %v5456_v6 = vld [vmem:[%s6610_s6 + $0xa98] sm:$0xf] }
 0x1cb   : > { %3857 = vmatpush.bf16.msrb.mxu0 %v5177_v36  ;;  %v3631_v15 = vpop.f32.mrf.mxu2  ;;  %v3607_v25 = vpop.f32.mrf.mxu0  ;;  %v5737_v36 = vor.u32 %v6293_v46, %v5736_v23 }
 0x1cc   : > { %3870 = vmatpush.bf16.msrb.mxu1 %v5401_v37  ;;  %v3644_v22 = vpop.f32.mrf.mxu3  ;;  %v3620_v35 = vpop.f32.mrf.mxu1  ;;  %v6174_v37 = vld [vmem:[%s6610_s6 + $0x928] sm:$0xf0] }
 0x1cd   : > { %3883 = vmatpush.bf16.msrb.mxu2 %v5625_v10  ;;  %v5484_v10 = vld [vmem:[%s6610_s6 + $0xad0] sm:$0xf]  ;;  %v5261_v49 = vor.u32 %v6174_v37, %v5260_v34 }
 0x1ce   : > { %3896 = vmatpush.bf16.msrb.mxu3 %v5849_v45  ;;  %v7670_v45 = vld [vmem:[%s6616_s9] sm:$0xff]  ;;  %v5485_v47 = vor.u32 %v6230_v40, %v5484_v10 }
 0x1cf   : > { %3858 = vmatpush.bf16.msrb.mxu0 %v5149_v51  ;;  %v838_v48 = vperm.slane %v7670_v45, 4  ;;  %v6111_v51 = vld [vmem:[%s6610_s6 + $0x730] sm:$0xf0] }
 0x1d0   : > { %3871 = vmatpush.bf16.msrb.mxu1 %v5373_v4  ;;  %v5232_v4 = vld [vmem:[%s6610_s6 + $0x8d8] sm:$0xf]  ;;  %v5009_v60 = vor.u32 %v6111_v51, %v5008_v50 }
 0x1d1   : > { %3884 = vmatpush.bf16.msrb.mxu2 %v5597_v52  ;;  %v3606_v59 = vadd.f32 %v7641_v33, %v838_v48 }
 0x1d2   : > { %3897 = vmatpush.bf16.msrb.mxu3 %v5821_v55  ;;  %v6223_v55 = vld [vmem:[%s6610_s6 + $0xab0] sm:$0xf0] }
 0x1d3   : > { %3859 = vmatpush.bf16.msrb.mxu0 %v5121_v21  ;;  %v3633_v52 = vpop.f32.mrf.mxu2  ;;  %v5233_v21 = vor.u32 %v6167_v54, %v5232_v4  ;;  %v3619_v53 = vadd.f32 %v7646_v0, %v3606_v59 }
 0x1d4   : > { %3872 = vmatpush.bf16.msrb.mxu1 %v5345_v61  ;;  %v3646_v13 = vpop.f32.mrf.mxu3  ;;  %v5457_v61 = vor.u32 %v6223_v55, %v5456_v6 }
 0x1d5   : > { %3885 = vmatpush.bf16.msrb.mxu2 %v5569_v62  ;;  %v5681_v62 = vor.u32 %v6279_v57, %v5680_v20  ;;  %v3632_v56 = vadd.f32 %v3631_v15, %v3619_v53  ;;  %v839_v15 = vperm.slane %v7670_v45, 5 }
 0x1d6   : > { %3898 = vmatpush.bf16.msrb.mxu3 %v5793_v31 }
 0x1d7   : > { %3860 = vmatpush.bf16.msrb.mxu0 %v5093_v8  ;;  %v3645_v33 = vadd.f32 %v3644_v22, %v3632_v56 }
 0x1d8   : > { %3873 = vmatpush.bf16.msrb.mxu1 %v5317_v9 }
 0x1d9   : > { %3886 = vmatpush.bf16.msrb.mxu2 %v5541_v39 }
 0x1da   : > { %3899 = vmatpush.bf16.msrb.mxu3 %v5765_v16 }
 0x1db   : > { %3861 = vmatpush.bf16.msrb.mxu0 %v5065_v24 }
 0x1dc   : > { %3874 = vmatpush.bf16.msrb.mxu1 %v5289_v27 }
 0x1dd   : > { %3887 = vmatpush.bf16.msrb.mxu2 %v5513_v28 }
 0x1de   : > { %3900 = vmatpush.bf16.msrb.mxu3 %v5737_v36 }
 0x1df   : > { %3862 = vmatpush.bf16.msrb.mxu0 %v5037_v18 }
 0x1e0   : > { %3875 = vmatpush.bf16.msrb.mxu1 %v5261_v49 }
 0x1e1   : > { %3888 = vmatpush.bf16.msrb.mxu2 %v5485_v47  ;;  %v840_v47 = vperm.slane %v7670_v45, 6 }
 0x1e2   : > { %3901 = vmatpush.bf16.msrb.mxu3 %v5709_v26 }
 0x1e3   : > { %3863 = vmatpush.bf16.msrb.mxu0 %v5009_v60  ;;  %v3657_v63 = vpop.f32.mrf.mxu0 }
 0x1e4   : > { %3876 = vmatpush.bf16.msrb.mxu1 %v5233_v21  ;;  %v3658_v31 = vadd.f32 %v3657_v63, %v3645_v33  ;;  %v3670_v1 = vpop.f32.mrf.mxu1 }
 0x1e5   : > { %3889 = vmatpush.bf16.msrb.mxu2 %v5457_v61 }
 0x1e6   : > { %3902 = vmatpush.bf16.msrb.mxu3 %v5681_v62  ;;  %3864 = vmatmul.bf16.vlgmr.msrb.gmra.mxu0 %v6792_v41  ;;  %v3671_v2 = vadd.f32 %v3670_v1, %v3658_v31 }
 0x1e7   : > { %3877 = vmatmul.bf16.vlgmr.msrb.gmra.mxu1 %v6796_v44 }
 0x1e8   : > { %3890 = vmatmul.bf16.vlgmr.msrb.gmra.mxu2 %v6788_v38 }
 0x1e9   : > { %3903 = vmatmul.bf16.vlgmr.msrb.gmra.mxu3 %v6794_v42 }
 0x1eb   : > { %v3683_v0 = vpop.f32.mrf.mxu2  ;;  %v3659_v8 = vpop.f32.mrf.mxu0 }
 0x1ec   : > { %v3684_v3 = vadd.f32 %v3683_v0, %v3671_v2  ;;  %v3696_v32 = vpop.f32.mrf.mxu3  ;;  %v3672_v9 = vpop.f32.mrf.mxu1 }
 0x1ee   : > { %v3697_v7 = vadd.f32 %v3696_v32, %v3684_v3 }
 0x1f0   : > { %3912 = vst [vmem:[%s7133_s28 + $0x20] sm:$0xff] %v3697_v7 }
 0x1f3   : > { %v3685_v41 = vpop.f32.mrf.mxu2 }
 0x1f4   : > { %v3698_v39 = vpop.f32.mrf.mxu3 }
 0x203   : > { %v3709_v11 = vpop.f32.mrf.mxu0 }
 0x204   : > { %v3722_v44 = vpop.f32.mrf.mxu1  ;;  %v3710_v19 = vadd.f32 %v3709_v11, %v839_v15 }
 0x206   : > { %v3723_v5 = vadd.f32 %v3722_v44, %v3710_v19 }
 0x20b   : > { %v3735_v58 = vpop.f32.mrf.mxu2  ;;  %v3711_v14 = vpop.f32.mrf.mxu0 }
 0x20c   : > { %v3748_v38 = vpop.f32.mrf.mxu3  ;;  %v3724_v42 = vpop.f32.mrf.mxu1  ;;  %v3736_v22 = vadd.f32 %v3735_v58, %v3723_v5 }
 0x20e   : > { %v3749_v23 = vadd.f32 %v3748_v38, %v3736_v22 }
 0x213   : > { %v3737_v16 = vpop.f32.mrf.mxu2 }
 0x214   : > { %v3750_v17 = vpop.f32.mrf.mxu3 }
 0x223   : > { %v3761_v46 = vpop.f32.mrf.mxu0 }
 0x224   : > { %v3762_v24 = vadd.f32 %v3761_v46, %v3749_v23  ;;  %v3774_v25 = vpop.f32.mrf.mxu1 }
 0x226   : > { %v3775_v27 = vadd.f32 %v3774_v25, %v3762_v24 }
 0x22b   : > { %v3787_v28 = vpop.f32.mrf.mxu2  ;;  %v3763_v35 = vpop.f32.mrf.mxu0 }
 0x22c   : > { %v3788_v29 = vadd.f32 %v3787_v28, %v3775_v27  ;;  %v3800_v30 = vpop.f32.mrf.mxu3  ;;  %v3776_v36 = vpop.f32.mrf.mxu1 }
 0x22e   : > { %v3801_v34 = vadd.f32 %v3800_v30, %v3788_v29 }
 0x230   : > { %3913 = vst [vmem:[%s7133_s28 + $0x28] sm:$0xff] %v3801_v34 }
 0x233   : > { %v3789_v37 = vpop.f32.mrf.mxu2 }
 0x234   : > { %v3802_v10 = vpop.f32.mrf.mxu3 }
 0x243   : > { %v3813_v40 = vpop.f32.mrf.mxu0 }
 0x244   : > { %v3826_v12 = vpop.f32.mrf.mxu1  ;;  %v3814_v4 = vadd.f32 %v3813_v40, %v840_v47 }
 0x246   : > { %v3827_v52 = vadd.f32 %v3826_v12, %v3814_v4 }
 0x24b   : > { %v3839_v43 = vpop.f32.mrf.mxu2  ;;  %v3815_v18 = vpop.f32.mrf.mxu0 }
 0x24c   : > { %v3852_v48 = vpop.f32.mrf.mxu3  ;;  %v3828_v49 = vpop.f32.mrf.mxu1  ;;  %v3840_v26 = vadd.f32 %v3839_v43, %v3827_v52 }
 0x24e   : > { %v3853_v54 = vadd.f32 %v3852_v48, %v3840_v26 }
 0x253   : > { %v3841_v50 = vpop.f32.mrf.mxu2 }
 0x254   : > { %v3854_v51 = vpop.f32.mrf.mxu3 }
 0x263   : > { %v3865_v6 = vpop.f32.mrf.mxu0 }
 0x264   : > { %v3878_v55 = vpop.f32.mrf.mxu1  ;;  %v3866_v13 = vadd.f32 %v3865_v6, %v3853_v54 }
 0x266   : > { %v3879_v20 = vadd.f32 %v3878_v55, %v3866_v13 }
 0x26b   : > { %v3891_v57 = vpop.f32.mrf.mxu2  ;;  %v3867_v21 = vpop.f32.mrf.mxu0 }
 0x26c   : > { %v3892_v59 = vadd.f32 %v3891_v57, %v3879_v20  ;;  %v3904_v60 = vpop.f32.mrf.mxu3  ;;  %v3880_v61 = vpop.f32.mrf.mxu1 }
 0x26e   : > { %v3905_v62 = vadd.f32 %v3904_v60, %v3892_v59 }
 0x270   : > { %3914 = vst [vmem:[%s7133_s28 + $0x30] sm:$0xff] %v3905_v62 }
 0x273   : > { %v3893_v53 = vpop.f32.mrf.mxu2 }
 0x274   : > { %v3906_v45 = vpop.f32.mrf.mxu3 }
 0x275 PF: > { %s19_s17 = sadd.s32 1, %s6512_s17   ;;  %s7717_s12 = smov %s6496_s13 }
 0x276   : > { %p16_p0 = scmp.ge.s32.totalorder %s19_s17, 9   ;;  %s7718_s13 = smov %s6500_s14 }
 0x277   : > { %s7719_s14 = smov %s6582_s23  ;;  %s7720_s15 = smov %s6508_s16 }
 0x278   : > { %s7721_s16 = smov %s7723_s19  ;;  %18 = sbr.rel (!%p16_p0) target bundleno = 6 (0x6), region = 88 }
 0x27d   :  { %3953 = vsyncpa [#allocation3], 1 }
 0x27e   :  { %3955 = vsyncpa [#allocation3 + $0x1], 1 }
 0x27f   :  { %3956 = vsyncpa [#allocation5], 1 }
 0x280   :  { %3958 = vsyncpa [#allocation5 + $0x1], 1 }

// kernel: generator_forward.6
= control target key start
LH: loop header
LB: loop body
LE: loop exit
PB: predicated region body
PF: predicated region fallthrough
CT: control target
= control target key end

     0   :  { %s857_s12 = smov 0   ;;  %s859_s13 = smov 0   ;;  %s1057_s0 = inlined_call_operand.vmem [shape: f32[4,104,512], index: 0, kind: input, shape index: {}]   ;;  %s1058_s1 = inlined_call_operand.vmem [shape: f32[4,512,128], index: 1, kind: input, shape index: {}]   ;;  %s1059_s2 = inlined_call_operand.vmem [shape: f32[4,1,128], index: 2, kind: input, shape index: {}]   ;;  %s1060_s3 = inlined_call_operand.vmem [shape: f32[4,104,128], index: 3, kind: output, shape index: {}]  }
   0x1   :  { %s861_s14 = smov 0  }
   0x2 LB: > { %s32_s15 = sadd.s32 1, %s831_s13  ;;  %p778_p0 = scmp.ge.s32.totalorder %s835_s14, 1  ;;  %s835_s14 = sphi %s861_s14, %s13_s14   ;;  %s831_s13 = sphi %s859_s13, %s1062_s13   ;;  %s827_s12 = sphi %s857_s12, %s1061_s12  }
   0x3   : > { %p34_p1 = scmp.ge.s32.totalorder %s32_s15, 4  ;;  %p196_p2 = scmp.lt.s32.totalorder %s835_s14, 5 }
   0x5   : > { %s1064_s15 = smov (%p34_p1, %s32_s15), 0  ;;  %p197_p3 = pnand %p778_p0, %p196_p2 }
   0x6   : > { %p247_p4 = scmp.lt.s32.totalorder (!%p197_p3), %s827_s12, 3 }
   0x7   : > { %200 = sbr.rel (%p197_p3) target bundleno = 281 (0x119), region = 32 }
   0xc   : > { %s1066_s12 = smov (!%p247_p4, %s827_s12), 3 }
   0xd   : > { %s785_s16 = sshll.u32 %s1066_s12, 9  ;;  %s786_s20 = smul.u32 416, %s1066_s12 }
   0xe   : > { %s881_s19 = scalar_lea.vmem %s1058_s1, %s785_s16  ;;  %s270_s23 = scalar_lea.vmem %s1059_s2, %s1066_s12 }
   0xf   : > { %v383_v0 = vld [vmem:[%s881_s19 + $0x178] sm:$0xff]  ;;  %v382_v2 = vld [vmem:[%s881_s19 + $0x170] sm:$0xff]  ;;  %v381_v6 = vld [vmem:[%s881_s19 + $0x168] sm:$0xff]  ;;  %s949_s26 = scalar_lea.vmem %s1057_s0, %s786_s20  ;;  %s787_s29 = smul.u32 104, %s1066_s12 }
  0x10   : > { %v351_v1 = vld [vmem:[%s881_s19 + $0x78] sm:$0xff]  ;;  %516 = vmatpush.msra.mxu2 %v383_v0  ;;  %v350_v4 = vld [vmem:[%s881_s19 + $0x70] sm:$0xff]  ;;  %v349_v8 = vld [vmem:[%s881_s19 + $0x68] sm:$0xff] }
  0x11   : > { %404 = vmatpush.msra.mxu0 %v351_v1  ;;  %v399_v3 = vld [vmem:[%s881_s19 + $0x1f8] sm:$0xff]  ;;  %v398_v7 = vld [vmem:[%s881_s19 + $0x1f0] sm:$0xff]  ;;  %v397_v10 = vld [vmem:[%s881_s19 + $0x1e8] sm:$0xff]  ;;  %s1021_s5 = scalar_lea.vmem %s1060_s3, %s787_s29 }
  0x12   : > { %v367_v5 = vld [vmem:[%s881_s19 + $0xf8] sm:$0xff]  ;;  %572 = vmatpush.msra.mxu3 %v399_v3  ;;  %517 = vmatpush.msra.mxu2 %v382_v2  ;;  %v366_v9 = vld [vmem:[%s881_s19 + $0xf0] sm:$0xff]  ;;  %v380_v11 = vld [vmem:[%s881_s19 + $0x160] sm:$0xff] }
  0x13   : > { %460 = vmatpush.msra.mxu1 %v367_v5  ;;  %405 = vmatpush.msra.mxu0 %v350_v4  ;;  %v348_v12 = vld [vmem:[%s881_s19 + $0x60] sm:$0xff]  ;;  %v365_v13 = vld [vmem:[%s881_s19 + $0xe8] sm:$0xff]  ;;  %v379_v16 = vld [vmem:[%s881_s19 + $0x158] sm:$0xff] }
  0x14   : > { %573 = vmatpush.msra.mxu3 %v398_v7  ;;  %518 = vmatpush.msra.mxu2 %v381_v6  ;;  %v396_v14 = vld [vmem:[%s881_s19 + $0x1e0] sm:$0xff]  ;;  %v347_v17 = vld [vmem:[%s881_s19 + $0x58] sm:$0xff]  ;;  %v378_v20 = vld [vmem:[%s881_s19 + $0x150] sm:$0xff] }
  0x15   : > { %461 = vmatpush.msra.mxu1 %v366_v9  ;;  %406 = vmatpush.msra.mxu0 %v349_v8  ;;  %v364_v15 = vld [vmem:[%s881_s19 + $0xe0] sm:$0xff]  ;;  %v395_v18 = vld [vmem:[%s881_s19 + $0x1d8] sm:$0xff]  ;;  %v346_v21 = vld [vmem:[%s881_s19 + $0x50] sm:$0xff] }
  0x16   : > { %574 = vmatpush.msra.mxu3 %v397_v10  ;;  %519 = vmatpush.msra.mxu2 %v380_v11  ;;  %v363_v19 = vld [vmem:[%s881_s19 + $0xd8] sm:$0xff]  ;;  %v394_v22 = vld [vmem:[%s881_s19 + $0x1d0] sm:$0xff]  ;;  %v377_v24 = vld [vmem:[%s881_s19 + $0x148] sm:$0xff] }
  0x17   : > { %462 = vmatpush.msra.mxu1 %v365_v13  ;;  %407 = vmatpush.msra.mxu0 %v348_v12  ;;  %v362_v23 = vld [vmem:[%s881_s19 + $0xd0] sm:$0xff]  ;;  %v345_v25 = vld [vmem:[%s881_s19 + $0x48] sm:$0xff]  ;;  %v376_v28 = vld [vmem:[%s881_s19 + $0x140] sm:$0xff] }
  0x18   : > { %575 = vmatpush.msra.mxu3 %v396_v14  ;;  %520 = vmatpush.msra.mxu2 %v379_v16  ;;  %v393_v26 = vld [vmem:[%s881_s19 + $0x1c8] sm:$0xff]  ;;  %v344_v29 = vld [vmem:[%s881_s19 + $0x40] sm:$0xff]  ;;  %v375_v32 = vld [vmem:[%s881_s19 + $0x138] sm:$0xff] }
  0x19   : > { %463 = vmatpush.msra.mxu1 %v364_v15  ;;  %408 = vmatpush.msra.mxu0 %v347_v17  ;;  %v361_v27 = vld [vmem:[%s881_s19 + $0xc8] sm:$0xff]  ;;  %v392_v30 = vld [vmem:[%s881_s19 + $0x1c0] sm:$0xff]  ;;  %v343_v33 = vld [vmem:[%s881_s19 + $0x38] sm:$0xff] }
  0x1a   : > { %576 = vmatpush.msra.mxu3 %v395_v18  ;;  %521 = vmatpush.msra.mxu2 %v378_v20  ;;  %v360_v31 = vld [vmem:[%s881_s19 + $0xc0] sm:$0xff]  ;;  %v391_v34 = vld [vmem:[%s881_s19 + $0x1b8] sm:$0xff]  ;;  %v374_v36 = vld [vmem:[%s881_s19 + $0x130] sm:$0xff] }
  0x1b   : > { %464 = vmatpush.msra.mxu1 %v363_v19  ;;  %409 = vmatpush.msra.mxu0 %v346_v21  ;;  %v359_v35 = vld [vmem:[%s881_s19 + $0xb8] sm:$0xff]  ;;  %v342_v37 = vld [vmem:[%s881_s19 + $0x30] sm:$0xff]  ;;  %v373_v40 = vld [vmem:[%s881_s19 + $0x128] sm:$0xff] }
  0x1c   : > { %577 = vmatpush.msra.mxu3 %v394_v22  ;;  %522 = vmatpush.msra.mxu2 %v377_v24  ;;  %v390_v38 = vld [vmem:[%s881_s19 + $0x1b0] sm:$0xff]  ;;  %v341_v41 = vld [vmem:[%s881_s19 + $0x28] sm:$0xff]  ;;  %v372_v44 = vld [vmem:[%s881_s19 + $0x120] sm:$0xff] }
  0x1d   : > { %465 = vmatpush.msra.mxu1 %v362_v23  ;;  %410 = vmatpush.msra.mxu0 %v345_v25  ;;  %v358_v39 = vld [vmem:[%s881_s19 + $0xb0] sm:$0xff]  ;;  %v389_v42 = vld [vmem:[%s881_s19 + $0x1a8] sm:$0xff]  ;;  %v340_v45 = vld [vmem:[%s881_s19 + $0x20] sm:$0xff] }
  0x1e   : > { %578 = vmatpush.msra.mxu3 %v393_v26  ;;  %523 = vmatpush.msra.mxu2 %v376_v28  ;;  %v357_v43 = vld [vmem:[%s881_s19 + $0xa8] sm:$0xff]  ;;  %v388_v46 = vld [vmem:[%s881_s19 + $0x1a0] sm:$0xff]  ;;  %v371_v48 = vld [vmem:[%s881_s19 + $0x118] sm:$0xff] }
  0x1f   : > { %466 = vmatpush.msra.mxu1 %v361_v27  ;;  %411 = vmatpush.msra.mxu0 %v344_v29  ;;  %v356_v47 = vld [vmem:[%s881_s19 + $0xa0] sm:$0xff]  ;;  %v339_v49 = vld [vmem:[%s881_s19 + $0x18] sm:$0xff]  ;;  %v370_v52 = vld [vmem:[%s881_s19 + $0x110] sm:$0xff] }
  0x20   : > { %579 = vmatpush.msra.mxu3 %v392_v30  ;;  %524 = vmatpush.msra.mxu2 %v375_v32  ;;  %v387_v50 = vld [vmem:[%s881_s19 + $0x198] sm:$0xff]  ;;  %v338_v53 = vld [vmem:[%s881_s19 + $0x10] sm:$0xff]  ;;  %v369_v56 = vld [vmem:[%s881_s19 + $0x108] sm:$0xff] }
  0x21   : > { %467 = vmatpush.msra.mxu1 %v360_v31  ;;  %412 = vmatpush.msra.mxu0 %v343_v33  ;;  %v355_v51 = vld [vmem:[%s881_s19 + $0x98] sm:$0xff]  ;;  %v386_v54 = vld [vmem:[%s881_s19 + $0x190] sm:$0xff]  ;;  %v337_v57 = vld [vmem:[%s881_s19 + $0x8] sm:$0xff] }
  0x22   : > { %580 = vmatpush.msra.mxu3 %v391_v34  ;;  %525 = vmatpush.msra.mxu2 %v374_v36  ;;  %v354_v55 = vld [vmem:[%s881_s19 + $0x90] sm:$0xff]  ;;  %v385_v58 = vld [vmem:[%s881_s19 + $0x188] sm:$0xff]  ;;  %v368_v60 = vld [vmem:[%s881_s19 + $0x100] sm:$0xff] }
  0x23   : > { %468 = vmatpush.msra.mxu1 %v359_v35  ;;  %413 = vmatpush.msra.mxu0 %v342_v37  ;;  %v353_v59 = vld [vmem:[%s881_s19 + $0x88] sm:$0xff]  ;;  %v336_v61 = vld [vmem:[%s881_s19] sm:$0xff]  ;;  %v286_v62 = vld [vmem:[%s949_s26 + $0x10] sm:$0xff] }
  0x24   : > { %581 = vmatpush.msra.mxu3 %v390_v38  ;;  %526 = vmatpush.msra.mxu2 %v373_v40  ;;  %v384_v63 = vld [vmem:[%s881_s19 + $0x180] sm:$0xff]  ;;  %v287_v1 = vld [vmem:[%s949_s26 + $0x18] sm:$0xff]  ;;  %v285_v3 = vld [vmem:[%s949_s26 + $0x8] sm:$0xff] }
  0x25   : > { %469 = vmatpush.msra.mxu1 %v358_v39  ;;  %414 = vmatpush.msra.mxu0 %v341_v41  ;;  %v284_v0 = vld [vmem:[%s949_s26] sm:$0xff]  ;;  %v290_v4 = vld [vmem:[%s949_s26 + $0x30] sm:$0xff]  ;;  %v291_v6 = vld [vmem:[%s949_s26 + $0x38] sm:$0xff] }
  0x26   : > { %582 = vmatpush.msra.mxu3 %v389_v42  ;;  %527 = vmatpush.msra.mxu2 %v372_v44  ;;  %v352_v2 = vld [vmem:[%s881_s19 + $0x80] sm:$0xff]  ;;  %v289_v7 = vld [vmem:[%s949_s26 + $0x28] sm:$0xff]  ;;  %v294_v8 = vld [vmem:[%s949_s26 + $0x50] sm:$0xff] }
  0x27   : > { %470 = vmatpush.msra.mxu1 %v357_v43  ;;  %415 = vmatpush.msra.mxu0 %v340_v45  ;;  %v288_v5 = vld [vmem:[%s949_s26 + $0x20] sm:$0xff]  ;;  %v295_v10 = vld [vmem:[%s949_s26 + $0x58] sm:$0xff]  ;;  %v293_v11 = vld [vmem:[%s949_s26 + $0x48] sm:$0xff] }
  0x28   : > { %583 = vmatpush.msra.mxu3 %v388_v46  ;;  %528 = vmatpush.msra.mxu2 %v371_v48  ;;  %v292_v9 = vld [vmem:[%s949_s26 + $0x40] sm:$0xff]  ;;  %v298_v12 = vld [vmem:[%s949_s26 + $0x70] sm:$0xff]  ;;  %v299_v14 = vld [vmem:[%s949_s26 + $0x78] sm:$0xff] }
  0x29   : > { %471 = vmatpush.msra.mxu1 %v356_v47  ;;  %416 = vmatpush.msra.mxu0 %v339_v49  ;;  %v296_v13 = vld [vmem:[%s949_s26 + $0x60] sm:$0xff]  ;;  %v297_v15 = vld [vmem:[%s949_s26 + $0x68] sm:$0xff]  ;;  %v302_v16 = vld [vmem:[%s949_s26 + $0x90] sm:$0xff] }
  0x2a   : > { %584 = vmatpush.msra.mxu3 %v387_v50  ;;  %529 = vmatpush.msra.mxu2 %v370_v52  ;;  %v300_v17 = vld [vmem:[%s949_s26 + $0x80] sm:$0xff]  ;;  %v303_v18 = vld [vmem:[%s949_s26 + $0x98] sm:$0xff]  ;;  %v301_v19 = vld [vmem:[%s949_s26 + $0x88] sm:$0xff] }
  0x2b   : > { %472 = vmatpush.msra.mxu1 %v355_v51  ;;  %417 = vmatpush.msra.mxu0 %v338_v53  ;;  %v306_v20 = vld [vmem:[%s949_s26 + $0xb0] sm:$0xff]  ;;  %v304_v21 = vld [vmem:[%s949_s26 + $0xa0] sm:$0xff]  ;;  %v307_v22 = vld [vmem:[%s949_s26 + $0xb8] sm:$0xff] }
  0x2c   : > { %585 = vmatpush.msra.mxu3 %v386_v54  ;;  %530 = vmatpush.msra.mxu2 %v369_v56  ;;  %v305_v23 = vld [vmem:[%s949_s26 + $0xa8] sm:$0xff]  ;;  %v310_v24 = vld [vmem:[%s949_s26 + $0xd0] sm:$0xff]  ;;  %v308_v25 = vld [vmem:[%s949_s26 + $0xc0] sm:$0xff] }
  0x2d   : > { %473 = vmatpush.msra.mxu1 %v354_v55  ;;  %418 = vmatpush.msra.mxu0 %v337_v57  ;;  %v311_v26 = vld [vmem:[%s949_s26 + $0xd8] sm:$0xff]  ;;  %v309_v27 = vld [vmem:[%s949_s26 + $0xc8] sm:$0xff]  ;;  %v314_v28 = vld [vmem:[%s949_s26 + $0xf0] sm:$0xff] }
  0x2e   : > { %586 = vmatpush.msra.mxu3 %v385_v58  ;;  %531 = vmatpush.msra.mxu2 %v368_v60  ;;  %v312_v29 = vld [vmem:[%s949_s26 + $0xe0] sm:$0xff]  ;;  %v315_v30 = vld [vmem:[%s949_s26 + $0xf8] sm:$0xff]  ;;  %v313_v31 = vld [vmem:[%s949_s26 + $0xe8] sm:$0xff] }
  0x2f   : > { %474 = vmatpush.msra.mxu1 %v353_v59  ;;  %419 = vmatpush.msra.mxu0 %v336_v61  ;;  %v318_v32 = vld [vmem:[%s949_s26 + $0x110] sm:$0xff]  ;;  %v316_v33 = vld [vmem:[%s949_s26 + $0x100] sm:$0xff]  ;;  %v319_v34 = vld [vmem:[%s949_s26 + $0x118] sm:$0xff] }
  0x30   : > { %532 = vmatmul.f32.vlgmr.msra.gmra.mxu2 %v286_v62  ;;  %587 = vmatpush.msra.mxu3 %v384_v63  ;;  %v317_v35 = vld [vmem:[%s949_s26 + $0x108] sm:$0xff]  ;;  %v322_v36 = vld [vmem:[%s949_s26 + $0x130] sm:$0xff]  ;;  %v320_v37 = vld [vmem:[%s949_s26 + $0x120] sm:$0xff] }
  0x31   : > { %420 = vmatmul.f32.vlgmr.msra.gmra.mxu0 %v284_v0  ;;  %588 = vmatmul.f32.vlgmr.msra.gmra.mxu3 %v287_v1  ;;  %v323_v38 = vld [vmem:[%s949_s26 + $0x138] sm:$0xff]  ;;  %v321_v39 = vld [vmem:[%s949_s26 + $0x128] sm:$0xff]  ;;  %v326_v40 = vld [vmem:[%s949_s26 + $0x150] sm:$0xff] }
  0x32   : > { %475 = vmatpush.msra.mxu1 %v352_v2  ;;  %v324_v41 = vld [vmem:[%s949_s26 + $0x140] sm:$0xff]  ;;  %v327_v42 = vld [vmem:[%s949_s26 + $0x158] sm:$0xff]  ;;  %v325_v43 = vld [vmem:[%s949_s26 + $0x148] sm:$0xff] }
  0x33   : > { %476 = vmatmul.f32.vlgmr.msra.gmra.mxu1 %v285_v3  ;;  %v330_v44 = vld [vmem:[%s949_s26 + $0x170] sm:$0xff]  ;;  %v328_v45 = vld [vmem:[%s949_s26 + $0x160] sm:$0xff]  ;;  %v331_v46 = vld [vmem:[%s949_s26 + $0x178] sm:$0xff] }
  0x34   : > { %v329_v47 = vld [vmem:[%s949_s26 + $0x168] sm:$0xff]  ;;  %v334_v48 = vld [vmem:[%s949_s26 + $0x190] sm:$0xff]  ;;  %v332_v49 = vld [vmem:[%s949_s26 + $0x180] sm:$0xff] }
  0x35   : > { %v335_v50 = vld [vmem:[%s949_s26 + $0x198] sm:$0xff]  ;;  %v333_v51 = vld [vmem:[%s949_s26 + $0x188] sm:$0xff]  ;;  %v1014_v52 = vld [vmem:[%s270_s23] ss:$0 sm:$0xff] }
  0x38   : > { %535 = vmatmul.f32.gmra.mxu2 %v290_v4 }
  0x39   : > { %423 = vmatmul.f32.gmra.mxu0 %v288_v5  ;;  %591 = vmatmul.f32.gmra.mxu3 %v291_v6 }
  0x3b   : > { %479 = vmatmul.f32.gmra.mxu1 %v289_v7 }
  0x40   : > { %538 = vmatmul.f32.gmra.mxu2 %v294_v8 }
  0x41   : > { %426 = vmatmul.f32.gmra.mxu0 %v292_v9  ;;  %594 = vmatmul.f32.gmra.mxu3 %v295_v10 }
  0x43   : > { %482 = vmatmul.f32.gmra.mxu1 %v293_v11 }
  0x48   : > { %541 = vmatmul.f32.gmra.mxu2 %v298_v12 }
  0x49   : > { %429 = vmatmul.f32.gmra.mxu0 %v296_v13  ;;  %597 = vmatmul.f32.gmra.mxu3 %v299_v14 }
  0x4b   : > { %485 = vmatmul.f32.gmra.mxu1 %v297_v15 }
  0x50   : > { %544 = vmatmul.f32.gmra.mxu2 %v302_v16 }
  0x51   : > { %432 = vmatmul.f32.gmra.mxu0 %v300_v17  ;;  %600 = vmatmul.f32.gmra.mxu3 %v303_v18 }
  0x53   : > { %488 = vmatmul.f32.gmra.mxu1 %v301_v19 }
  0x58   : > { %547 = vmatmul.f32.gmra.mxu2 %v306_v20 }
  0x59   : > { %435 = vmatmul.f32.gmra.mxu0 %v304_v21  ;;  %603 = vmatmul.f32.gmra.mxu3 %v307_v22 }
  0x5b   : > { %491 = vmatmul.f32.gmra.mxu1 %v305_v23 }
  0x60   : > { %550 = vmatmul.f32.gmra.mxu2 %v310_v24 }
  0x61   : > { %438 = vmatmul.f32.gmra.mxu0 %v308_v25  ;;  %606 = vmatmul.f32.gmra.mxu3 %v311_v26 }
  0x63   : > { %494 = vmatmul.f32.gmra.mxu1 %v309_v27 }
  0x68   : > { %553 = vmatmul.f32.gmra.mxu2 %v314_v28 }
  0x69   : > { %441 = vmatmul.f32.gmra.mxu0 %v312_v29  ;;  %609 = vmatmul.f32.gmra.mxu3 %v315_v30 }
  0x6b   : > { %497 = vmatmul.f32.gmra.mxu1 %v313_v31 }
  0x70   : > { %556 = vmatmul.f32.gmra.mxu2 %v318_v32 }
  0x71   : > { %444 = vmatmul.f32.gmra.mxu0 %v316_v33  ;;  %612 = vmatmul.f32.gmra.mxu3 %v319_v34 }
  0x73   : > { %500 = vmatmul.f32.gmra.mxu1 %v317_v35 }
  0x78   : > { %559 = vmatmul.f32.gmra.mxu2 %v322_v36 }
  0x79   : > { %447 = vmatmul.f32.gmra.mxu0 %v320_v37  ;;  %615 = vmatmul.f32.gmra.mxu3 %v323_v38 }
  0x7b   : > { %503 = vmatmul.f32.gmra.mxu1 %v321_v39 }
  0x80   : > { %562 = vmatmul.f32.gmra.mxu2 %v326_v40 }
  0x81   : > { %450 = vmatmul.f32.gmra.mxu0 %v324_v41  ;;  %618 = vmatmul.f32.gmra.mxu3 %v327_v42 }
  0x83   : > { %506 = vmatmul.f32.gmra.mxu1 %v325_v43 }
  0x88   : > { %565 = vmatmul.f32.gmra.mxu2 %v330_v44 }
  0x89   : > { %453 = vmatmul.f32.gmra.mxu0 %v328_v45  ;;  %621 = vmatmul.f32.gmra.mxu3 %v331_v46 }
  0x8b   : > { %509 = vmatmul.f32.gmra.mxu1 %v329_v47 }
  0x90   : > { %568 = vmatmul.f32.gmra.mxu2 %v334_v48 }
  0x91   : > { %456 = vmatmul.f32.gmra.mxu0 %v332_v49  ;;  %624 = vmatmul.f32.gmra.mxu3 %v335_v50 }
  0x93   : > { %512 = vmatmul.f32.gmra.mxu1 %v333_v51 }
  0xae   : > { %v421_v53 = vpop.f32.mrf.mxu0 }
  0xaf   : > { %v422_v54 = vadd.f32 %v1014_v52, %v421_v53 }
  0xb0   : > { %v477_v55 = vpop.f32.mrf.mxu1 }
  0xb1   : > { %v478_v56 = vadd.f32 %v477_v55, %v422_v54 }
  0xb3   : > { %v533_v57 = vpop.f32.mrf.mxu2 }
  0xb4   : > { %v534_v58 = vadd.f32 %v533_v57, %v478_v56  ;;  %v589_v59 = vpop.f32.mrf.mxu3 }
  0xb6   : > { %v590_v60 = vadd.f32 %v589_v59, %v534_v58  ;;  %v424_v61 = vpop.f32.mrf.mxu0 }
  0xb7   : > { %v425_v62 = vadd.f32 %v1014_v52, %v424_v61 }
  0xb8   : > { %628 = vst [vmem:[%s1021_s5] sm:$0xff] %v590_v60  ;;  %v480_v63 = vpop.f32.mrf.mxu1 }
  0xb9   : > { %v481_v0 = vadd.f32 %v480_v63, %v425_v62 }
  0xbb   : > { %v536_v1 = vpop.f32.mrf.mxu2 }
  0xbc   : > { %v537_v2 = vadd.f32 %v536_v1, %v481_v0  ;;  %v592_v3 = vpop.f32.mrf.mxu3 }
  0xbe   : > { %v593_v4 = vadd.f32 %v592_v3, %v537_v2  ;;  %v427_v5 = vpop.f32.mrf.mxu0 }
  0xbf   : > { %v428_v6 = vadd.f32 %v1014_v52, %v427_v5 }
  0xc0   : > { %629 = vst [vmem:[%s1021_s5 + $0x8] sm:$0xff] %v593_v4  ;;  %v483_v7 = vpop.f32.mrf.mxu1 }
  0xc1   : > { %v484_v8 = vadd.f32 %v483_v7, %v428_v6 }
  0xc3   : > { %v539_v9 = vpop.f32.mrf.mxu2 }
  0xc4   : > { %v540_v10 = vadd.f32 %v539_v9, %v484_v8  ;;  %v595_v11 = vpop.f32.mrf.mxu3 }
  0xc6   : > { %v596_v12 = vadd.f32 %v595_v11, %v540_v10  ;;  %v430_v13 = vpop.f32.mrf.mxu0 }
  0xc7   : > { %v431_v14 = vadd.f32 %v1014_v52, %v430_v13 }
  0xc8   : > { %630 = vst [vmem:[%s1021_s5 + $0x10] sm:$0xff] %v596_v12  ;;  %v486_v15 = vpop.f32.mrf.mxu1 }
  0xc9   : > { %v487_v16 = vadd.f32 %v486_v15, %v431_v14 }
  0xcb   : > { %v542_v17 = vpop.f32.mrf.mxu2 }
  0xcc   : > { %v543_v18 = vadd.f32 %v542_v17, %v487_v16  ;;  %v598_v19 = vpop.f32.mrf.mxu3 }
  0xce   : > { %v599_v20 = vadd.f32 %v598_v19, %v543_v18  ;;  %v433_v21 = vpop.f32.mrf.mxu0 }
  0xcf   : > { %v434_v22 = vadd.f32 %v1014_v52, %v433_v21 }
  0xd0   : > { %631 = vst [vmem:[%s1021_s5 + $0x18] sm:$0xff] %v599_v20  ;;  %v489_v23 = vpop.f32.mrf.mxu1 }
  0xd1   : > { %v490_v24 = vadd.f32 %v489_v23, %v434_v22 }
  0xd3   : > { %v545_v25 = vpop.f32.mrf.mxu2 }
  0xd4   : > { %v546_v26 = vadd.f32 %v545_v25, %v490_v24  ;;  %v601_v27 = vpop.f32.mrf.mxu3 }
  0xd6   : > { %v602_v28 = vadd.f32 %v601_v27, %v546_v26  ;;  %v436_v29 = vpop.f32.mrf.mxu0 }
  0xd7   : > { %v437_v30 = vadd.f32 %v1014_v52, %v436_v29 }
  0xd8   : > { %632 = vst [vmem:[%s1021_s5 + $0x20] sm:$0xff] %v602_v28  ;;  %v492_v31 = vpop.f32.mrf.mxu1 }
  0xd9   : > { %v493_v32 = vadd.f32 %v492_v31, %v437_v30 }
  0xdb   : > { %v548_v33 = vpop.f32.mrf.mxu2 }
  0xdc   : > { %v549_v34 = vadd.f32 %v548_v33, %v493_v32  ;;  %v604_v35 = vpop.f32.mrf.mxu3 }
  0xde   : > { %v605_v36 = vadd.f32 %v604_v35, %v549_v34  ;;  %v439_v37 = vpop.f32.mrf.mxu0 }
  0xdf   : > { %v440_v38 = vadd.f32 %v1014_v52, %v439_v37 }
  0xe0   : > { %633 = vst [vmem:[%s1021_s5 + $0x28] sm:$0xff] %v605_v36  ;;  %v495_v39 = vpop.f32.mrf.mxu1 }
  0xe1   : > { %v496_v40 = vadd.f32 %v495_v39, %v440_v38 }
  0xe3   : > { %v551_v41 = vpop.f32.mrf.mxu2 }
  0xe4   : > { %v552_v42 = vadd.f32 %v551_v41, %v496_v40  ;;  %v607_v43 = vpop.f32.mrf.mxu3 }
  0xe6   : > { %v608_v44 = vadd.f32 %v607_v43, %v552_v42  ;;  %v442_v45 = vpop.f32.mrf.mxu0 }
  0xe7   : > { %v443_v46 = vadd.f32 %v1014_v52, %v442_v45 }
  0xe8   : > { %634 = vst [vmem:[%s1021_s5 + $0x30] sm:$0xff] %v608_v44  ;;  %v498_v47 = vpop.f32.mrf.mxu1 }
  0xe9   : > { %v499_v48 = vadd.f32 %v498_v47, %v443_v46 }
  0xeb   : > { %v554_v49 = vpop.f32.mrf.mxu2 }
  0xec   : > { %v555_v50 = vadd.f32 %v554_v49, %v499_v48  ;;  %v610_v51 = vpop.f32.mrf.mxu3 }
  0xee   : > { %v611_v53 = vadd.f32 %v610_v51, %v555_v50  ;;  %v445_v54 = vpop.f32.mrf.mxu0 }
  0xef   : > { %v446_v55 = vadd.f32 %v1014_v52, %v445_v54 }
  0xf0   : > { %635 = vst [vmem:[%s1021_s5 + $0x38] sm:$0xff] %v611_v53  ;;  %v501_v56 = vpop.f32.mrf.mxu1 }
  0xf1   : > { %v502_v57 = vadd.f32 %v501_v56, %v446_v55 }
  0xf3   : > { %v557_v58 = vpop.f32.mrf.mxu2 }
  0xf4   : > { %v558_v59 = vadd.f32 %v557_v58, %v502_v57  ;;  %v613_v60 = vpop.f32.mrf.mxu3 }
  0xf6   : > { %v614_v61 = vadd.f32 %v613_v60, %v558_v59  ;;  %v448_v62 = vpop.f32.mrf.mxu0 }
  0xf7   : > { %v449_v63 = vadd.f32 %v1014_v52, %v448_v62 }
  0xf8   : > { %636 = vst [vmem:[%s1021_s5 + $0x40] sm:$0xff] %v614_v61  ;;  %v504_v0 = vpop.f32.mrf.mxu1 }
  0xf9   : > { %v505_v1 = vadd.f32 %v504_v0, %v449_v63 }
  0xfb   : > { %v560_v2 = vpop.f32.mrf.mxu2 }
  0xfc   : > { %v561_v3 = vadd.f32 %v560_v2, %v505_v1  ;;  %v616_v4 = vpop.f32.mrf.mxu3 }
  0xfe   : > { %v617_v5 = vadd.f32 %v616_v4, %v561_v3  ;;  %v451_v6 = vpop.f32.mrf.mxu0 }
  0xff   : > { %v452_v7 = vadd.f32 %v1014_v52, %v451_v6 }
 0x100   : > { %637 = vst [vmem:[%s1021_s5 + $0x48] sm:$0xff] %v617_v5  ;;  %v507_v8 = vpop.f32.mrf.mxu1 }
 0x101   : > { %v508_v9 = vadd.f32 %v507_v8, %v452_v7 }
 0x103   : > { %v563_v10 = vpop.f32.mrf.mxu2 }
 0x104   : > { %v564_v11 = vadd.f32 %v563_v10, %v508_v9  ;;  %v619_v12 = vpop.f32.mrf.mxu3 }
 0x106   : > { %v620_v13 = vadd.f32 %v619_v12, %v564_v11  ;;  %v454_v14 = vpop.f32.mrf.mxu0 }
 0x107   : > { %v455_v15 = vadd.f32 %v1014_v52, %v454_v14 }
 0x108   : > { %638 = vst [vmem:[%s1021_s5 + $0x50] sm:$0xff] %v620_v13  ;;  %v510_v16 = vpop.f32.mrf.mxu1 }
 0x109   : > { %v511_v17 = vadd.f32 %v510_v16, %v455_v15 }
 0x10b   : > { %v566_v18 = vpop.f32.mrf.mxu2 }
 0x10c   : > { %v567_v19 = vadd.f32 %v566_v18, %v511_v17  ;;  %v622_v20 = vpop.f32.mrf.mxu3 }
 0x10e   : > { %v623_v21 = vadd.f32 %v622_v20, %v567_v19  ;;  %v457_v22 = vpop.f32.mrf.mxu0 }
 0x10f   : > { %v458_v23 = vadd.f32 %v1014_v52, %v457_v22 }
 0x110   : > { %639 = vst [vmem:[%s1021_s5 + $0x58] sm:$0xff] %v623_v21  ;;  %v513_v24 = vpop.f32.mrf.mxu1 }
 0x111   : > { %v514_v25 = vadd.f32 %v513_v24, %v458_v23 }
 0x113   : > { %v569_v26 = vpop.f32.mrf.mxu2 }
 0x114   : > { %v570_v27 = vadd.f32 %v569_v26, %v514_v25  ;;  %v625_v28 = vpop.f32.mrf.mxu3 }
 0x116   : > { %v626_v29 = vadd.f32 %v625_v28, %v570_v27 }
 0x118   : > { %640 = vst [vmem:[%s1021_s5 + $0x60] sm:$0xff] %v626_v29 }
 0x119 PF: > { %s13_s14 = sadd.s32 1, %s835_s14   ;;  %s1061_s12 = smov %s831_s13 }
 0x11a   : > { %p10_p5 = scmp.ge.s32.totalorder %s13_s14, 6   ;;  %s1062_s13 = smov %s1064_s15 }
 0x11c   :  { %12 = sbr.rel (!%p10_p5) target bundleno = 2 (0x2), region = 68 }

// kernel: generator_forward.7
= control target key start
LH: loop header
LB: loop body
LE: loop exit
PB: predicated region body
PF: predicated region fallthrough
CT: control target
= control target key end

     0   :  { %s1583_s12 = smov 0   ;;  %s1585_s13 = smov 0   ;;  %s1873_s0 = inlined_call_operand.vmem [shape: f32[4,392,256], index: 0, kind: input, shape index: {}]   ;;  %s1874_s1 = inlined_call_operand.vmem [shape: f32[4,256,128], index: 1, kind: input, shape index: {}]   ;;  %s1875_s2 = inlined_call_operand.vmem [shape: f32[4,1,128], index: 2, kind: input, shape index: {}]   ;;  %s1876_s3 = inlined_call_operand.vmem [shape: f32[4,392,128], index: 3, kind: output, shape index: {}]  }
   0x1   :  { %s1587_s14 = smov 0  }
   0x2 LB: > { %s32_s15 = sadd.s32 1, %s1557_s13  ;;  %p1275_p0 = scmp.ge.s32.totalorder %s1561_s14, 1  ;;  %s1561_s14 = sphi %s1587_s14, %s13_s14   ;;  %s1557_s13 = sphi %s1585_s13, %s1878_s13   ;;  %s1553_s12 = sphi %s1583_s12, %s1877_s12  }
   0x3   : > { %p34_p1 = scmp.ge.s32.totalorder %s32_s15, 4  ;;  %p196_p2 = scmp.lt.s32.totalorder %s1561_s14, 5 }
   0x5   : > { %s1880_s15 = smov (%p34_p1, %s32_s15), 0  ;;  %p197_p3 = pnand %p1275_p0, %p196_p2 }
   0x6   : > { %p247_p4 = scmp.lt.s32.totalorder (!%p197_p3), %s1553_s12, 3 }
   0x7   : > { %200 = sbr.rel (%p197_p3) target bundleno = 400 (0x190), region = 32 }
   0xc   : > { %s1882_s12 = smov (!%p247_p4, %s1553_s12), 3 }
   0xd   : > { %s1282_s16 = sshll.u32 %s1882_s12, 8  ;;  %s1315_s20 = smul.u32 784, %s1882_s12 }
   0xe   : > { %s1607_s19 = scalar_lea.vmem %s1874_s1, %s1282_s16  ;;  %s1655_s26 = scalar_lea.vmem %s1875_s2, %s1882_s12 }
   0xf   : > { %v397_v0 = vld [vmem:[%s1607_s19 + $0x78] sm:$0xff]  ;;  %v396_v2 = vld [vmem:[%s1607_s19 + $0x70] sm:$0xff]  ;;  %v395_v4 = vld [vmem:[%s1607_s19 + $0x68] sm:$0xff]  ;;  %s1643_s23 = scalar_lea.vmem %s1873_s0, %s1315_s20  ;;  %s1316_s27 = smul.u32 392, %s1882_s12 }
  0x10   : > { %v413_v1 = vld [vmem:[%s1607_s19 + $0xf8] sm:$0xff]  ;;  %1283 = vmatpush.msra.mxu2 %v397_v0  ;;  %v412_v3 = vld [vmem:[%s1607_s19 + $0xf0] sm:$0xff]  ;;  %v411_v5 = vld [vmem:[%s1607_s19 + $0xe8] sm:$0xff]  ;;  %418 = vmatpush.msra.mxu0 %v397_v0 }
  0x11   : > { %582 = vmatpush.msra.mxu1 %v413_v1  ;;  %1299 = vmatpush.msra.mxu3 %v413_v1  ;;  %v394_v6 = vld [vmem:[%s1607_s19 + $0x60] sm:$0xff]  ;;  %v393_v8 = vld [vmem:[%s1607_s19 + $0x58] sm:$0xff]  ;;  %v392_v10 = vld [vmem:[%s1607_s19 + $0x50] sm:$0xff]  ;;  %s1748_s30 = scalar_lea.vmem %s1876_s3, %s1316_s27 }
  0x12   : > { %1284 = vmatpush.msra.mxu2 %v396_v2  ;;  %v410_v7 = vld [vmem:[%s1607_s19 + $0xe0] sm:$0xff]  ;;  %419 = vmatpush.msra.mxu0 %v396_v2  ;;  %v409_v9 = vld [vmem:[%s1607_s19 + $0xd8] sm:$0xff]  ;;  %v408_v11 = vld [vmem:[%s1607_s19 + $0xd0] sm:$0xff] }
  0x13   : > { %583 = vmatpush.msra.mxu1 %v412_v3  ;;  %1300 = vmatpush.msra.mxu3 %v412_v3  ;;  %v391_v12 = vld [vmem:[%s1607_s19 + $0x48] sm:$0xff]  ;;  %v390_v14 = vld [vmem:[%s1607_s19 + $0x40] sm:$0xff]  ;;  %v389_v16 = vld [vmem:[%s1607_s19 + $0x38] sm:$0xff] }
  0x14   : > { %1285 = vmatpush.msra.mxu2 %v395_v4  ;;  %420 = vmatpush.msra.mxu0 %v395_v4  ;;  %v407_v13 = vld [vmem:[%s1607_s19 + $0xc8] sm:$0xff]  ;;  %v406_v15 = vld [vmem:[%s1607_s19 + $0xc0] sm:$0xff]  ;;  %v405_v17 = vld [vmem:[%s1607_s19 + $0xb8] sm:$0xff] }
  0x15   : > { %584 = vmatpush.msra.mxu1 %v411_v5  ;;  %1301 = vmatpush.msra.mxu3 %v411_v5  ;;  %v388_v18 = vld [vmem:[%s1607_s19 + $0x30] sm:$0xff]  ;;  %v387_v20 = vld [vmem:[%s1607_s19 + $0x28] sm:$0xff]  ;;  %v386_v22 = vld [vmem:[%s1607_s19 + $0x20] sm:$0xff] }
  0x16   : > { %1286 = vmatpush.msra.mxu2 %v394_v6  ;;  %421 = vmatpush.msra.mxu0 %v394_v6  ;;  %v404_v19 = vld [vmem:[%s1607_s19 + $0xb0] sm:$0xff]  ;;  %v403_v21 = vld [vmem:[%s1607_s19 + $0xa8] sm:$0xff]  ;;  %v402_v23 = vld [vmem:[%s1607_s19 + $0xa0] sm:$0xff] }
  0x17   : > { %585 = vmatpush.msra.mxu1 %v410_v7  ;;  %1302 = vmatpush.msra.mxu3 %v410_v7  ;;  %v385_v24 = vld [vmem:[%s1607_s19 + $0x18] sm:$0xff]  ;;  %v384_v26 = vld [vmem:[%s1607_s19 + $0x10] sm:$0xff]  ;;  %v383_v28 = vld [vmem:[%s1607_s19 + $0x8] sm:$0xff] }
  0x18   : > { %1287 = vmatpush.msra.mxu2 %v393_v8  ;;  %422 = vmatpush.msra.mxu0 %v393_v8  ;;  %v401_v25 = vld [vmem:[%s1607_s19 + $0x98] sm:$0xff]  ;;  %v400_v27 = vld [vmem:[%s1607_s19 + $0x90] sm:$0xff]  ;;  %v399_v29 = vld [vmem:[%s1607_s19 + $0x88] sm:$0xff] }
  0x19   : > { %586 = vmatpush.msra.mxu1 %v409_v9  ;;  %1303 = vmatpush.msra.mxu3 %v409_v9  ;;  %v382_v30 = vld [vmem:[%s1607_s19] sm:$0xff]  ;;  %v285_v33 = vld [vmem:[%s1643_s23 + $0x8] sm:$0xff]  ;;  %v335_v35 = vld [vmem:[%s1643_s23 + $0x198] sm:$0xff] }
  0x1a   : > { %1288 = vmatpush.msra.mxu2 %v392_v10  ;;  %423 = vmatpush.msra.mxu0 %v392_v10  ;;  %v398_v31 = vld [vmem:[%s1607_s19 + $0x80] sm:$0xff]  ;;  %v334_v36 = vld [vmem:[%s1643_s23 + $0x190] sm:$0xff]  ;;  %v287_v37 = vld [vmem:[%s1643_s23 + $0x18] sm:$0xff] }
  0x1b   : > { %587 = vmatpush.msra.mxu1 %v408_v11  ;;  %1304 = vmatpush.msra.mxu3 %v408_v11  ;;  %v332_v32 = vld [vmem:[%s1643_s23 + $0x180] sm:$0xff]  ;;  %v286_v38 = vld [vmem:[%s1643_s23 + $0x10] sm:$0xff]  ;;  %v337_v39 = vld [vmem:[%s1643_s23 + $0x1a8] sm:$0xff] }
  0x1c   : > { %1289 = vmatpush.msra.mxu2 %v391_v12  ;;  %424 = vmatpush.msra.mxu0 %v391_v12  ;;  %v284_v34 = vld [vmem:[%s1643_s23] sm:$0xff]  ;;  %v289_v41 = vld [vmem:[%s1643_s23 + $0x28] sm:$0xff]  ;;  %v339_v43 = vld [vmem:[%s1643_s23 + $0x1b8] sm:$0xff] }
  0x1d   : > { %588 = vmatpush.msra.mxu1 %v407_v13  ;;  %1305 = vmatpush.msra.mxu3 %v407_v13  ;;  %v336_v40 = vld [vmem:[%s1643_s23 + $0x1a0] sm:$0xff]  ;;  %v338_v44 = vld [vmem:[%s1643_s23 + $0x1b0] sm:$0xff]  ;;  %v291_v45 = vld [vmem:[%s1643_s23 + $0x38] sm:$0xff] }
  0x1e   : > { %1290 = vmatpush.msra.mxu2 %v390_v14  ;;  %425 = vmatpush.msra.mxu0 %v390_v14  ;;  %v288_v42 = vld [vmem:[%s1643_s23 + $0x20] sm:$0xff]  ;;  %v290_v46 = vld [vmem:[%s1643_s23 + $0x30] sm:$0xff]  ;;  %v341_v47 = vld [vmem:[%s1643_s23 + $0x1c8] sm:$0xff] }
  0x1f   : > { %589 = vmatpush.msra.mxu1 %v406_v15  ;;  %1306 = vmatpush.msra.mxu3 %v406_v15  ;;  %v340_v48 = vld [vmem:[%s1643_s23 + $0x1c0] sm:$0xff]  ;;  %v293_v49 = vld [vmem:[%s1643_s23 + $0x48] sm:$0xff]  ;;  %v343_v51 = vld [vmem:[%s1643_s23 + $0x1d8] sm:$0xff] }
  0x20   : > { %1291 = vmatpush.msra.mxu2 %v389_v16  ;;  %426 = vmatpush.msra.mxu0 %v389_v16  ;;  %v292_v50 = vld [vmem:[%s1643_s23 + $0x40] sm:$0xff]  ;;  %v342_v52 = vld [vmem:[%s1643_s23 + $0x1d0] sm:$0xff]  ;;  %v295_v53 = vld [vmem:[%s1643_s23 + $0x58] sm:$0xff] }
  0x21   : > { %590 = vmatpush.msra.mxu1 %v405_v17  ;;  %1307 = vmatpush.msra.mxu3 %v405_v17  ;;  %v294_v54 = vld [vmem:[%s1643_s23 + $0x50] sm:$0xff]  ;;  %v345_v55 = vld [vmem:[%s1643_s23 + $0x1e8] sm:$0xff]  ;;  %v344_v56 = vld [vmem:[%s1643_s23 + $0x1e0] sm:$0xff] }
  0x22   : > { %1292 = vmatpush.msra.mxu2 %v388_v18  ;;  %427 = vmatpush.msra.mxu0 %v388_v18  ;;  %v297_v57 = vld [vmem:[%s1643_s23 + $0x68] sm:$0xff]  ;;  %v296_v58 = vld [vmem:[%s1643_s23 + $0x60] sm:$0xff]  ;;  %v347_v59 = vld [vmem:[%s1643_s23 + $0x1f8] sm:$0xff] }
  0x23   : > { %591 = vmatpush.msra.mxu1 %v404_v19  ;;  %1308 = vmatpush.msra.mxu3 %v404_v19  ;;  %v346_v60 = vld [vmem:[%s1643_s23 + $0x1f0] sm:$0xff]  ;;  %v299_v61 = vld [vmem:[%s1643_s23 + $0x78] sm:$0xff]  ;;  %v349_v63 = vld [vmem:[%s1643_s23 + $0x208] sm:$0xff] }
  0x24   : > { %1293 = vmatpush.msra.mxu2 %v387_v20  ;;  %428 = vmatpush.msra.mxu0 %v387_v20  ;;  %v298_v62 = vld [vmem:[%s1643_s23 + $0x70] sm:$0xff]  ;;  %v348_v0 = vld [vmem:[%s1643_s23 + $0x200] sm:$0xff]  ;;  %v301_v1 = vld [vmem:[%s1643_s23 + $0x88] sm:$0xff] }
  0x25   : > { %592 = vmatpush.msra.mxu1 %v403_v21  ;;  %1309 = vmatpush.msra.mxu3 %v403_v21  ;;  %v300_v2 = vld [vmem:[%s1643_s23 + $0x80] sm:$0xff]  ;;  %v351_v3 = vld [vmem:[%s1643_s23 + $0x218] sm:$0xff]  ;;  %v350_v4 = vld [vmem:[%s1643_s23 + $0x210] sm:$0xff] }
  0x26   : > { %1294 = vmatpush.msra.mxu2 %v386_v22  ;;  %429 = vmatpush.msra.mxu0 %v386_v22  ;;  %v303_v5 = vld [vmem:[%s1643_s23 + $0x98] sm:$0xff]  ;;  %v302_v6 = vld [vmem:[%s1643_s23 + $0x90] sm:$0xff]  ;;  %v353_v7 = vld [vmem:[%s1643_s23 + $0x228] sm:$0xff] }
  0x27   : > { %593 = vmatpush.msra.mxu1 %v402_v23  ;;  %1310 = vmatpush.msra.mxu3 %v402_v23  ;;  %v352_v8 = vld [vmem:[%s1643_s23 + $0x220] sm:$0xff]  ;;  %v305_v9 = vld [vmem:[%s1643_s23 + $0xa8] sm:$0xff]  ;;  %v355_v11 = vld [vmem:[%s1643_s23 + $0x238] sm:$0xff] }
  0x28   : > { %1295 = vmatpush.msra.mxu2 %v385_v24  ;;  %430 = vmatpush.msra.mxu0 %v385_v24  ;;  %v304_v10 = vld [vmem:[%s1643_s23 + $0xa0] sm:$0xff]  ;;  %v354_v12 = vld [vmem:[%s1643_s23 + $0x230] sm:$0xff]  ;;  %v307_v13 = vld [vmem:[%s1643_s23 + $0xb8] sm:$0xff] }
  0x29   : > { %594 = vmatpush.msra.mxu1 %v401_v25  ;;  %1311 = vmatpush.msra.mxu3 %v401_v25  ;;  %v306_v14 = vld [vmem:[%s1643_s23 + $0xb0] sm:$0xff]  ;;  %v357_v15 = vld [vmem:[%s1643_s23 + $0x248] sm:$0xff]  ;;  %v356_v16 = vld [vmem:[%s1643_s23 + $0x240] sm:$0xff] }
  0x2a   : > { %1296 = vmatpush.msra.mxu2 %v384_v26  ;;  %431 = vmatpush.msra.mxu0 %v384_v26  ;;  %v309_v17 = vld [vmem:[%s1643_s23 + $0xc8] sm:$0xff]  ;;  %v308_v18 = vld [vmem:[%s1643_s23 + $0xc0] sm:$0xff]  ;;  %v359_v19 = vld [vmem:[%s1643_s23 + $0x258] sm:$0xff] }
  0x2b   : > { %595 = vmatpush.msra.mxu1 %v400_v27  ;;  %1312 = vmatpush.msra.mxu3 %v400_v27  ;;  %v358_v20 = vld [vmem:[%s1643_s23 + $0x250] sm:$0xff]  ;;  %v311_v21 = vld [vmem:[%s1643_s23 + $0xd8] sm:$0xff]  ;;  %v361_v23 = vld [vmem:[%s1643_s23 + $0x268] sm:$0xff] }
  0x2c   : > { %1297 = vmatpush.msra.mxu2 %v383_v28  ;;  %432 = vmatpush.msra.mxu0 %v383_v28  ;;  %v310_v22 = vld [vmem:[%s1643_s23 + $0xd0] sm:$0xff]  ;;  %v360_v24 = vld [vmem:[%s1643_s23 + $0x260] sm:$0xff]  ;;  %v313_v25 = vld [vmem:[%s1643_s23 + $0xe8] sm:$0xff] }
  0x2d   : > { %596 = vmatpush.msra.mxu1 %v399_v29  ;;  %1313 = vmatpush.msra.mxu3 %v399_v29  ;;  %v312_v26 = vld [vmem:[%s1643_s23 + $0xe0] sm:$0xff]  ;;  %v363_v27 = vld [vmem:[%s1643_s23 + $0x278] sm:$0xff]  ;;  %v362_v28 = vld [vmem:[%s1643_s23 + $0x270] sm:$0xff] }
  0x2e   : > { %1298 = vmatpush.msra.mxu2 %v382_v30  ;;  %433 = vmatpush.msra.mxu0 %v382_v30  ;;  %v315_v29 = vld [vmem:[%s1643_s23 + $0xf8] sm:$0xff]  ;;  %v314_v30 = vld [vmem:[%s1643_s23 + $0xf0] sm:$0xff] }
  0x2f   : > { %597 = vmatpush.msra.mxu1 %v398_v31  ;;  %506 = vmatmul.f32.vlgmr.msra.gmra.mxu2 %v332_v32  ;;  %v1718_v32 = vld [vmem:[%s1655_s26] ss:$0 sm:$0xff] }
  0x30   : > { %598 = vmatmul.f32.vlgmr.msra.gmra.mxu1 %v285_v33  ;;  %1314 = vmatpush.msra.mxu3 %v398_v31  ;;  %v365_v31 = vld [vmem:[%s1643_s23 + $0x288] sm:$0xff] }
  0x31   : > { %434 = vmatmul.f32.vlgmr.msra.gmra.mxu0 %v284_v34  ;;  %673 = vmatmul.f32.vlgmr.msra.gmra.mxu3 %v335_v35  ;;  %v364_v34 = vld [vmem:[%s1643_s23 + $0x280] sm:$0xff]  ;;  %v317_v35 = vld [vmem:[%s1643_s23 + $0x108] sm:$0xff] }
  0x37   : > { %509 = vmatmul.f32.gmra.mxu2 %v334_v36 }
  0x38   : > { %601 = vmatmul.f32.gmra.mxu1 %v287_v37  ;;  %v316_v37 = vld [vmem:[%s1643_s23 + $0x100] sm:$0xff] }
  0x39   : > { %437 = vmatmul.f32.gmra.mxu0 %v286_v38  ;;  %676 = vmatmul.f32.gmra.mxu3 %v337_v39  ;;  %v367_v38 = vld [vmem:[%s1643_s23 + $0x298] sm:$0xff] }
  0x3f   : > { %512 = vmatmul.f32.gmra.mxu2 %v336_v40 }
  0x40   : > { %604 = vmatmul.f32.gmra.mxu1 %v289_v41 }
  0x41   : > { %440 = vmatmul.f32.gmra.mxu0 %v288_v42  ;;  %679 = vmatmul.f32.gmra.mxu3 %v339_v43 }
  0x47   : > { %515 = vmatmul.f32.gmra.mxu2 %v338_v44  ;;  %v366_v44 = vld [vmem:[%s1643_s23 + $0x290] sm:$0xff] }
  0x48   : > { %607 = vmatmul.f32.gmra.mxu1 %v291_v45  ;;  %v319_v45 = vld [vmem:[%s1643_s23 + $0x118] sm:$0xff] }
  0x49   : > { %443 = vmatmul.f32.gmra.mxu0 %v290_v46  ;;  %682 = vmatmul.f32.gmra.mxu3 %v341_v47 }
  0x4f   : > { %518 = vmatmul.f32.gmra.mxu2 %v340_v48 }
  0x50   : > { %610 = vmatmul.f32.gmra.mxu1 %v293_v49  ;;  %v318_v49 = vld [vmem:[%s1643_s23 + $0x110] sm:$0xff] }
  0x51   : > { %446 = vmatmul.f32.gmra.mxu0 %v292_v50  ;;  %685 = vmatmul.f32.gmra.mxu3 %v343_v51  ;;  %v369_v50 = vld [vmem:[%s1643_s23 + $0x2a8] sm:$0xff] }
  0x57   : > { %521 = vmatmul.f32.gmra.mxu2 %v342_v52 }
  0x58   : > { %613 = vmatmul.f32.gmra.mxu1 %v295_v53 }
  0x59   : > { %449 = vmatmul.f32.gmra.mxu0 %v294_v54  ;;  %688 = vmatmul.f32.gmra.mxu3 %v345_v55 }
  0x5f   : > { %524 = vmatmul.f32.gmra.mxu2 %v344_v56 }
  0x60   : > { %616 = vmatmul.f32.gmra.mxu1 %v297_v57  ;;  %v368_v57 = vld [vmem:[%s1643_s23 + $0x2a0] sm:$0xff] }
  0x61   : > { %452 = vmatmul.f32.gmra.mxu0 %v296_v58  ;;  %691 = vmatmul.f32.gmra.mxu3 %v347_v59  ;;  %v321_v58 = vld [vmem:[%s1643_s23 + $0x128] sm:$0xff] }
  0x67   : > { %527 = vmatmul.f32.gmra.mxu2 %v346_v60 }
  0x68   : > { %619 = vmatmul.f32.gmra.mxu1 %v299_v61 }
  0x69   : > { %455 = vmatmul.f32.gmra.mxu0 %v298_v62  ;;  %694 = vmatmul.f32.gmra.mxu3 %v349_v63 }
  0x6f   : > { %530 = vmatmul.f32.gmra.mxu2 %v348_v0 }
  0x70   : > { %622 = vmatmul.f32.gmra.mxu1 %v301_v1  ;;  %v320_v1 = vld [vmem:[%s1643_s23 + $0x120] sm:$0xff] }
  0x71   : > { %458 = vmatmul.f32.gmra.mxu0 %v300_v2  ;;  %697 = vmatmul.f32.gmra.mxu3 %v351_v3  ;;  %v371_v2 = vld [vmem:[%s1643_s23 + $0x2b8] sm:$0xff] }
  0x77   : > { %533 = vmatmul.f32.gmra.mxu2 %v350_v4 }
  0x78   : > { %625 = vmatmul.f32.gmra.mxu1 %v303_v5 }
  0x79   : > { %461 = vmatmul.f32.gmra.mxu0 %v302_v6  ;;  %700 = vmatmul.f32.gmra.mxu3 %v353_v7 }
  0x7f   : > { %536 = vmatmul.f32.gmra.mxu2 %v352_v8 }
  0x80   : > { %628 = vmatmul.f32.gmra.mxu1 %v305_v9 }
  0x81   : > { %464 = vmatmul.f32.gmra.mxu0 %v304_v10  ;;  %703 = vmatmul.f32.gmra.mxu3 %v355_v11  ;;  %v370_v11 = vld [vmem:[%s1643_s23 + $0x2b0] sm:$0xff] }
  0x87   : > { %539 = vmatmul.f32.gmra.mxu2 %v354_v12  ;;  %v323_v12 = vld [vmem:[%s1643_s23 + $0x138] sm:$0xff] }
  0x88   : > { %631 = vmatmul.f32.gmra.mxu1 %v307_v13 }
  0x89   : > { %467 = vmatmul.f32.gmra.mxu0 %v306_v14  ;;  %706 = vmatmul.f32.gmra.mxu3 %v357_v15 }
  0x8f   : > { %542 = vmatmul.f32.gmra.mxu2 %v356_v16 }
  0x90   : > { %634 = vmatmul.f32.gmra.mxu1 %v309_v17 }
  0x91   : > { %470 = vmatmul.f32.gmra.mxu0 %v308_v18  ;;  %709 = vmatmul.f32.gmra.mxu3 %v359_v19 }
  0x97   : > { %545 = vmatmul.f32.gmra.mxu2 %v358_v20  ;;  %v322_v20 = vld [vmem:[%s1643_s23 + $0x130] sm:$0xff] }
  0x98   : > { %637 = vmatmul.f32.gmra.mxu1 %v311_v21  ;;  %v373_v21 = vld [vmem:[%s1643_s23 + $0x2c8] sm:$0xff] }
  0x99   : > { %473 = vmatmul.f32.gmra.mxu0 %v310_v22  ;;  %712 = vmatmul.f32.gmra.mxu3 %v361_v23 }
  0x9f   : > { %548 = vmatmul.f32.gmra.mxu2 %v360_v24 }
  0xa0   : > { %640 = vmatmul.f32.gmra.mxu1 %v313_v25 }
  0xa1   : > { %476 = vmatmul.f32.gmra.mxu0 %v312_v26  ;;  %715 = vmatmul.f32.gmra.mxu3 %v363_v27 }
  0xa7   : > { %551 = vmatmul.f32.gmra.mxu2 %v362_v28 }
  0xa8   : > { %643 = vmatmul.f32.gmra.mxu1 %v315_v29 }
  0xa9   : > { %479 = vmatmul.f32.gmra.mxu0 %v314_v30  ;;  %718 = vmatmul.f32.gmra.mxu3 %v365_v31 }
  0xad   : > { %v599_v33 = vpop.f32.mrf.mxu1 }
  0xae   : > { %v435_v36 = vpop.f32.mrf.mxu0 }
  0xaf   : > { %554 = vmatmul.f32.gmra.mxu2 %v364_v34  ;;  %v436_v39 = vadd.f32 %v1718_v32, %v435_v36  ;;  %v325_v36 = vld [vmem:[%s1643_s23 + $0x148] sm:$0xff] }
  0xb0   : > { %646 = vmatmul.f32.gmra.mxu1 %v317_v35  ;;  %v372_v35 = vld [vmem:[%s1643_s23 + $0x2c0] sm:$0xff] }
  0xb1   : > { %v600_v40 = vadd.f32 %v599_v33, %v436_v39  ;;  %482 = vmatmul.f32.gmra.mxu0 %v316_v37  ;;  %721 = vmatmul.f32.gmra.mxu3 %v367_v38 }
  0xb2   : > { %v1725_v41 = vpop.f32.mrf.mxu2 }
  0xb3   : > { %v746_v42 = vsub.f32 0.0, %v600_v40 }
  0xb4   : > { %v674_v46 = vpop.f32.mrf.mxu3 }
  0xb5   : > { %v602_v43 = vpop.f32.mrf.mxu1  ;;  %v795_v47 = vmul.f32 1.442695, %v746_v42 }
  0xb6   : > { %v438_v48 = vpop.f32.mrf.mxu0 }
  0xb7   : > { %1342 = vpow2.f32 %v795_v47  ;;  %557 = vmatmul.f32.gmra.mxu2 %v366_v44  ;;  %v439_v51 = vadd.f32 %v1718_v32, %v438_v48 }
  0xb8   : > { %649 = vmatmul.f32.gmra.mxu1 %v319_v45  ;;  %v324_v45 = vld [vmem:[%s1643_s23 + $0x140] sm:$0xff] }
  0xb9   : > { %v603_v52 = vadd.f32 %v602_v43, %v439_v51  ;;  %485 = vmatmul.f32.gmra.mxu0 %v318_v49  ;;  %724 = vmatmul.f32.gmra.mxu3 %v369_v50 }
  0xba   : > { %v510_v53 = vpop.f32.mrf.mxu2 }
  0xbb   : > { %v747_v54 = vsub.f32 0.0, %v603_v52  ;;  %v511_v55 = vadd.f32 %v1718_v32, %v510_v53 }
  0xbc   : > { %v677_v59 = vpop.f32.mrf.mxu3 }
  0xbd   : > { %v605_v56 = vpop.f32.mrf.mxu1  ;;  %v1343_v60 = vpop.eup %1342  ;;  %v797_v61 = vmul.f32 1.442695, %v747_v54  ;;  %v675_v62 = vadd.f32 %v674_v46, %v511_v55  ;;  %v375_v46 = vld [vmem:[%s1643_s23 + $0x2d8] sm:$0xff] }
  0xbe   : > { %v893_v63 = vadd.f32 1.0, %v1343_v60  ;;  %v441_v0 = vpop.f32.mrf.mxu0 }
  0xbf   : > { %1344 = vpow2.f32 %v797_v61  ;;  %v771_v3 = vsub.f32 0.0, %v675_v62  ;;  %560 = vmatmul.f32.gmra.mxu2 %v368_v57  ;;  %v442_v4 = vadd.f32 %v1718_v32, %v441_v0  ;;  %v374_v61 = vld [vmem:[%s1643_s23 + $0x2d0] sm:$0xff]  ;;  %v327_v62 = vld [vmem:[%s1643_s23 + $0x158] sm:$0xff] }
  0xc0   : > { %652 = vmatmul.f32.gmra.mxu1 %v321_v58  ;;  %1346 = vrcp.f32 %v893_v63 }
  0xc1   : > { %v845_v5 = vmul.f32 1.442695, %v771_v3  ;;  %v606_v6 = vadd.f32 %v605_v56, %v442_v4  ;;  %488 = vmatmul.f32.gmra.mxu0 %v320_v1  ;;  %727 = vmatmul.f32.gmra.mxu3 %v371_v2 }
  0xc2   : > { %v513_v7 = vpop.f32.mrf.mxu2 }
  0xc3   : > { %1348 = vpow2.f32 %v845_v5  ;;  %v748_v8 = vsub.f32 0.0, %v606_v6  ;;  %v514_v9 = vadd.f32 %v1718_v32, %v513_v7  ;;  %v326_v7 = vld [vmem:[%s1643_s23 + $0x150] sm:$0xff] }
  0xc4   : > { %v680_v13 = vpop.f32.mrf.mxu3 }
  0xc5   : > { %v608_v10 = vpop.f32.mrf.mxu1  ;;  %v1345_v14 = vpop.eup %1344  ;;  %v799_v15 = vmul.f32 1.442695, %v748_v8  ;;  %v678_v16 = vadd.f32 %v677_v59, %v514_v9  ;;  %v377_v8 = vld [vmem:[%s1643_s23 + $0x2e8] sm:$0xff] }
  0xc6   : > { %v1347_v17 = vpop.eup %1346  ;;  %v894_v18 = vadd.f32 1.0, %v1345_v14  ;;  %v444_v19 = vpop.f32.mrf.mxu0 }
  0xc7   : > { %v991_v22 = vmax.f32 %v1347_v17, 0.0  ;;  %1350 = vpow2.f32 %v799_v15  ;;  %v772_v23 = vsub.f32 0.0, %v678_v16  ;;  %563 = vmatmul.f32.gmra.mxu2 %v370_v11  ;;  %v445_v24 = vadd.f32 %v1718_v32, %v444_v19 }
  0xc8   : > { %655 = vmatmul.f32.gmra.mxu1 %v323_v12  ;;  %1352 = vrcp.f32 %v894_v18 }
  0xc9   : > { %v1349_v25 = vpop.eup %1348  ;;  %v1040_v26 = vmin.f32 %v991_v22, 1.0  ;;  %v847_v27 = vmul.f32 1.442695, %v772_v23  ;;  %v609_v28 = vadd.f32 %v608_v10, %v445_v24  ;;  %491 = vmatmul.f32.gmra.mxu0 %v322_v20  ;;  %730 = vmatmul.f32.gmra.mxu3 %v373_v21  ;;  %v376_v23 = vld [vmem:[%s1643_s23 + $0x2e0] sm:$0xff]  ;;  %v329_v24 = vld [vmem:[%s1643_s23 + $0x168] sm:$0xff] }
  0xca   : > { %v918_v29 = vadd.f32 1.0, %v1349_v25  ;;  %v516_v30 = vpop.f32.mrf.mxu2 }
  0xcb   : > { %1089 = vst [vmem:[%s1748_s30] sm:$0xff] %v1040_v26  ;;  %1354 = vpow2.f32 %v847_v27  ;;  %v749_v31 = vsub.f32 0.0, %v609_v28  ;;  %v517_v33 = vadd.f32 %v1718_v32, %v516_v30 }
  0xcc   : > { %1356 = vrcp.f32 %v918_v29  ;;  %v683_v37 = vpop.f32.mrf.mxu3 }
  0xcd   : > { %v611_v34 = vpop.f32.mrf.mxu1  ;;  %v1351_v38 = vpop.eup %1350  ;;  %v801_v39 = vmul.f32 1.442695, %v749_v31  ;;  %v681_v40 = vadd.f32 %v680_v13, %v517_v33 }
  0xce   : > { %v1353_v42 = vpop.eup %1352  ;;  %v895_v43 = vadd.f32 1.0, %v1351_v38  ;;  %v447_v44 = vpop.f32.mrf.mxu0 }
  0xcf   : > { %v992_v47 = vmax.f32 %v1353_v42, 0.0  ;;  %1358 = vpow2.f32 %v801_v39  ;;  %v773_v48 = vsub.f32 0.0, %v681_v40  ;;  %566 = vmatmul.f32.gmra.mxu2 %v372_v35  ;;  %v448_v49 = vadd.f32 %v1718_v32, %v447_v44  ;;  %v379_v35 = vld [vmem:[%s1643_s23 + $0x2f8] sm:$0xff] }
  0xd0   : > { %658 = vmatmul.f32.gmra.mxu1 %v325_v36  ;;  %1360 = vrcp.f32 %v895_v43 }
  0xd1   : > { %v1355_v50 = vpop.eup %1354  ;;  %v1041_v51 = vmin.f32 %v992_v47, 1.0  ;;  %v849_v52 = vmul.f32 1.442695, %v773_v48  ;;  %v612_v53 = vadd.f32 %v611_v34, %v448_v49  ;;  %494 = vmatmul.f32.gmra.mxu0 %v324_v45  ;;  %733 = vmatmul.f32.gmra.mxu3 %v375_v46  ;;  %v328_v34 = vld [vmem:[%s1643_s23 + $0x160] sm:$0xff] }
  0xd2   : > { %v1357_v54 = vpop.eup %1356  ;;  %v919_v55 = vadd.f32 1.0, %v1355_v50  ;;  %v519_v56 = vpop.f32.mrf.mxu2 }
  0xd3   : > { %1090 = vst [vmem:[%s1748_s30 + $0x8] sm:$0xff] %v1041_v51  ;;  %v1016_v57 = vmax.f32 %v1357_v54, 0.0  ;;  %1362 = vpow2.f32 %v849_v52  ;;  %v750_v58 = vsub.f32 0.0, %v612_v53  ;;  %v520_v59 = vadd.f32 %v1718_v32, %v519_v56  ;;  %v378_v51 = vld [vmem:[%s1643_s23 + $0x2f0] sm:$0xff]  ;;  %v331_v52 = vld [vmem:[%s1643_s23 + $0x178] sm:$0xff] }
  0xd4   : > { %1364 = vrcp.f32 %v919_v55  ;;  %v686_v63 = vpop.f32.mrf.mxu3 }
  0xd5   : > { %v614_v60 = vpop.f32.mrf.mxu1  ;;  %v1359_v0 = vpop.eup %1358  ;;  %v1065_v1 = vmin.f32 %v1016_v57, 1.0  ;;  %v803_v2 = vmul.f32 1.442695, %v750_v58  ;;  %v684_v3 = vadd.f32 %v683_v37, %v520_v59 }
  0xd6   : > { %v1361_v4 = vpop.eup %1360  ;;  %v896_v5 = vadd.f32 1.0, %v1359_v0  ;;  %v450_v6 = vpop.f32.mrf.mxu0 }
  0xd7   : > { %1114 = vst [vmem:[%s1748_s30 + $0xc8] sm:$0xff] %v1065_v1  ;;  %v993_v9 = vmax.f32 %v1361_v4, 0.0  ;;  %1366 = vpow2.f32 %v803_v2  ;;  %v774_v10 = vsub.f32 0.0, %v684_v3  ;;  %569 = vmatmul.f32.gmra.mxu2 %v374_v61  ;;  %v451_v11 = vadd.f32 %v1718_v32, %v450_v6  ;;  %v330_v61 = vld [vmem:[%s1643_s23 + $0x170] sm:$0xff] }
  0xd8   : > { %661 = vmatmul.f32.gmra.mxu1 %v327_v62  ;;  %1368 = vrcp.f32 %v896_v5  ;;  %v381_v62 = vld [vmem:[%s1643_s23 + $0x308] sm:$0xff] }
  0xd9   : > { %v1363_v12 = vpop.eup %1362  ;;  %v1042_v13 = vmin.f32 %v993_v9, 1.0  ;;  %v851_v14 = vmul.f32 1.442695, %v774_v10  ;;  %v615_v15 = vadd.f32 %v614_v60, %v451_v11  ;;  %497 = vmatmul.f32.gmra.mxu0 %v326_v7  ;;  %736 = vmatmul.f32.gmra.mxu3 %v377_v8 }
  0xda   : > { %v1365_v16 = vpop.eup %1364  ;;  %v920_v17 = vadd.f32 1.0, %v1363_v12  ;;  %v522_v18 = vpop.f32.mrf.mxu2 }
  0xdb   : > { %1091 = vst [vmem:[%s1748_s30 + $0x10] sm:$0xff] %v1042_v13  ;;  %v1017_v19 = vmax.f32 %v1365_v16, 0.0  ;;  %1370 = vpow2.f32 %v851_v14  ;;  %v751_v20 = vsub.f32 0.0, %v615_v15  ;;  %v523_v21 = vadd.f32 %v1718_v32, %v522_v18  ;;  %v380_v13 = vld [vmem:[%s1643_s23 + $0x300] sm:$0xff]  ;;  %v333_v14 = vld [vmem:[%s1643_s23 + $0x188] sm:$0xff] }
  0xdc   : > { %1372 = vrcp.f32 %v920_v17  ;;  %v689_v25 = vpop.f32.mrf.mxu3 }
  0xdd   : > { %v617_v22 = vpop.f32.mrf.mxu1  ;;  %v1367_v26 = vpop.eup %1366  ;;  %v1066_v27 = vmin.f32 %v1017_v19, 1.0  ;;  %v805_v28 = vmul.f32 1.442695, %v751_v20  ;;  %v687_v29 = vadd.f32 %v686_v63, %v523_v21 }
  0xde   : > { %v1369_v30 = vpop.eup %1368  ;;  %v897_v31 = vadd.f32 1.0, %v1367_v26  ;;  %v453_v33 = vpop.f32.mrf.mxu0 }
  0xdf   : > { %1115 = vst [vmem:[%s1748_s30 + $0xd0] sm:$0xff] %v1066_v27  ;;  %v994_v36 = vmax.f32 %v1369_v30, 0.0  ;;  %1374 = vpow2.f32 %v805_v28  ;;  %v775_v37 = vsub.f32 0.0, %v687_v29  ;;  %572 = vmatmul.f32.gmra.mxu2 %v376_v23  ;;  %v454_v38 = vadd.f32 %v1718_v32, %v453_v33 }
  0xe0   : > { %664 = vmatmul.f32.gmra.mxu1 %v329_v24  ;;  %1376 = vrcp.f32 %v897_v31 }
  0xe1   : > { %v1371_v39 = vpop.eup %1370  ;;  %v1043_v40 = vmin.f32 %v994_v36, 1.0  ;;  %v853_v42 = vmul.f32 1.442695, %v775_v37  ;;  %v618_v43 = vadd.f32 %v617_v22, %v454_v38  ;;  %500 = vmatmul.f32.gmra.mxu0 %v328_v34  ;;  %739 = vmatmul.f32.gmra.mxu3 %v379_v35 }
  0xe2   : > { %v1373_v44 = vpop.eup %1372  ;;  %v921_v45 = vadd.f32 1.0, %v1371_v39  ;;  %v525_v46 = vpop.f32.mrf.mxu2 }
  0xe3   : > { %1092 = vst [vmem:[%s1748_s30 + $0x18] sm:$0xff] %v1043_v40  ;;  %v1018_v47 = vmax.f32 %v1373_v44, 0.0  ;;  %1378 = vpow2.f32 %v853_v42  ;;  %v752_v48 = vsub.f32 0.0, %v618_v43  ;;  %v526_v49 = vadd.f32 %v1718_v32, %v525_v46 }
  0xe4   : > { %1380 = vrcp.f32 %v921_v45  ;;  %v692_v53 = vpop.f32.mrf.mxu3 }
  0xe5   : > { %v620_v50 = vpop.f32.mrf.mxu1  ;;  %v1375_v54 = vpop.eup %1374  ;;  %v1067_v55 = vmin.f32 %v1018_v47, 1.0  ;;  %v807_v56 = vmul.f32 1.442695, %v752_v48  ;;  %v690_v57 = vadd.f32 %v689_v25, %v526_v49 }
  0xe6   : > { %v1377_v58 = vpop.eup %1376  ;;  %v898_v59 = vadd.f32 1.0, %v1375_v54  ;;  %v456_v60 = vpop.f32.mrf.mxu0 }
  0xe7   : > { %1116 = vst [vmem:[%s1748_s30 + $0xd8] sm:$0xff] %v1067_v55  ;;  %v995_v63 = vmax.f32 %v1377_v58, 0.0  ;;  %1382 = vpow2.f32 %v807_v56  ;;  %v776_v0 = vsub.f32 0.0, %v690_v57  ;;  %575 = vmatmul.f32.gmra.mxu2 %v378_v51  ;;  %v457_v1 = vadd.f32 %v1718_v32, %v456_v60 }
  0xe8   : > { %667 = vmatmul.f32.gmra.mxu1 %v331_v52  ;;  %1384 = vrcp.f32 %v898_v59 }
  0xe9   : > { %v1379_v2 = vpop.eup %1378  ;;  %v1044_v3 = vmin.f32 %v995_v63, 1.0  ;;  %v855_v4 = vmul.f32 1.442695, %v776_v0  ;;  %v621_v5 = vadd.f32 %v620_v50, %v457_v1  ;;  %503 = vmatmul.f32.gmra.mxu0 %v330_v61  ;;  %742 = vmatmul.f32.gmra.mxu3 %v381_v62 }
  0xea   : > { %v1381_v6 = vpop.eup %1380  ;;  %v922_v7 = vadd.f32 1.0, %v1379_v2  ;;  %v528_v8 = vpop.f32.mrf.mxu2 }
  0xeb   : > { %1093 = vst [vmem:[%s1748_s30 + $0x20] sm:$0xff] %v1044_v3  ;;  %v1019_v9 = vmax.f32 %v1381_v6, 0.0  ;;  %1386 = vpow2.f32 %v855_v4  ;;  %v753_v10 = vsub.f32 0.0, %v621_v5  ;;  %v529_v11 = vadd.f32 %v1718_v32, %v528_v8 }
  0xec   : > { %1388 = vrcp.f32 %v922_v7  ;;  %v695_v15 = vpop.f32.mrf.mxu3 }
  0xed   : > { %v623_v12 = vpop.f32.mrf.mxu1  ;;  %v1383_v16 = vpop.eup %1382  ;;  %v1068_v17 = vmin.f32 %v1019_v9, 1.0  ;;  %v809_v18 = vmul.f32 1.442695, %v753_v10  ;;  %v693_v19 = vadd.f32 %v692_v53, %v529_v11 }
  0xee   : > { %v1385_v20 = vpop.eup %1384  ;;  %v899_v21 = vadd.f32 1.0, %v1383_v16  ;;  %v459_v22 = vpop.f32.mrf.mxu0 }
  0xef   : > { %1117 = vst [vmem:[%s1748_s30 + $0xe0] sm:$0xff] %v1068_v17  ;;  %v996_v23 = vmax.f32 %v1385_v20, 0.0  ;;  %1390 = vpow2.f32 %v809_v18  ;;  %v777_v24 = vsub.f32 0.0, %v693_v19  ;;  %578 = vmatmul.f32.gmra.mxu2 %v380_v13  ;;  %v460_v25 = vadd.f32 %v1718_v32, %v459_v22 }
  0xf0   : > { %670 = vmatmul.f32.gmra.mxu1 %v333_v14  ;;  %1392 = vrcp.f32 %v899_v21 }
  0xf1   : > { %v1387_v26 = vpop.eup %1386  ;;  %v1045_v27 = vmin.f32 %v996_v23, 1.0  ;;  %v857_v28 = vmul.f32 1.442695, %v777_v24  ;;  %v624_v29 = vadd.f32 %v623_v12, %v460_v25 }
  0xf2   : > { %v1389_v30 = vpop.eup %1388  ;;  %v923_v31 = vadd.f32 1.0, %v1387_v26  ;;  %v531_v33 = vpop.f32.mrf.mxu2 }
  0xf3   : > { %1094 = vst [vmem:[%s1748_s30 + $0x28] sm:$0xff] %v1045_v27  ;;  %v1020_v34 = vmax.f32 %v1389_v30, 0.0  ;;  %1394 = vpow2.f32 %v857_v28  ;;  %v754_v35 = vsub.f32 0.0, %v624_v29  ;;  %v532_v36 = vadd.f32 %v1718_v32, %v531_v33 }
  0xf4   : > { %1396 = vrcp.f32 %v923_v31  ;;  %v698_v38 = vpop.f32.mrf.mxu3 }
  0xf5   : > { %v626_v37 = vpop.f32.mrf.mxu1  ;;  %v1391_v39 = vpop.eup %1390  ;;  %v1069_v40 = vmin.f32 %v1020_v34, 1.0  ;;  %v811_v42 = vmul.f32 1.442695, %v754_v35  ;;  %v696_v43 = vadd.f32 %v695_v15, %v532_v36 }
  0xf6   : > { %v1393_v44 = vpop.eup %1392  ;;  %v900_v45 = vadd.f32 1.0, %v1391_v39  ;;  %v462_v46 = vpop.f32.mrf.mxu0 }
  0xf7   : > { %1118 = vst [vmem:[%s1748_s30 + $0xe8] sm:$0xff] %v1069_v40  ;;  %v997_v47 = vmax.f32 %v1393_v44, 0.0  ;;  %1398 = vpow2.f32 %v811_v42  ;;  %v778_v48 = vsub.f32 0.0, %v696_v43  ;;  %v463_v49 = vadd.f32 %v1718_v32, %v462_v46 }
  0xf8   : > { %1400 = vrcp.f32 %v900_v45 }
  0xf9   : > { %v1395_v50 = vpop.eup %1394  ;;  %v1046_v51 = vmin.f32 %v997_v47, 1.0  ;;  %v859_v52 = vmul.f32 1.442695, %v778_v48  ;;  %v627_v53 = vadd.f32 %v626_v37, %v463_v49 }
  0xfa   : > { %v1397_v54 = vpop.eup %1396  ;;  %v924_v55 = vadd.f32 1.0, %v1395_v50  ;;  %v534_v56 = vpop.f32.mrf.mxu2 }
  0xfb   : > { %1095 = vst [vmem:[%s1748_s30 + $0x30] sm:$0xff] %v1046_v51  ;;  %v1021_v57 = vmax.f32 %v1397_v54, 0.0  ;;  %1402 = vpow2.f32 %v859_v52  ;;  %v755_v58 = vsub.f32 0.0, %v627_v53  ;;  %v535_v59 = vadd.f32 %v1718_v32, %v534_v56 }
  0xfc   : > { %1404 = vrcp.f32 %v924_v55  ;;  %v701_v61 = vpop.f32.mrf.mxu3 }
  0xfd   : > { %v629_v60 = vpop.f32.mrf.mxu1  ;;  %v1399_v62 = vpop.eup %1398  ;;  %v1070_v63 = vmin.f32 %v1021_v57, 1.0  ;;  %v813_v0 = vmul.f32 1.442695, %v755_v58  ;;  %v699_v1 = vadd.f32 %v698_v38, %v535_v59 }
  0xfe   : > { %v1401_v2 = vpop.eup %1400  ;;  %v901_v3 = vadd.f32 1.0, %v1399_v62  ;;  %v465_v4 = vpop.f32.mrf.mxu0 }
  0xff   : > { %1119 = vst [vmem:[%s1748_s30 + $0xf0] sm:$0xff] %v1070_v63  ;;  %v998_v5 = vmax.f32 %v1401_v2, 0.0  ;;  %1406 = vpow2.f32 %v813_v0  ;;  %v779_v6 = vsub.f32 0.0, %v699_v1  ;;  %v466_v7 = vadd.f32 %v1718_v32, %v465_v4 }
 0x100   : > { %1408 = vrcp.f32 %v901_v3 }
 0x101   : > { %v1403_v8 = vpop.eup %1402  ;;  %v1047_v9 = vmin.f32 %v998_v5, 1.0  ;;  %v861_v10 = vmul.f32 1.442695, %v779_v6  ;;  %v630_v11 = vadd.f32 %v629_v60, %v466_v7 }
 0x102   : > { %v1405_v12 = vpop.eup %1404  ;;  %v925_v13 = vadd.f32 1.0, %v1403_v8  ;;  %v537_v14 = vpop.f32.mrf.mxu2 }
 0x103   : > { %1096 = vst [vmem:[%s1748_s30 + $0x38] sm:$0xff] %v1047_v9  ;;  %v1022_v15 = vmax.f32 %v1405_v12, 0.0  ;;  %1410 = vpow2.f32 %v861_v10  ;;  %v756_v16 = vsub.f32 0.0, %v630_v11  ;;  %v538_v17 = vadd.f32 %v1718_v32, %v537_v14 }
 0x104   : > { %1412 = vrcp.f32 %v925_v13  ;;  %v704_v19 = vpop.f32.mrf.mxu3 }
 0x105   : > { %v632_v18 = vpop.f32.mrf.mxu1  ;;  %v1407_v20 = vpop.eup %1406  ;;  %v1071_v21 = vmin.f32 %v1022_v15, 1.0  ;;  %v815_v22 = vmul.f32 1.442695, %v756_v16  ;;  %v702_v23 = vadd.f32 %v701_v61, %v538_v17 }
 0x106   : > { %v1409_v24 = vpop.eup %1408  ;;  %v902_v25 = vadd.f32 1.0, %v1407_v20  ;;  %v468_v26 = vpop.f32.mrf.mxu0 }
 0x107   : > { %1120 = vst [vmem:[%s1748_s30 + $0xf8] sm:$0xff] %v1071_v21  ;;  %v999_v27 = vmax.f32 %v1409_v24, 0.0  ;;  %1414 = vpow2.f32 %v815_v22  ;;  %v780_v28 = vsub.f32 0.0, %v702_v23  ;;  %v469_v29 = vadd.f32 %v1718_v32, %v468_v26 }
 0x108   : > { %1416 = vrcp.f32 %v902_v25 }
 0x109   : > { %v1411_v30 = vpop.eup %1410  ;;  %v1048_v31 = vmin.f32 %v999_v27, 1.0  ;;  %v863_v33 = vmul.f32 1.442695, %v780_v28  ;;  %v633_v34 = vadd.f32 %v632_v18, %v469_v29 }
 0x10a   : > { %v1413_v35 = vpop.eup %1412  ;;  %v926_v36 = vadd.f32 1.0, %v1411_v30  ;;  %v540_v37 = vpop.f32.mrf.mxu2 }
 0x10b   : > { %1097 = vst [vmem:[%s1748_s30 + $0x40] sm:$0xff] %v1048_v31  ;;  %v1023_v38 = vmax.f32 %v1413_v35, 0.0  ;;  %1418 = vpow2.f32 %v863_v33  ;;  %v757_v39 = vsub.f32 0.0, %v633_v34  ;;  %v541_v40 = vadd.f32 %v1718_v32, %v540_v37 }
 0x10c   : > { %1420 = vrcp.f32 %v926_v36  ;;  %v707_v43 = vpop.f32.mrf.mxu3 }
 0x10d   : > { %v635_v42 = vpop.f32.mrf.mxu1  ;;  %v1415_v44 = vpop.eup %1414  ;;  %v1072_v45 = vmin.f32 %v1023_v38, 1.0  ;;  %v817_v46 = vmul.f32 1.442695, %v757_v39  ;;  %v705_v47 = vadd.f32 %v704_v19, %v541_v40 }
 0x10e   : > { %v1417_v48 = vpop.eup %1416  ;;  %v903_v49 = vadd.f32 1.0, %v1415_v44  ;;  %v471_v50 = vpop.f32.mrf.mxu0 }
 0x10f   : > { %1121 = vst [vmem:[%s1748_s30 + $0x100] sm:$0xff] %v1072_v45  ;;  %v1000_v51 = vmax.f32 %v1417_v48, 0.0  ;;  %1422 = vpow2.f32 %v817_v46  ;;  %v781_v52 = vsub.f32 0.0, %v705_v47  ;;  %v472_v53 = vadd.f32 %v1718_v32, %v471_v50 }
 0x110   : > { %1424 = vrcp.f32 %v903_v49 }
 0x111   : > { %v1419_v54 = vpop.eup %1418  ;;  %v1049_v55 = vmin.f32 %v1000_v51, 1.0  ;;  %v865_v56 = vmul.f32 1.442695, %v781_v52  ;;  %v636_v57 = vadd.f32 %v635_v42, %v472_v53 }
 0x112   : > { %v1421_v58 = vpop.eup %1420  ;;  %v927_v59 = vadd.f32 1.0, %v1419_v54  ;;  %v543_v60 = vpop.f32.mrf.mxu2 }
 0x113   : > { %1098 = vst [vmem:[%s1748_s30 + $0x48] sm:$0xff] %v1049_v55  ;;  %v1024_v61 = vmax.f32 %v1421_v58, 0.0  ;;  %1426 = vpow2.f32 %v865_v56  ;;  %v758_v62 = vsub.f32 0.0, %v636_v57  ;;  %v544_v63 = vadd.f32 %v1718_v32, %v543_v60 }
 0x114   : > { %1428 = vrcp.f32 %v927_v59  ;;  %v710_v1 = vpop.f32.mrf.mxu3 }
 0x115   : > { %v638_v0 = vpop.f32.mrf.mxu1  ;;  %v1423_v2 = vpop.eup %1422  ;;  %v1073_v3 = vmin.f32 %v1024_v61, 1.0  ;;  %v819_v4 = vmul.f32 1.442695, %v758_v62  ;;  %v708_v5 = vadd.f32 %v707_v43, %v544_v63 }
 0x116   : > { %v1425_v6 = vpop.eup %1424  ;;  %v904_v7 = vadd.f32 1.0, %v1423_v2  ;;  %v474_v8 = vpop.f32.mrf.mxu0 }
 0x117   : > { %1122 = vst [vmem:[%s1748_s30 + $0x108] sm:$0xff] %v1073_v3  ;;  %v1001_v9 = vmax.f32 %v1425_v6, 0.0  ;;  %1430 = vpow2.f32 %v819_v4  ;;  %v782_v10 = vsub.f32 0.0, %v708_v5  ;;  %v475_v11 = vadd.f32 %v1718_v32, %v474_v8 }
 0x118   : > { %1432 = vrcp.f32 %v904_v7 }
 0x119   : > { %v1427_v12 = vpop.eup %1426  ;;  %v1050_v13 = vmin.f32 %v1001_v9, 1.0  ;;  %v867_v14 = vmul.f32 1.442695, %v782_v10  ;;  %v639_v15 = vadd.f32 %v638_v0, %v475_v11 }
 0x11a   : > { %v1429_v16 = vpop.eup %1428  ;;  %v928_v17 = vadd.f32 1.0, %v1427_v12  ;;  %v546_v18 = vpop.f32.mrf.mxu2 }
 0x11b   : > { %1099 = vst [vmem:[%s1748_s30 + $0x50] sm:$0xff] %v1050_v13  ;;  %v1025_v19 = vmax.f32 %v1429_v16, 0.0  ;;  %1434 = vpow2.f32 %v867_v14  ;;  %v759_v20 = vsub.f32 0.0, %v639_v15  ;;  %v547_v21 = vadd.f32 %v1718_v32, %v546_v18 }
 0x11c   : > { %1436 = vrcp.f32 %v928_v17  ;;  %v713_v23 = vpop.f32.mrf.mxu3 }
 0x11d   : > { %v641_v22 = vpop.f32.mrf.mxu1  ;;  %v1431_v24 = vpop.eup %1430  ;;  %v1074_v25 = vmin.f32 %v1025_v19, 1.0  ;;  %v821_v26 = vmul.f32 1.442695, %v759_v20  ;;  %v711_v27 = vadd.f32 %v710_v1, %v547_v21 }
 0x11e   : > { %v1433_v28 = vpop.eup %1432  ;;  %v905_v29 = vadd.f32 1.0, %v1431_v24  ;;  %v477_v30 = vpop.f32.mrf.mxu0 }
 0x11f   : > { %1123 = vst [vmem:[%s1748_s30 + $0x110] sm:$0xff] %v1074_v25  ;;  %v1002_v31 = vmax.f32 %v1433_v28, 0.0  ;;  %1438 = vpow2.f32 %v821_v26  ;;  %v783_v33 = vsub.f32 0.0, %v711_v27  ;;  %v478_v34 = vadd.f32 %v1718_v32, %v477_v30 }
 0x120   : > { %1440 = vrcp.f32 %v905_v29 }
 0x121   : > { %v1435_v35 = vpop.eup %1434  ;;  %v1051_v36 = vmin.f32 %v1002_v31, 1.0  ;;  %v869_v37 = vmul.f32 1.442695, %v783_v33  ;;  %v642_v38 = vadd.f32 %v641_v22, %v478_v34 }
 0x122   : > { %v1437_v39 = vpop.eup %1436  ;;  %v929_v40 = vadd.f32 1.0, %v1435_v35  ;;  %v549_v42 = vpop.f32.mrf.mxu2 }
 0x123   : > { %1100 = vst [vmem:[%s1748_s30 + $0x58] sm:$0xff] %v1051_v36  ;;  %v1026_v43 = vmax.f32 %v1437_v39, 0.0  ;;  %1442 = vpow2.f32 %v869_v37  ;;  %v760_v44 = vsub.f32 0.0, %v642_v38  ;;  %v550_v45 = vadd.f32 %v1718_v32, %v549_v42 }
 0x124   : > { %1444 = vrcp.f32 %v929_v40  ;;  %v716_v47 = vpop.f32.mrf.mxu3 }
 0x125   : > { %v644_v46 = vpop.f32.mrf.mxu1  ;;  %v1439_v48 = vpop.eup %1438  ;;  %v1075_v49 = vmin.f32 %v1026_v43, 1.0  ;;  %v823_v50 = vmul.f32 1.442695, %v760_v44  ;;  %v714_v51 = vadd.f32 %v713_v23, %v550_v45 }
 0x126   : > { %v1441_v52 = vpop.eup %1440  ;;  %v906_v53 = vadd.f32 1.0, %v1439_v48  ;;  %v480_v54 = vpop.f32.mrf.mxu0 }
 0x127   : > { %1124 = vst [vmem:[%s1748_s30 + $0x118] sm:$0xff] %v1075_v49  ;;  %v1003_v55 = vmax.f32 %v1441_v52, 0.0  ;;  %1446 = vpow2.f32 %v823_v50  ;;  %v784_v56 = vsub.f32 0.0, %v714_v51  ;;  %v481_v57 = vadd.f32 %v1718_v32, %v480_v54  ;;  %v1825_v49 = vld [vmem:[%s1655_s26] ss:$0 sm:$0xff] }
 0x128   : > { %1448 = vrcp.f32 %v906_v53 }
 0x129   : > { %v1443_v58 = vpop.eup %1442  ;;  %v1052_v59 = vmin.f32 %v1003_v55, 1.0  ;;  %v871_v60 = vmul.f32 1.442695, %v784_v56  ;;  %v645_v61 = vadd.f32 %v644_v46, %v481_v57 }
 0x12a   : > { %v1445_v62 = vpop.eup %1444  ;;  %v930_v63 = vadd.f32 1.0, %v1443_v58  ;;  %v552_v0 = vpop.f32.mrf.mxu2 }
 0x12b   : > { %1101 = vst [vmem:[%s1748_s30 + $0x60] sm:$0xff] %v1052_v59  ;;  %v1027_v1 = vmax.f32 %v1445_v62, 0.0  ;;  %1450 = vpow2.f32 %v871_v60  ;;  %v761_v2 = vsub.f32 0.0, %v645_v61  ;;  %v553_v3 = vadd.f32 %v1718_v32, %v552_v0 }
 0x12c   : > { %1452 = vrcp.f32 %v930_v63  ;;  %v719_v5 = vpop.f32.mrf.mxu3 }
 0x12d   : > { %v647_v4 = vpop.f32.mrf.mxu1  ;;  %v1447_v6 = vpop.eup %1446  ;;  %v1076_v7 = vmin.f32 %v1027_v1, 1.0  ;;  %v825_v8 = vmul.f32 1.442695, %v761_v2  ;;  %v717_v9 = vadd.f32 %v716_v47, %v553_v3 }
 0x12e   : > { %v1449_v10 = vpop.eup %1448  ;;  %v907_v11 = vadd.f32 1.0, %v1447_v6  ;;  %v483_v12 = vpop.f32.mrf.mxu0 }
 0x12f   : > { %1125 = vst [vmem:[%s1748_s30 + $0x120] sm:$0xff] %v1076_v7  ;;  %v1004_v13 = vmax.f32 %v1449_v10, 0.0  ;;  %1454 = vpow2.f32 %v825_v8  ;;  %v785_v14 = vsub.f32 0.0, %v717_v9  ;;  %v484_v15 = vadd.f32 %v1718_v32, %v483_v12 }
 0x130   : > { %1456 = vrcp.f32 %v907_v11 }
 0x131   : > { %v1451_v16 = vpop.eup %1450  ;;  %v1053_v17 = vmin.f32 %v1004_v13, 1.0  ;;  %v873_v18 = vmul.f32 1.442695, %v785_v14  ;;  %v648_v19 = vadd.f32 %v647_v4, %v484_v15 }
 0x132   : > { %v1453_v20 = vpop.eup %1452  ;;  %v931_v21 = vadd.f32 1.0, %v1451_v16  ;;  %v555_v22 = vpop.f32.mrf.mxu2 }
 0x133   : > { %1102 = vst [vmem:[%s1748_s30 + $0x68] sm:$0xff] %v1053_v17  ;;  %v1028_v23 = vmax.f32 %v1453_v20, 0.0  ;;  %1458 = vpow2.f32 %v873_v18  ;;  %v762_v24 = vsub.f32 0.0, %v648_v19  ;;  %v556_v25 = vadd.f32 %v1718_v32, %v555_v22 }
 0x134   : > { %1460 = vrcp.f32 %v931_v21  ;;  %v722_v27 = vpop.f32.mrf.mxu3 }
 0x135   : > { %v650_v26 = vpop.f32.mrf.mxu1  ;;  %v1455_v28 = vpop.eup %1454  ;;  %v1077_v29 = vmin.f32 %v1028_v23, 1.0  ;;  %v827_v30 = vmul.f32 1.442695, %v762_v24  ;;  %v720_v31 = vadd.f32 %v719_v5, %v556_v25 }
 0x136   : > { %v1457_v33 = vpop.eup %1456  ;;  %v908_v34 = vadd.f32 1.0, %v1455_v28  ;;  %v486_v35 = vpop.f32.mrf.mxu0 }
 0x137   : > { %1126 = vst [vmem:[%s1748_s30 + $0x128] sm:$0xff] %v1077_v29  ;;  %v1005_v36 = vmax.f32 %v1457_v33, 0.0  ;;  %1462 = vpow2.f32 %v827_v30  ;;  %v786_v37 = vsub.f32 0.0, %v720_v31  ;;  %v487_v38 = vadd.f32 %v1718_v32, %v486_v35 }
 0x138   : > { %1464 = vrcp.f32 %v908_v34 }
 0x139   : > { %v1459_v39 = vpop.eup %1458  ;;  %v1054_v40 = vmin.f32 %v1005_v36, 1.0  ;;  %v875_v42 = vmul.f32 1.442695, %v786_v37  ;;  %v651_v43 = vadd.f32 %v650_v26, %v487_v38 }
 0x13a   : > { %v1461_v44 = vpop.eup %1460  ;;  %v932_v45 = vadd.f32 1.0, %v1459_v39  ;;  %v558_v46 = vpop.f32.mrf.mxu2 }
 0x13b   : > { %1103 = vst [vmem:[%s1748_s30 + $0x70] sm:$0xff] %v1054_v40  ;;  %v1029_v47 = vmax.f32 %v1461_v44, 0.0  ;;  %1466 = vpow2.f32 %v875_v42  ;;  %v763_v48 = vsub.f32 0.0, %v651_v43  ;;  %v559_v50 = vadd.f32 %v1825_v49, %v558_v46 }
 0x13c   : > { %1468 = vrcp.f32 %v932_v45  ;;  %v725_v32 = vpop.f32.mrf.mxu3 }
 0x13d   : > { %v653_v51 = vpop.f32.mrf.mxu1  ;;  %v1463_v52 = vpop.eup %1462  ;;  %v1078_v53 = vmin.f32 %v1029_v47, 1.0  ;;  %v829_v54 = vmul.f32 1.442695, %v763_v48  ;;  %v723_v55 = vadd.f32 %v722_v27, %v559_v50 }
 0x13e   : > { %v1465_v56 = vpop.eup %1464  ;;  %v909_v57 = vadd.f32 1.0, %v1463_v52  ;;  %v489_v58 = vpop.f32.mrf.mxu0 }
 0x13f   : > { %1127 = vst [vmem:[%s1748_s30 + $0x130] sm:$0xff] %v1078_v53  ;;  %v1006_v59 = vmax.f32 %v1465_v56, 0.0  ;;  %1470 = vpow2.f32 %v829_v54  ;;  %v787_v60 = vsub.f32 0.0, %v723_v55  ;;  %v490_v61 = vadd.f32 %v1825_v49, %v489_v58 }
 0x140   : > { %1472 = vrcp.f32 %v909_v57 }
 0x141   : > { %v1467_v62 = vpop.eup %1466  ;;  %v1055_v63 = vmin.f32 %v1006_v59, 1.0  ;;  %v877_v0 = vmul.f32 1.442695, %v787_v60  ;;  %v654_v1 = vadd.f32 %v653_v51, %v490_v61 }
 0x142   : > { %v1469_v2 = vpop.eup %1468  ;;  %v933_v3 = vadd.f32 1.0, %v1467_v62  ;;  %v561_v4 = vpop.f32.mrf.mxu2 }
 0x143   : > { %1104 = vst [vmem:[%s1748_s30 + $0x78] sm:$0xff] %v1055_v63  ;;  %v1030_v5 = vmax.f32 %v1469_v2, 0.0  ;;  %1474 = vpow2.f32 %v877_v0  ;;  %v764_v6 = vsub.f32 0.0, %v654_v1  ;;  %v562_v7 = vadd.f32 %v1825_v49, %v561_v4 }
 0x144   : > { %1476 = vrcp.f32 %v933_v3  ;;  %v728_v9 = vpop.f32.mrf.mxu3 }
 0x145   : > { %v656_v8 = vpop.f32.mrf.mxu1  ;;  %v1471_v10 = vpop.eup %1470  ;;  %v1079_v11 = vmin.f32 %v1030_v5, 1.0  ;;  %v831_v12 = vmul.f32 1.442695, %v764_v6  ;;  %v726_v13 = vadd.f32 %v725_v32, %v562_v7 }
 0x146   : > { %v1473_v14 = vpop.eup %1472  ;;  %v910_v15 = vadd.f32 1.0, %v1471_v10  ;;  %v492_v16 = vpop.f32.mrf.mxu0 }
 0x147   : > { %1128 = vst [vmem:[%s1748_s30 + $0x138] sm:$0xff] %v1079_v11  ;;  %v1007_v17 = vmax.f32 %v1473_v14, 0.0  ;;  %1478 = vpow2.f32 %v831_v12  ;;  %v788_v18 = vsub.f32 0.0, %v726_v13  ;;  %v493_v19 = vadd.f32 %v1825_v49, %v492_v16 }
 0x148   : > { %1480 = vrcp.f32 %v910_v15 }
 0x149   : > { %v1475_v20 = vpop.eup %1474  ;;  %v1056_v21 = vmin.f32 %v1007_v17, 1.0  ;;  %v879_v22 = vmul.f32 1.442695, %v788_v18  ;;  %v657_v23 = vadd.f32 %v656_v8, %v493_v19 }
 0x14a   : > { %v1477_v24 = vpop.eup %1476  ;;  %v934_v25 = vadd.f32 1.0, %v1475_v20  ;;  %v564_v26 = vpop.f32.mrf.mxu2 }
 0x14b   : > { %1105 = vst [vmem:[%s1748_s30 + $0x80] sm:$0xff] %v1056_v21  ;;  %v1031_v27 = vmax.f32 %v1477_v24, 0.0  ;;  %1482 = vpow2.f32 %v879_v22  ;;  %v765_v28 = vsub.f32 0.0, %v657_v23  ;;  %v565_v29 = vadd.f32 %v1825_v49, %v564_v26 }
 0x14c   : > { %1484 = vrcp.f32 %v934_v25  ;;  %v731_v31 = vpop.f32.mrf.mxu3 }
 0x14d   : > { %v659_v30 = vpop.f32.mrf.mxu1  ;;  %v1479_v33 = vpop.eup %1478  ;;  %v1080_v34 = vmin.f32 %v1031_v27, 1.0  ;;  %v833_v35 = vmul.f32 1.442695, %v765_v28  ;;  %v729_v36 = vadd.f32 %v728_v9, %v565_v29 }
 0x14e   : > { %v1481_v37 = vpop.eup %1480  ;;  %v911_v38 = vadd.f32 1.0, %v1479_v33  ;;  %v495_v39 = vpop.f32.mrf.mxu0 }
 0x14f   : > { %1129 = vst [vmem:[%s1748_s30 + $0x140] sm:$0xff] %v1080_v34  ;;  %v1008_v40 = vmax.f32 %v1481_v37, 0.0  ;;  %1486 = vpow2.f32 %v833_v35  ;;  %v789_v42 = vsub.f32 0.0, %v729_v36  ;;  %v496_v43 = vadd.f32 %v1825_v49, %v495_v39 }
 0x150   : > { %1488 = vrcp.f32 %v911_v38 }
 0x151   : > { %v1483_v44 = vpop.eup %1482  ;;  %v1057_v45 = vmin.f32 %v1008_v40, 1.0  ;;  %v881_v46 = vmul.f32 1.442695, %v789_v42  ;;  %v660_v47 = vadd.f32 %v659_v30, %v496_v43 }
 0x152   : > { %v1485_v48 = vpop.eup %1484  ;;  %v935_v50 = vadd.f32 1.0, %v1483_v44  ;;  %v567_v51 = vpop.f32.mrf.mxu2 }
 0x153   : > { %1106 = vst [vmem:[%s1748_s30 + $0x88] sm:$0xff] %v1057_v45  ;;  %v1032_v32 = vmax.f32 %v1485_v48, 0.0  ;;  %1490 = vpow2.f32 %v881_v46  ;;  %v766_v52 = vsub.f32 0.0, %v660_v47  ;;  %v568_v53 = vadd.f32 %v1825_v49, %v567_v51 }
 0x154   : > { %1492 = vrcp.f32 %v935_v50  ;;  %v734_v55 = vpop.f32.mrf.mxu3 }
 0x155   : > { %v662_v54 = vpop.f32.mrf.mxu1  ;;  %v1487_v56 = vpop.eup %1486  ;;  %v1081_v57 = vmin.f32 %v1032_v32, 1.0  ;;  %v835_v58 = vmul.f32 1.442695, %v766_v52  ;;  %v732_v59 = vadd.f32 %v731_v31, %v568_v53  ;;  %v508_v53 = vadd.f32 %v1825_v49, %v1725_v41 }
 0x156   : > { %v1489_v60 = vpop.eup %1488  ;;  %v912_v61 = vadd.f32 1.0, %v1487_v56  ;;  %v498_v62 = vpop.f32.mrf.mxu0 }
 0x157   : > { %1130 = vst [vmem:[%s1748_s30 + $0x148] sm:$0xff] %v1081_v57  ;;  %v1009_v63 = vmax.f32 %v1489_v60, 0.0  ;;  %1494 = vpow2.f32 %v835_v58  ;;  %v790_v0 = vsub.f32 0.0, %v732_v59  ;;  %v499_v1 = vadd.f32 %v1825_v49, %v498_v62 }
 0x158   : > { %1496 = vrcp.f32 %v912_v61 }
 0x159   : > { %v1491_v2 = vpop.eup %1490  ;;  %v1058_v3 = vmin.f32 %v1009_v63, 1.0  ;;  %v883_v4 = vmul.f32 1.442695, %v790_v0  ;;  %v663_v5 = vadd.f32 %v662_v54, %v499_v1 }
 0x15a   : > { %v1493_v6 = vpop.eup %1492  ;;  %v936_v7 = vadd.f32 1.0, %v1491_v2  ;;  %v570_v8 = vpop.f32.mrf.mxu2 }
 0x15b   : > { %1107 = vst [vmem:[%s1748_s30 + $0x90] sm:$0xff] %v1058_v3  ;;  %v1033_v9 = vmax.f32 %v1493_v6, 0.0  ;;  %1498 = vpow2.f32 %v883_v4  ;;  %v767_v10 = vsub.f32 0.0, %v663_v5  ;;  %v571_v11 = vadd.f32 %v1825_v49, %v570_v8 }
 0x15c   : > { %1500 = vrcp.f32 %v936_v7  ;;  %v737_v20 = vpop.f32.mrf.mxu3 }
 0x15d   : > { %v665_v12 = vpop.f32.mrf.mxu1  ;;  %v1495_v13 = vpop.eup %1494  ;;  %v1082_v14 = vmin.f32 %v1033_v9, 1.0  ;;  %v837_v15 = vmul.f32 1.442695, %v767_v10  ;;  %v735_v16 = vadd.f32 %v734_v55, %v571_v11 }
 0x15e   : > { %v1497_v17 = vpop.eup %1496  ;;  %v913_v18 = vadd.f32 1.0, %v1495_v13  ;;  %v501_v19 = vpop.f32.mrf.mxu0 }
 0x15f   : > { %1131 = vst [vmem:[%s1748_s30 + $0x150] sm:$0xff] %v1082_v14  ;;  %v1010_v21 = vmax.f32 %v1497_v17, 0.0  ;;  %1502 = vpow2.f32 %v837_v15  ;;  %v791_v22 = vsub.f32 0.0, %v735_v16  ;;  %v502_v23 = vadd.f32 %v1825_v49, %v501_v19 }
 0x160   : > { %1504 = vrcp.f32 %v913_v18 }
 0x161   : > { %v1499_v24 = vpop.eup %1498  ;;  %v1059_v25 = vmin.f32 %v1010_v21, 1.0  ;;  %v885_v26 = vmul.f32 1.442695, %v791_v22  ;;  %v666_v27 = vadd.f32 %v665_v12, %v502_v23 }
 0x162   : > { %v1501_v28 = vpop.eup %1500  ;;  %v937_v29 = vadd.f32 1.0, %v1499_v24  ;;  %v573_v30 = vpop.f32.mrf.mxu2 }
 0x163   : > { %1108 = vst [vmem:[%s1748_s30 + $0x98] sm:$0xff] %v1059_v25  ;;  %v1034_v31 = vmax.f32 %v1501_v28, 0.0  ;;  %1506 = vpow2.f32 %v885_v26  ;;  %v768_v33 = vsub.f32 0.0, %v666_v27  ;;  %v574_v34 = vadd.f32 %v1825_v49, %v573_v30 }
 0x164   : > { %1508 = vrcp.f32 %v937_v29  ;;  %v740_v47 = vpop.f32.mrf.mxu3 }
 0x165   : > { %v668_v35 = vpop.f32.mrf.mxu1  ;;  %v1503_v36 = vpop.eup %1502  ;;  %v1083_v37 = vmin.f32 %v1034_v31, 1.0  ;;  %v839_v38 = vmul.f32 1.442695, %v768_v33  ;;  %v738_v39 = vadd.f32 %v737_v20, %v574_v34 }
 0x166   : > { %v1505_v40 = vpop.eup %1504  ;;  %v914_v42 = vadd.f32 1.0, %v1503_v36  ;;  %v504_v43 = vpop.f32.mrf.mxu0 }
 0x167   : > { %1132 = vst [vmem:[%s1748_s30 + $0x158] sm:$0xff] %v1083_v37  ;;  %v1011_v44 = vmax.f32 %v1505_v40, 0.0  ;;  %1510 = vpow2.f32 %v839_v38  ;;  %v792_v45 = vsub.f32 0.0, %v738_v39  ;;  %v505_v46 = vadd.f32 %v1825_v49, %v504_v43 }
 0x168   : > { %1512 = vrcp.f32 %v914_v42 }
 0x169   : > { %v1507_v48 = vpop.eup %1506  ;;  %v1060_v50 = vmin.f32 %v1011_v44, 1.0  ;;  %v887_v51 = vmul.f32 1.442695, %v792_v45  ;;  %v669_v32 = vadd.f32 %v668_v35, %v505_v46 }
 0x16a   : > { %v1509_v52 = vpop.eup %1508  ;;  %v938_v54 = vadd.f32 1.0, %v1507_v48  ;;  %v576_v55 = vpop.f32.mrf.mxu2 }
 0x16b   : > { %1109 = vst [vmem:[%s1748_s30 + $0xa0] sm:$0xff] %v1060_v50  ;;  %v1035_v56 = vmax.f32 %v1509_v52, 0.0  ;;  %1514 = vpow2.f32 %v887_v51  ;;  %v769_v57 = vsub.f32 0.0, %v669_v32  ;;  %v577_v58 = vadd.f32 %v1825_v49, %v576_v55 }
 0x16c   : > { %1516 = vrcp.f32 %v938_v54  ;;  %v743_v12 = vpop.f32.mrf.mxu3 }
 0x16d   : > { %v671_v59 = vpop.f32.mrf.mxu1  ;;  %v1511_v60 = vpop.eup %1510  ;;  %v1084_v61 = vmin.f32 %v1035_v56, 1.0  ;;  %v841_v62 = vmul.f32 1.442695, %v769_v57  ;;  %v741_v0 = vadd.f32 %v740_v47, %v577_v58 }
 0x16e   : > { %v672_v63 = vadd.f32 %v671_v59, %v508_v53  ;;  %v1513_v1 = vpop.eup %1512  ;;  %v915_v2 = vadd.f32 1.0, %v1511_v60 }
 0x16f   : > { %1133 = vst [vmem:[%s1748_s30 + $0x160] sm:$0xff] %v1084_v61  ;;  %v1012_v41 = vmax.f32 %v1513_v1, 0.0  ;;  %1518 = vpow2.f32 %v841_v62  ;;  %v793_v4 = vsub.f32 0.0, %v741_v0 }
 0x170   : > { %v770_v3 = vsub.f32 0.0, %v672_v63  ;;  %1520 = vrcp.f32 %v915_v2 }
 0x171   : > { %v1515_v5 = vpop.eup %1514  ;;  %v1061_v6 = vmin.f32 %v1012_v41, 1.0  ;;  %v889_v8 = vmul.f32 1.442695, %v793_v4 }
 0x172   : > { %v843_v7 = vmul.f32 1.442695, %v770_v3  ;;  %v1517_v9 = vpop.eup %1516  ;;  %v939_v10 = vadd.f32 1.0, %v1515_v5  ;;  %v579_v11 = vpop.f32.mrf.mxu2 }
 0x173   : > { %1110 = vst [vmem:[%s1748_s30 + $0xa8] sm:$0xff] %v1061_v6  ;;  %v1036_v13 = vmax.f32 %v1517_v9, 0.0  ;;  %v580_v14 = vadd.f32 %v1825_v49, %v579_v11 }
 0x174   : > { %1522 = vpow2.f32 %v843_v7 }
 0x175   : > { %1524 = vrcp.f32 %v939_v10  ;;  %v1519_v15 = vpop.eup %1518  ;;  %v1085_v16 = vmin.f32 %v1036_v13, 1.0  ;;  %v744_v17 = vadd.f32 %v743_v12, %v580_v14 }
 0x176   : > { %1526 = vpow2.f32 %v889_v8  ;;  %v1521_v18 = vpop.eup %1520  ;;  %v916_v19 = vadd.f32 1.0, %v1519_v15 }
 0x177   : > { %1134 = vst [vmem:[%s1748_s30 + $0x168] sm:$0xff] %v1085_v16  ;;  %v1013_v20 = vmax.f32 %v1521_v18, 0.0  ;;  %v794_v21 = vsub.f32 0.0, %v744_v17 }
 0x178   : > { %1528 = vrcp.f32 %v916_v19 }
 0x179   : > { %v1062_v23 = vmin.f32 %v1013_v20, 1.0  ;;  %v891_v24 = vmul.f32 1.442695, %v794_v21 }
 0x17a   : > { %v1523_v22 = vpop.eup %1522 }
 0x17b   : > { %v1525_v25 = vpop.eup %1524  ;;  %v917_v26 = vadd.f32 1.0, %v1523_v22  ;;  %1111 = vst [vmem:[%s1748_s30 + $0xb0] sm:$0xff] %v1062_v23  ;;  %1530 = vpow2.f32 %v891_v24 }
 0x17c   : > { %v1527_v49 = vpop.eup %1526  ;;  %v1037_v27 = vmax.f32 %v1525_v25, 0.0 }
 0x17d   : > { %1532 = vrcp.f32 %v917_v26  ;;  %v940_v28 = vadd.f32 1.0, %v1527_v49 }
 0x17e   : > { %v1086_v29 = vmin.f32 %v1037_v27, 1.0  ;;  %v1529_v30 = vpop.eup %1528 }
 0x17f   : > { %1534 = vrcp.f32 %v940_v28  ;;  %v1014_v31 = vmax.f32 %v1529_v30, 0.0 }
 0x180   : > { %1135 = vst [vmem:[%s1748_s30 + $0x170] sm:$0xff] %v1086_v29 }
 0x181   : > { %v1531_v33 = vpop.eup %1530  ;;  %v1063_v34 = vmin.f32 %v1014_v31, 1.0 }
 0x182   : > { %v941_v36 = vadd.f32 1.0, %v1531_v33 }
 0x183   : > { %v1533_v35 = vpop.eup %1532  ;;  %1112 = vst [vmem:[%s1748_s30 + $0xb8] sm:$0xff] %v1063_v34 }
 0x184   : > { %v1015_v37 = vmax.f32 %v1533_v35, 0.0  ;;  %1536 = vrcp.f32 %v941_v36 }
 0x185   : > { %v1535_v38 = vpop.eup %1534 }
 0x186   : > { %v1064_v39 = vmin.f32 %v1015_v37, 1.0  ;;  %v1038_v40 = vmax.f32 %v1535_v38, 0.0 }
 0x188   : > { %1113 = vst [vmem:[%s1748_s30 + $0xc0] sm:$0xff] %v1064_v39  ;;  %v1087_v42 = vmin.f32 %v1038_v40, 1.0 }
 0x18a   : > { %1136 = vst [vmem:[%s1748_s30 + $0x178] sm:$0xff] %v1087_v42  ;;  %v1537_v43 = vpop.eup %1536 }
 0x18b   : > { %v1039_v44 = vmax.f32 %v1537_v43, 0.0 }
 0x18d   : > { %v1088_v45 = vmin.f32 %v1039_v44, 1.0 }
 0x18f   : > { %1137 = vst [vmem:[%s1748_s30 + $0x180] sm:$0xff] %v1088_v45 }
 0x190 PF: > { %s13_s14 = sadd.s32 1, %s1561_s14   ;;  %s1877_s12 = smov %s1557_s13 }
 0x191   : > { %p10_p5 = scmp.ge.s32.totalorder %s13_s14, 6   ;;  %s1878_s13 = smov %s1880_s15 }
 0x193   :  { %12 = sbr.rel (!%p10_p5) target bundleno = 2 (0x2), region = 68 }

</bundles_post_ra>
